<compile_context>
chip_gen: v5e
topology: v5e:2x2
jax: 0.10.0
libtpu: 0.0.40
codegen_flags: <defaults>
</compile_context>

<pallas_src>
import jax
import jax.numpy as jnp
from jax.experimental import pallas as pl
from jax.experimental.pallas import tpu as pltpu


TILE = 256  # row/col tile for both kernels (native MXU width on v6e/v7x)


def _round_up(x, m):
    return ((x + m - 1) // m) * m


# -----------------------------------------------------------------------------
# Projection kernel: Linear(H,H) -> ELU -> Linear(H,O) for za AND zb in one
# call. Weights use constant index maps -> DMA'd once, VMEM-resident across the
# row-tile grid. Emits:
#   m    = (za_proj + zb_proj)/2                  (f32, feeds the embedding)
#   pa_n = za_proj / ||za_proj|| / sqrt(tau)      (bf16, feeds the loss kernel)
#   pb_n = zb_proj / ||zb_proj|| / sqrt(tau)
# -----------------------------------------------------------------------------
def make_proj_kernel(tau):
    inv_sqrt_tau = 1.0 / float(tau) ** 0.5

    def proj_kernel(za_ref, zb_ref, w1_ref, b1_ref, w2_ref, b2_ref,
                    pan_ref, pbn_ref, m_ref):
        w1 = w1_ref[...]
        b1 = b1_ref[...]
        w2 = w2_ref[...]
        b2 = b2_ref[...]

        def mlp(x):
            h = jnp.dot(x, w1, preferred_element_type=jnp.float32) + b1
            # ELU(alpha=1); exp only sees min(h, 0) so the dead branch can't overflow.
            h = jnp.where(h > 0, h, jnp.exp(jnp.minimum(h, 0.0)) - 1.0)
            return jnp.dot(h, w2, preferred_element_type=jnp.float32) + b2

        pa = mlp(za_ref[...])
        pb = mlp(zb_ref[...])
        m_ref[...] = (pa + pb) * 0.5

        sa = jax.lax.rsqrt(jnp.sum(pa * pa, axis=-1, keepdims=True)) * inv_sqrt_tau
        sb = jax.lax.rsqrt(jnp.sum(pb * pb, axis=-1, keepdims=True)) * inv_sqrt_tau
        pan_ref[...] = (pa * sa).astype(pan_ref.dtype)
        pbn_ref[...] = (pb * sb).astype(pbn_ref.dtype)

    return proj_kernel


# -----------------------------------------------------------------------------
# Flash-style tiled loss kernel over (i, j) blocks of the NxN similarity matrix
# (never materialized). Inputs are pre-normalized + tau-folded bf16 rows.
#   a->b: row stats accumulate over the inner j axis (scratch, reset at j==0),
#         per-row loss written at j == nj-1.
#   b->a: per-(i-block, j-block) partial column stats written every step, so
#         the i axis carries no state and can be 'parallel' (v7x megacore).
# -----------------------------------------------------------------------------
def make_loss_kernel(n_valid, ti, tj, needs_mask):
    def kernel(pan_ref, pbn_ref, pos_ref, post_ref,
               lrow_ref, csum_ref, cpos_ref, row_sum, row_pos):
        i = pl.program_id(0)
        j = pl.program_id(1)
        nj = pl.num_programs(1)

        @pl.when(j == 0)
        def _init_rows():
            row_sum[...] = jnp.zeros_like(row_sum)
            row_pos[...] = jnp.zeros_like(row_pos)

        # bf16 x bf16 -> f32 on the MXU; inputs already carry the norm + 1/sqrt(tau),
        # so this is cos/tau directly.
        logits = jnp.einsum('id,jd->ij', pan_ref[...], pbn_ref[...],
                            preferred_element_type=jnp.float32)      # (TI, TJ) f32
        sim = jnp.exp(logits)

        if needs_mask:
            row_ids = i * ti + jax.lax.broadcasted_iota(jnp.int32, (ti, 1), 0)
            col_ids = j * tj + jax.lax.broadcasted_iota(jnp.int32, (1, tj), 1)
            sim = jnp.where((row_ids < n_valid) & (col_ids < n_valid), sim, 0.0)

        pos_a = pos_ref[...].astype(jnp.float32)                     # pos[i rows, j cols]
        pos_b = jnp.transpose(post_ref[...].astype(jnp.float32))     # pos.T[i rows, j cols] (XLU)

        # a->b: running row reductions over the inner j axis.
        row_sum[...] = row_sum[...] + jnp.sum(sim, axis=1, keepdims=True)
        row_pos[...] = row_pos[...] + jnp.sum(sim * pos_a, axis=1, keepdims=True)

        # b->a: per-block partial column stats (no cross-i scratch).
        csum_ref[...] = jnp.sum(sim, axis=0, keepdims=True).reshape(1, 1, tj)
        cpos_ref[...] = jnp.sum(sim * pos_b, axis=0, keepdims=True).reshape(1, 1, tj)

        @pl.when(j == nj - 1)
        def _finish_rows():
            # -log(row_pos / (row_sum + eps)) == log(row_sum + eps) - log(row_pos)
            lrow_ref[...] = jnp.log(row_sum[...] + 1e-8) - jnp.log(row_pos[...])

    return kernel


def contrast_forward(za, zb, pos, params, tau, lam):
    w1, b1, w2, b2 = params    # PyTorch layout: w1 [H,H], b1 [H], w2 [O,H], b2 [O]
    n, h = za.shape
    o = w2.shape[0]

    n_pad = _round_up(n, TILE)
    needs_mask = n_pad != n

    def pad_rows(a):
        return a if a.shape[0] == n_pad else jnp.pad(a, ((0, n_pad - n), (0, 0)))

    za_p = pad_rows(za.astype(jnp.float32))
    zb_p = pad_rows(zb.astype(jnp.float32))
    w1t = w1.T.astype(jnp.float32)
    w2t = w2.T.astype(jnp.float32)
    b1r = b1.reshape(1, -1).astype(jnp.float32)
    b2r = b2.reshape(1, -1).astype(jnp.float32)

    # ---- projection pass (weights VMEM-resident across the row-tile grid) ----
    pan, pbn, m = pl.pallas_call(
        make_proj_kernel(tau),
        out_shape=(jax.ShapeDtypeStruct((n_pad, o), jnp.bfloat16),
                   jax.ShapeDtypeStruct((n_pad, o), jnp.bfloat16),
                   jax.ShapeDtypeStruct((n_pad, o), jnp.float32)),
        grid=(n_pad // TILE,),
        in_specs=[
            pl.BlockSpec((TILE, h), lambda r: (r, 0)),
            pl.BlockSpec((TILE, h), lambda r: (r, 0)),
            pl.BlockSpec((h, h), lambda r: (0, 0)),
            pl.BlockSpec((1, h), lambda r: (0, 0)),
            pl.BlockSpec((h, o), lambda r: (0, 0)),
            pl.BlockSpec((1, o), lambda r: (0, 0)),
        ],
        out_specs=(
            pl.BlockSpec((TILE, o), lambda r: (r, 0)),
            pl.BlockSpec((TILE, o), lambda r: (r, 0)),
            pl.BlockSpec((TILE, o), lambda r: (r, 0)),
        ),
        compiler_params=pltpu.CompilerParams(
            dimension_semantics=("parallel",)),
    )(za_p, zb_p, w1t, b1r, w2t, b2r)

    # 0/1 positive mask as bf16 (exact for a mask, halves HBM traffic). The b->a
    # direction reads the SAME array through a (j, i) BlockSpec view and does a
    # per-tile XLU transpose in-kernel -- no pos.T materialization in HBM.
    pos_p = pos.astype(jnp.bfloat16)
    if needs_mask:
        pos_p = jnp.pad(pos_p, ((0, n_pad - n), (0, n_pad - n)))

    ni = n_pad // TILE
    nj = n_pad // TILE

    # ---- tiled InfoNCE loss pass ----
    lrow, csum_part, cpos_part = pl.pallas_call(
        make_loss_kernel(n, TILE, TILE, needs_mask),
        out_shape=(jax.ShapeDtypeStruct((n_pad, 1), jnp.float32),
                   jax.ShapeDtypeStruct((ni, 1, n_pad), jnp.float32),
                   jax.ShapeDtypeStruct((ni, 1, n_pad), jnp.float32)),
        grid=(ni, nj),
        in_specs=[
            pl.BlockSpec((TILE, o), lambda i, j: (i, 0)),        # pa_n rows (i block)
            pl.BlockSpec((TILE, o), lambda i, j: (j, 0)),        # pb_n rows (j block)
            pl.BlockSpec((TILE, TILE), lambda i, j: (i, j)),     # pos[i, j] tile
            pl.BlockSpec((TILE, TILE), lambda i, j: (j, i)),     # pos[j, i] tile (same array)
        ],
        out_specs=(
            pl.BlockSpec((TILE, 1), lambda i, j: (i, 0)),        # per-row a->b loss
            pl.BlockSpec((1, 1, TILE), lambda i, j: (i, 0, j)),  # partial col sums
            pl.BlockSpec((1, 1, TILE), lambda i, j: (i, 0, j)),  # partial col pos sums
        ),
        scratch_shapes=[
            pltpu.VMEM((TILE, 1), jnp.float32),   # row_sum
            pltpu.VMEM((TILE, 1), jnp.float32),   # row_pos
        ],
        compiler_params=pltpu.CompilerParams(
            dimension_semantics=("parallel", "arbitrary")),
    )(pan, pbn, pos_p, pos_p)

    # Tiny exact f32 wrapper combines (padded rows/cols sliced away).
    lori_a = jnp.mean(lrow[:n, 0])
    col_sum = jnp.sum(csum_part[:, 0, :n], axis=0)
    col_pos = jnp.sum(cpos_part[:, 0, :n], axis=0)
    lori_b = jnp.mean(jnp.log(col_sum + 1e-8) - jnp.log(col_pos))

    loss = lam * lori_a + (1.0 - lam) * lori_b
    m_s = m[:n]
    emb = jnp.concatenate([m_s, m_s], axis=1)   # == (cat(pa,pb) + cat(pb,pa)) / 2
    return loss, emb


# Pure-JAX reference (mirrors the PyTorch module) for a correctness check.
def reference_forward(za, zb, pos, params, tau, lam):
    w1, b1, w2, b2 = params
    hi = jax.lax.Precision.HIGHEST

    def proj(x):
        h = jnp.dot(x, w1.T, precision=hi) + b1
        h = jnp.where(h > 0, h, jnp.exp(jnp.minimum(h, 0.0)) - 1.0)
        return jnp.dot(h, w2.T, precision=hi) + b2

    pa, pb = proj(za), proj(zb)
    na = jnp.linalg.norm(pa, axis=-1, keepdims=True)
    nb = jnp.linalg.norm(pb, axis=-1, keepdims=True)
    sim = jnp.exp(jnp.dot(pa, pb.T, precision=hi) / (na * nb.T) / tau)
    a2b = sim / (jnp.sum(sim, axis=1, keepdims=True) + 1e-8)
    lori_a = -jnp.log(jnp.sum(a2b * pos, axis=-1)).mean()
    b2a = sim.T / (jnp.sum(sim.T, axis=1, keepdims=True) + 1e-8)
    lori_b = -jnp.log(jnp.sum(b2a * pos, axis=-1)).mean()
    emb = (jnp.concatenate([pa, pb], 1) + jnp.concatenate([pb, pa], 1)) / 2
    return lam * lori_a + (1 - lam) * lori_b, emb


if __name__ == "__main__":
    key = jax.random.PRNGKey(0)
    N, H, O = 384, 32, 16        # N not a multiple of 256 -> exercises padding + masking
    tau, lam = 0.8, 0.5

    k1, k2, k3, k4, k5, k6, k7 = jax.random.split(key, 7)
    za = jax.random.normal(k1, (N, H), jnp.float32)
    zb = jax.random.normal(k2, (N, H), jnp.float32)
    # dense positive mask (module calls pos.to_dense()): diagonal positives + extras
    pos = (jax.random.uniform(k3, (N, N)) < 0.05).astype(jnp.float32)
    pos = jnp.maximum(pos, jnp.eye(N, dtype=jnp.float32))

    def xavier_normal(k, shape, gain=1.414):
        fan_out, fan_in = shape
        std = gain * (2.0 / (fan_in + fan_out)) ** 0.5
        return std * jax.random.normal(k, shape, jnp.float32)

    w1 = xavier_normal(k4, (H, H))
    b1 = jax.random.uniform(k5, (H,), jnp.float32, -1.0 / H ** 0.5, 1.0 / H ** 0.5)
    w2 = xavier_normal(k6, (O, H))
    b2 = jax.random.uniform(k7, (O,), jnp.float32, -1.0 / H ** 0.5, 1.0 / H ** 0.5)
    params = (w1, b1, w2, b2)

    loss, emb = contrast_forward(za, zb, pos, params, tau, lam)
    jax.block_until_ready((loss, emb))

    loss_ref, emb_ref = reference_forward(za, zb, pos, params, tau, lam)
    assert emb.shape == (N, 2 * O)
    assert bool(jnp.isfinite(loss))
    # loose tolerance: the cosine matmul runs in bf16 (per perf review), rest is f32
    assert abs(float(loss) - float(loss_ref)) <= 0.02 + 0.05 * abs(float(loss_ref)), \
        (float(loss), float(loss_ref))
    assert bool(jnp.allclose(emb, emb_ref, rtol=1e-2, atol=1e-2))
    print("KERNEL_OK")
</pallas_src>

<mosaic_0001>
module attributes {stable_mosaic.version = 11 : i64} {
  func.func @proj_kernel(%arg0: i32, %arg1: memref<256x32xf32, #tpu.memory_space<vmem>>, %arg2: memref<256x32xf32, #tpu.memory_space<vmem>>, %arg3: memref<32x32xf32, #tpu.memory_space<vmem>>, %arg4: memref<1x32xf32, #tpu.memory_space<vmem>>, %arg5: memref<32x16xf32, #tpu.memory_space<vmem>>, %arg6: memref<1x16xf32, #tpu.memory_space<vmem>>, %arg7: memref<256x16xbf16, #tpu.memory_space<vmem>>, %arg8: memref<256x16xbf16, #tpu.memory_space<vmem>>, %arg9: memref<256x16xf32, #tpu.memory_space<vmem>>) attributes {dimension_semantics = [#tpu.dimension_semantics<parallel>], iteration_bounds = array<i64: 2>, scalar_prefetch = 0 : i64, scratch_operands = 0 : i64, tpu.core_type = #tpu.core_type<tc>, window_params = [{transform_indices = @transform_0, window_bounds = array<i64: 256, 32>}, {transform_indices = @transform_1, window_bounds = array<i64: 256, 32>}, {pipeline_mode = #tpu.pipeline_mode<synchronous>, transform_indices = @transform_2, window_bounds = array<i64: 32, 32>}, {pipeline_mode = #tpu.pipeline_mode<synchronous>, transform_indices = @transform_3, window_bounds = array<i64: 1, 32>}, {pipeline_mode = #tpu.pipeline_mode<synchronous>, transform_indices = @transform_4, window_bounds = array<i64: 32, 16>}, {pipeline_mode = #tpu.pipeline_mode<synchronous>, transform_indices = @transform_5, window_bounds = array<i64: 1, 16>}, {transform_indices = @transform_6, window_bounds = array<i64: 256, 16>}, {transform_indices = @transform_7, window_bounds = array<i64: 256, 16>}, {transform_indices = @transform_8, window_bounds = array<i64: 256, 16>}]} {
    %c0 = arith.constant 0 : index
    %c0_0 = arith.constant 0 : index
    %0 = vector.load %arg3[%c0, %c0_0] : memref<32x32xf32, #tpu.memory_space<vmem>>, vector<32x32xf32>
    %c0_1 = arith.constant 0 : index
    %c0_2 = arith.constant 0 : index
    %1 = vector.load %arg4[%c0_1, %c0_2] : memref<1x32xf32, #tpu.memory_space<vmem>>, vector<1x32xf32>
    %c0_3 = arith.constant 0 : index
    %c0_4 = arith.constant 0 : index
    %2 = vector.load %arg5[%c0_3, %c0_4] : memref<32x16xf32, #tpu.memory_space<vmem>>, vector<32x16xf32>
    %c0_5 = arith.constant 0 : index
    %c0_6 = arith.constant 0 : index
    %3 = vector.load %arg6[%c0_5, %c0_6] : memref<1x16xf32, #tpu.memory_space<vmem>>, vector<1x16xf32>
    %c0_7 = arith.constant 0 : index
    %c0_8 = arith.constant 0 : index
    %4 = vector.load %arg1[%c0_7, %c0_8] : memref<256x32xf32, #tpu.memory_space<vmem>>, vector<256x32xf32>
    %cst = arith.constant dense<0.000000e+00> : vector<256x32xf32>
    %5 = tpu.matmul %4, %0, %cst {dimension_numbers = #tpu.dot_dimension_numbers<[1], [0], [0], [1], [0, 0, 1, 1], [], []>} : vector<256x32xf32>, vector<32x32xf32>, vector<256x32xf32> -> vector<256x32xf32>
    %6 = vector.broadcast %1 : vector<1x32xf32> to vector<256x32xf32>
    %7 = arith.addf %5, %6 : vector<256x32xf32>
    %cst_9 = arith.constant 0.000000e+00 : f32
    %8 = vector.broadcast %cst_9 : f32 to vector<256x32xf32>
    %9 = arith.cmpf ogt, %7, %8 : vector<256x32xf32>
    %cst_10 = arith.constant 0.000000e+00 : f32
    %10 = vector.broadcast %cst_10 : f32 to vector<256x32xf32>
    %11 = arith.minimumf %7, %10 : vector<256x32xf32>
    %12 = math.exp %11 : vector<256x32xf32>
    %cst_11 = arith.constant 1.000000e+00 : f32
    %13 = vector.broadcast %cst_11 : f32 to vector<256x32xf32>
    %14 = arith.subf %12, %13 : vector<256x32xf32>
    %15 = arith.select %9, %7, %14 : vector<256x32xi1>, vector<256x32xf32>
    %cst_12 = arith.constant dense<0.000000e+00> : vector<256x16xf32>
    %16 = tpu.matmul %15, %2, %cst_12 {dimension_numbers = #tpu.dot_dimension_numbers<[1], [0], [0], [1], [0, 0, 1, 1], [], []>} : vector<256x32xf32>, vector<32x16xf32>, vector<256x16xf32> -> vector<256x16xf32>
    %17 = vector.broadcast %3 : vector<1x16xf32> to vector<256x16xf32>
    %18 = arith.addf %16, %17 : vector<256x16xf32>
    %c0_13 = arith.constant 0 : index
    %c0_14 = arith.constant 0 : index
    %19 = vector.load %arg2[%c0_13, %c0_14] : memref<256x32xf32, #tpu.memory_space<vmem>>, vector<256x32xf32>
    %cst_15 = arith.constant dense<0.000000e+00> : vector<256x32xf32>
    %20 = tpu.matmul %19, %0, %cst_15 {dimension_numbers = #tpu.dot_dimension_numbers<[1], [0], [0], [1], [0, 0, 1, 1], [], []>} : vector<256x32xf32>, vector<32x32xf32>, vector<256x32xf32> -> vector<256x32xf32>
    %21 = vector.broadcast %1 : vector<1x32xf32> to vector<256x32xf32>
    %22 = arith.addf %20, %21 : vector<256x32xf32>
    %cst_16 = arith.constant 0.000000e+00 : f32
    %23 = vector.broadcast %cst_16 : f32 to vector<256x32xf32>
    %24 = arith.cmpf ogt, %22, %23 : vector<256x32xf32>
    %cst_17 = arith.constant 0.000000e+00 : f32
    %25 = vector.broadcast %cst_17 : f32 to vector<256x32xf32>
    %26 = arith.minimumf %22, %25 : vector<256x32xf32>
    %27 = math.exp %26 : vector<256x32xf32>
    %cst_18 = arith.constant 1.000000e+00 : f32
    %28 = vector.broadcast %cst_18 : f32 to vector<256x32xf32>
    %29 = arith.subf %27, %28 : vector<256x32xf32>
    %30 = arith.select %24, %22, %29 : vector<256x32xi1>, vector<256x32xf32>
    %cst_19 = arith.constant dense<0.000000e+00> : vector<256x16xf32>
    %31 = tpu.matmul %30, %2, %cst_19 {dimension_numbers = #tpu.dot_dimension_numbers<[1], [0], [0], [1], [0, 0, 1, 1], [], []>} : vector<256x32xf32>, vector<32x16xf32>, vector<256x16xf32> -> vector<256x16xf32>
    %32 = vector.broadcast %3 : vector<1x16xf32> to vector<256x16xf32>
    %33 = arith.addf %31, %32 : vector<256x16xf32>
    %34 = arith.addf %18, %33 : vector<256x16xf32>
    %cst_20 = arith.constant 5.000000e-01 : f32
    %35 = vector.broadcast %cst_20 : f32 to vector<256x16xf32>
    %36 = arith.mulf %34, %35 : vector<256x16xf32>
    %c0_21 = arith.constant 0 : index
    %c0_22 = arith.constant 0 : index
    %37 = vector.load %arg9[%c0_21, %c0_22] : memref<256x16xf32, #tpu.memory_space<vmem>>, vector<256x16xf32>
    tpu.vector_store %arg9[%c0_21, %c0_22], %36 {strides = array<i32>} : memref<256x16xf32, #tpu.memory_space<vmem>>, vector<256x16xf32>,
    %38 = arith.mulf %18, %18 : vector<256x16xf32>
    %cst_23 = arith.constant dense<0.000000e+00> : vector<256xf32>
    %39 = vector.multi_reduction <add>, %38, %cst_23 [1] : vector<256x16xf32> to vector<256xf32>
    %40 = vector.shape_cast %39 : vector<256xf32> to vector<256x1xf32>
    %41 = math.rsqrt %40 : vector<256x1xf32>
    %cst_24 = arith.constant 1.11803401 : f32
    %42 = vector.broadcast %cst_24 : f32 to vector<256x1xf32>
    %43 = arith.mulf %41, %42 : vector<256x1xf32>
    %44 = arith.mulf %33, %33 : vector<256x16xf32>
    %cst_25 = arith.constant dense<0.000000e+00> : vector<256xf32>
    %45 = vector.multi_reduction <add>, %44, %cst_25 [1] : vector<256x16xf32> to vector<256xf32>
    %46 = vector.shape_cast %45 : vector<256xf32> to vector<256x1xf32>
    %47 = math.rsqrt %46 : vector<256x1xf32>
    %cst_26 = arith.constant 1.11803401 : f32
    %48 = vector.broadcast %cst_26 : f32 to vector<256x1xf32>
    %49 = arith.mulf %47, %48 : vector<256x1xf32>
    %50 = vector.broadcast %43 : vector<256x1xf32> to vector<256x16xf32>
    %51 = arith.mulf %18, %50 : vector<256x16xf32>
    %52 = arith.truncf %51 : vector<256x16xf32> to vector<256x16xbf16>
    %c0_27 = arith.constant 0 : index
    %c0_28 = arith.constant 0 : index
    %53 = vector.load %arg7[%c0_27, %c0_28] : memref<256x16xbf16, #tpu.memory_space<vmem>>, vector<256x16xbf16>
    tpu.vector_store %arg7[%c0_27, %c0_28], %52 {strides = array<i32>} : memref<256x16xbf16, #tpu.memory_space<vmem>>, vector<256x16xbf16>,
    %54 = vector.broadcast %49 : vector<256x1xf32> to vector<256x16xf32>
    %55 = arith.mulf %33, %54 : vector<256x16xf32>
    %56 = arith.truncf %55 : vector<256x16xf32> to vector<256x16xbf16>
    %c0_29 = arith.constant 0 : index
    %c0_30 = arith.constant 0 : index
    %57 = vector.load %arg8[%c0_29, %c0_30] : memref<256x16xbf16, #tpu.memory_space<vmem>>, vector<256x16xbf16>
    tpu.vector_store %arg8[%c0_29, %c0_30], %56 {strides = array<i32>} : memref<256x16xbf16, #tpu.memory_space<vmem>>, vector<256x16xbf16>,
    return
  }
  func.func @transform_0(%arg0: i32) -> (i32, i32) {
    %c0_i32 = arith.constant 0 : i32
    %c0_i32_0 = arith.constant 0 : i32
    return %arg0, %c0_i32 : i32, i32
  }
  func.func @transform_1(%arg0: i32) -> (i32, i32) {
    %c0_i32 = arith.constant 0 : i32
    %c0_i32_0 = arith.constant 0 : i32
    return %arg0, %c0_i32 : i32, i32
  }
  func.func @transform_2(%arg0: i32) -> (i32, i32) {
    %c0_i32 = arith.constant 0 : i32
    %c0_i32_0 = arith.constant 0 : i32
    %c0_i32_1 = arith.constant 0 : i32
    return %c0_i32, %c0_i32_0 : i32, i32
  }
  func.func @transform_3(%arg0: i32) -> (i32, i32) {
    %c0_i32 = arith.constant 0 : i32
    %c0_i32_0 = arith.constant 0 : i32
    %c0_i32_1 = arith.constant 0 : i32
    return %c0_i32, %c0_i32_0 : i32, i32
  }
  func.func @transform_4(%arg0: i32) -> (i32, i32) {
    %c0_i32 = arith.constant 0 : i32
    %c0_i32_0 = arith.constant 0 : i32
    %c0_i32_1 = arith.constant 0 : i32
    return %c0_i32, %c0_i32_0 : i32, i32
  }
  func.func @transform_5(%arg0: i32) -> (i32, i32) {
    %c0_i32 = arith.constant 0 : i32
    %c0_i32_0 = arith.constant 0 : i32
    %c0_i32_1 = arith.constant 0 : i32
    return %c0_i32, %c0_i32_0 : i32, i32
  }
  func.func @transform_6(%arg0: i32) -> (i32, i32) {
    %c0_i32 = arith.constant 0 : i32
    %c0_i32_0 = arith.constant 0 : i32
    return %arg0, %c0_i32 : i32, i32
  }
  func.func @transform_7(%arg0: i32) -> (i32, i32) {
    %c0_i32 = arith.constant 0 : i32
    %c0_i32_0 = arith.constant 0 : i32
    return %arg0, %c0_i32 : i32, i32
  }
  func.func @transform_8(%arg0: i32) -> (i32, i32) {
    %c0_i32 = arith.constant 0 : i32
    %c0_i32_0 = arith.constant 0 : i32
    return %arg0, %c0_i32 : i32, i32
  }
}

</mosaic_0001>

<bundles_post_ra>
// kernel: tpu_custom_call.1
= control target key start
LH: loop header
LB: loop body
LE: loop exit
PB: predicated region body
PF: predicated region fallthrough
CT: control target
= control target key end

     0   :  { %s3576_s27 = smov 0   ;;  %s5248_s0 = inlined_call_operand.vmem [shape: f32[512,32], index: 0, kind: input, shape index: {}]   ;;  %s5249_s1 = inlined_call_operand.vmem [shape: f32[512,32], index: 1, kind: input, shape index: {}]   ;;  %s5250_s2 = inlined_call_operand.vmem [shape: f32[32,32], index: 2, kind: input, shape index: {}]   ;;  %s5251_s3 = inlined_call_operand.vmem [shape: f32[1,32], index: 3, kind: input, shape index: {}]   ;;  %s5252_s4 = inlined_call_operand.vmem [shape: f32[32,16], index: 4, kind: input, shape index: {}]   ;;  %s5253_s5 = inlined_call_operand.vmem [shape: f32[1,16], index: 5, kind: input, shape index: {}]   ;;  %s5254_s6 = inlined_call_operand.vmem [shape: bf16[512,16], index: 6, kind: output, shape index: {0}]   ;;  %s5255_s7 = inlined_call_operand.vmem [shape: bf16[512,16], index: 7, kind: output, shape index: {1}]   ;;  %s5256_s8 = inlined_call_operand.vmem [shape: f32[512,16], index: 8, kind: output, shape index: {2}]  }
   0x1 LB: > { %s3045_s28 = sadd.s32 4294967295, %s3529_s27   ;;  %p3049_p0 = scmp.ge.s32.totalorder %s3529_s27, 1  ;;  %s3529_s27 = sphi %s3576_s27, %s19_s27  }
   0x2   : > { %p279_p1 = scmp.lt.s32.totalorder %s3529_s27, 3 }
   0x4   : > { %p280_p2 = pnand %p3049_p0, %p279_p1 }
   0x5   : > { %s3050_s11 = sshll.u32 (!%p280_p2), %s3045_s28, 5 }
   0x6   : > { %283 = sbr.rel (%p280_p2) target bundleno = 694 (0x2b6), region = 44  ;;  %p329_p3 = scmp.lt.s32.totalorder (!%p280_p2), %s3050_s11, 63 }
   0xb   : > { %v361_v0 = vld [vmem:[%s5250_s2 + $0x18] sm:$0xff]  ;;  %v360_v1 = vld [vmem:[%s5250_s2 + $0x10] sm:$0xff]  ;;  %v359_v2 = vld [vmem:[%s5250_s2 + $0x8] sm:$0xff]  ;;  %s5258_s11 = smov (!%p329_p3, %s3050_s11), 63  ;;  %vm403_vm0 = vcmask 261120  }
   0xc   : > { %512 = vmatpush.msra.mxu0 %v361_v0  ;;  %1157 = vmatpush.msra.mxu2 %v361_v0  ;;  %v358_v3 = vld [vmem:[%s5250_s2] sm:$0xff]  ;;  %s3599_s16 = sshll.u32 %s5258_s11, 3  ;;  %v366_v32 = vld [vmem:[%s5252_s4 + $0x18] sm:$0xff]  ;;  %v365_v33 = vld [vmem:[%s5252_s4 + $0x10] sm:$0xff] }
   0xd   : > { %s3605_s19 = scalar_lea.vmem %s5248_s0, %s3599_s16  ;;  %s3611_s22 = scalar_lea.vmem %s5249_s1, %s3599_s16  ;;  %916 = vmatpush.msra.mxu1 %v366_v32  ;;  %1558 = vmatpush.msra.mxu3 %v366_v32  ;;  %v364_v34 = vld [vmem:[%s5252_s4 + $0x8] sm:$0xff]  ;;  %v363_v35 = vld [vmem:[%s5252_s4] sm:$0xff] }
   0xe   : > { %513 = vmatpush.msra.mxu0 %v360_v1  ;;  %1158 = vmatpush.msra.mxu2 %v360_v1  ;;  %v368_v4 = vld [vmem:[%s3605_s19] sm:$0xff]  ;;  %v369_v6 = vld [vmem:[%s3605_s19 + $0x8] sm:$0xff]  ;;  %v370_v8 = vld [vmem:[%s3605_s19 + $0x10] sm:$0xff]  ;;  %s3863_s18 = scalar_lea.vmem %s5256_s8, %s3599_s16 }
   0xf   : > { %v1017_v5 = vld [vmem:[%s3611_s22] sm:$0xff]  ;;  %v1018_v7 = vld [vmem:[%s3611_s22 + $0x8] sm:$0xff]  ;;  %v1019_v9 = vld [vmem:[%s3611_s22 + $0x10] sm:$0xff]  ;;  %917 = vmatpush.msra.mxu1 %v365_v33  ;;  %1559 = vmatpush.msra.mxu3 %v365_v33 }
  0x10   : > { %514 = vmatpush.msra.mxu0 %v359_v2  ;;  %1159 = vmatpush.msra.mxu2 %v359_v2  ;;  %v371_v10 = vld [vmem:[%s3605_s19 + $0x18] sm:$0xff]  ;;  %v372_v12 = vld [vmem:[%s3605_s19 + $0x20] sm:$0xff]  ;;  %v373_v14 = vld [vmem:[%s3605_s19 + $0x28] sm:$0xff] }
  0x11   : > { %v1020_v11 = vld [vmem:[%s3611_s22 + $0x18] sm:$0xff]  ;;  %v1021_v13 = vld [vmem:[%s3611_s22 + $0x20] sm:$0xff]  ;;  %v1022_v15 = vld [vmem:[%s3611_s22 + $0x28] sm:$0xff]  ;;  %918 = vmatpush.msra.mxu1 %v364_v34  ;;  %1560 = vmatpush.msra.mxu3 %v364_v34 }
  0x12   : > { %515 = vmatpush.msra.mxu0 %v358_v3  ;;  %1160 = vmatpush.msra.mxu2 %v358_v3  ;;  %v374_v16 = vld [vmem:[%s3605_s19 + $0x30] sm:$0xff]  ;;  %v375_v18 = vld [vmem:[%s3605_s19 + $0x38] sm:$0xff]  ;;  %v376_v20 = vld [vmem:[%s3605_s19 + $0x40] sm:$0xff] }
  0x13   : > { %3060 = vmatmul.msk.f32.vlgmr.msra.gmra.mxu0 %vm403_vm0, %v368_v4  ;;  %3156 = vmatmul.msk.f32.vlgmr.msra.gmra.mxu2 %vm403_vm0, %v1017_v5  ;;  %v1023_v17 = vld [vmem:[%s3611_s22 + $0x30] sm:$0xff]  ;;  %v1024_v19 = vld [vmem:[%s3611_s22 + $0x38] sm:$0xff]  ;;  %v1025_v21 = vld [vmem:[%s3611_s22 + $0x40] sm:$0xff] }
  0x14   : > { %v377_v22 = vld [vmem:[%s3605_s19 + $0x48] sm:$0xff]  ;;  %v378_v24 = vld [vmem:[%s3605_s19 + $0x50] sm:$0xff]  ;;  %v379_v26 = vld [vmem:[%s3605_s19 + $0x58] sm:$0xff]  ;;  %919 = vmatpush.msra.mxu1 %v363_v35  ;;  %1561 = vmatpush.msra.mxu3 %v363_v35 }
  0x15   : > { %v1026_v23 = vld [vmem:[%s3611_s22 + $0x48] sm:$0xff]  ;;  %v1027_v25 = vld [vmem:[%s3611_s22 + $0x50] sm:$0xff]  ;;  %v1028_v27 = vld [vmem:[%s3611_s22 + $0x58] sm:$0xff] }
  0x16   : > { %v380_v28 = vld [vmem:[%s3605_s19 + $0x60] sm:$0xff]  ;;  %v381_v30 = vld [vmem:[%s3605_s19 + $0x68] sm:$0xff]  ;;  %v382_v36 = vld [vmem:[%s3605_s19 + $0x70] sm:$0xff] }
  0x17   : > { %v1029_v29 = vld [vmem:[%s3611_s22 + $0x60] sm:$0xff]  ;;  %v1030_v31 = vld [vmem:[%s3611_s22 + $0x68] sm:$0xff]  ;;  %v1031_v37 = vld [vmem:[%s3611_s22 + $0x70] sm:$0xff] }
  0x18   : > { %v383_v38 = vld [vmem:[%s3605_s19 + $0x78] sm:$0xff]  ;;  %v3692_v40 = vld [vmem:[%s5251_s3] ss:$0 sm:$0xff]  ;;  %v385_v50 = vld [vmem:[%s3605_s19 + $0x88] sm:$0xff] }
  0x19   : > { %v1032_v39 = vld [vmem:[%s3611_s22 + $0x78] sm:$0xff]  ;;  %v384_v42 = vld [vmem:[%s3605_s19 + $0x80] sm:$0xff]  ;;  %v1034_v51 = vld [vmem:[%s3611_s22 + $0x88] sm:$0xff] }
  0x1a   : > { %v1033_v43 = vld [vmem:[%s3611_s22 + $0x80] sm:$0xff]  ;;  %v386_v63 = vld [vmem:[%s3605_s19 + $0x90] sm:$0xff] }
  0x1b   : > { %3061 = vmatmul.msk.f32.gmra.mxu0 %vm403_vm0, %v369_v6  ;;  %3157 = vmatmul.msk.f32.gmra.mxu2 %vm403_vm0, %v1018_v7  ;;  %v1035_v0 = vld [vmem:[%s3611_s22 + $0x90] sm:$0xff]  ;;  %v1037_v32 = vld [vmem:[%s3611_s22 + $0xa0] sm:$0xff] }
  0x23   : > { %3062 = vmatmul.msk.f32.gmra.mxu0 %vm403_vm0, %v370_v8  ;;  %3158 = vmatmul.msk.f32.gmra.mxu2 %vm403_vm0, %v1019_v9 }
  0x2b   : > { %3063 = vmatmul.msk.f32.gmra.mxu0 %vm403_vm0, %v371_v10  ;;  %3159 = vmatmul.msk.f32.gmra.mxu2 %vm403_vm0, %v1020_v11 }
  0x33   : > { %3064 = vmatmul.msk.f32.gmra.mxu0 %vm403_vm0, %v372_v12  ;;  %3160 = vmatmul.msk.f32.gmra.mxu2 %vm403_vm0, %v1021_v13 }
  0x3b   : > { %3065 = vmatmul.msk.f32.gmra.mxu0 %vm403_vm0, %v373_v14  ;;  %3161 = vmatmul.msk.f32.gmra.mxu2 %vm403_vm0, %v1022_v15  ;;  %v387_v15 = vld [vmem:[%s3605_s19 + $0x98] sm:$0xff] }
  0x43   : > { %3066 = vmatmul.msk.f32.gmra.mxu0 %vm403_vm0, %v374_v16  ;;  %3162 = vmatmul.msk.f32.gmra.mxu2 %vm403_vm0, %v1023_v17  ;;  %v1036_v16 = vld [vmem:[%s3611_s22 + $0x98] sm:$0xff] }
  0x4b   : > { %3067 = vmatmul.msk.f32.gmra.mxu0 %vm403_vm0, %v375_v18  ;;  %3163 = vmatmul.msk.f32.gmra.mxu2 %vm403_vm0, %v1024_v19 }
  0x53   : > { %3068 = vmatmul.msk.f32.gmra.mxu0 %vm403_vm0, %v376_v20  ;;  %3164 = vmatmul.msk.f32.gmra.mxu2 %vm403_vm0, %v1025_v21 }
  0x5b   : > { %3069 = vmatmul.msk.f32.gmra.mxu0 %vm403_vm0, %v377_v22  ;;  %3165 = vmatmul.msk.f32.gmra.mxu2 %vm403_vm0, %v1026_v23 }
  0x63   : > { %3070 = vmatmul.msk.f32.gmra.mxu0 %vm403_vm0, %v378_v24  ;;  %3166 = vmatmul.msk.f32.gmra.mxu2 %vm403_vm0, %v1027_v25 }
  0x6b   : > { %3071 = vmatmul.msk.f32.gmra.mxu0 %vm403_vm0, %v379_v26  ;;  %3167 = vmatmul.msk.f32.gmra.mxu2 %vm403_vm0, %v1028_v27 }
  0x73   : > { %3072 = vmatmul.msk.f32.gmra.mxu0 %vm403_vm0, %v380_v28  ;;  %3168 = vmatmul.msk.f32.gmra.mxu2 %vm403_vm0, %v1029_v29 }
  0x7b   : > { %3073 = vmatmul.msk.f32.gmra.mxu0 %vm403_vm0, %v381_v30  ;;  %3169 = vmatmul.msk.f32.gmra.mxu2 %vm403_vm0, %v1030_v31  ;;  %v388_v31 = vld [vmem:[%s3605_s19 + $0xa0] sm:$0xff] }
  0x83   : > { %3074 = vmatmul.msk.f32.gmra.mxu0 %vm403_vm0, %v382_v36  ;;  %3170 = vmatmul.msk.f32.gmra.mxu2 %vm403_vm0, %v1031_v37 }
  0x8b   : > { %3075 = vmatmul.msk.f32.gmra.mxu0 %vm403_vm0, %v383_v38  ;;  %3171 = vmatmul.msk.f32.gmra.mxu2 %vm403_vm0, %v1032_v39 }
  0x90   : > { %v517_v41 = vpop.f32.mrf.mxu0 }
  0x91   : > { %v518_v44 = vadd.f32 %v3692_v40, %v517_v41 }
  0x93   : > { %v645_v45 = vmin.f32 %v518_v44, 0.0  ;;  %3076 = vmatmul.msk.f32.gmra.mxu0 %vm403_vm0, %v384_v42  ;;  %3172 = vmatmul.msk.f32.gmra.mxu2 %vm403_vm0, %v1033_v43  ;;  %vm613_vm1 = vcmp.gt.f32.partialorder %v518_v44, 0.0 }
  0x95   : > { %v677_v46 = vmul.f32 1.442695, %v645_v45 }
  0x96   : > { %v1162_v47 = vpop.f32.mrf.mxu2 }
  0x97   : > { %3264 = vpow2.f32 %v677_v46  ;;  %v1163_v48 = vadd.f32 %v3692_v40, %v1162_v47 }
  0x98   : > { %v520_v49 = vpop.f32.mrf.mxu0 }
  0x99   : > { %v1290_v52 = vmin.f32 %v1163_v48, 0.0  ;;  %v521_v53 = vadd.f32 %v3692_v40, %v520_v49  ;;  %vm1258_vm2 = vcmp.gt.f32.partialorder %v1163_v48, 0.0  ;;  %v1038_v49 = vld [vmem:[%s3611_s22 + $0xa8] sm:$0xff] }
  0x9b   : > { %v1322_v54 = vmul.f32 1.442695, %v1290_v52  ;;  %v646_v55 = vmin.f32 %v521_v53, 0.0  ;;  %3077 = vmatmul.msk.f32.gmra.mxu0 %vm403_vm0, %v385_v50  ;;  %3173 = vmatmul.msk.f32.gmra.mxu2 %vm403_vm0, %v1034_v51  ;;  %vm614_vm3 = vcmp.gt.f32.partialorder %v521_v53, 0.0 }
  0x9d   : > { %v3265_v56 = vpop.eup %3264  ;;  %3266 = vpow2.f32 %v1322_v54  ;;  %v679_v57 = vmul.f32 1.442695, %v646_v55 }
  0x9e   : > { %v1165_v58 = vpop.f32.mrf.mxu2  ;;  %v3092_v59 = vadd.f32 -1.0, %v3265_v56 }
  0x9f   : > { %3268 = vpow2.f32 %v679_v57  ;;  %v1166_v60 = vadd.f32 %v3692_v40, %v1165_v58 }
  0xa0   : > { %v523_v61 = vpop.f32.mrf.mxu0  ;;  %v773_v62 = vsel %vm613_vm1, %v518_v44, %v3092_v59 }
  0xa1   : > { %v1291_v1 = vmin.f32 %v1166_v60, 0.0  ;;  %v524_v2 = vadd.f32 %v3692_v40, %v523_v61  ;;  %3124 = vmatmul.msk.f32.vlgmr.msra.gmra.mxu1 %vm403_vm0, %v773_v62  ;;  %vm1259_vm4 = vcmp.gt.f32.partialorder %v1166_v60, 0.0 }
  0xa3   : > { %v3267_v3 = vpop.eup %3266  ;;  %v1324_v4 = vmul.f32 1.442695, %v1291_v1  ;;  %v647_v5 = vmin.f32 %v524_v2, 0.0  ;;  %3078 = vmatmul.msk.f32.gmra.mxu0 %vm403_vm0, %v386_v63  ;;  %3174 = vmatmul.msk.f32.gmra.mxu2 %vm403_vm0, %v1035_v0  ;;  %vm615_vm5 = vcmp.gt.f32.partialorder %v524_v2, 0.0  ;;  %v390_v0 = vld [vmem:[%s3605_s19 + $0xb0] sm:$0xff] }
  0xa4   : > { %v3188_v6 = vadd.f32 -1.0, %v3267_v3  ;;  %v1039_v1 = vld [vmem:[%s3611_s22 + $0xb0] sm:$0xff] }
  0xa5   : > { %v3269_v7 = vpop.eup %3268  ;;  %3270 = vpow2.f32 %v1324_v4  ;;  %v681_v8 = vmul.f32 1.442695, %v647_v5 }
  0xa6   : > { %v1168_v9 = vpop.f32.mrf.mxu2  ;;  %v1418_v10 = vsel %vm1258_vm2, %v1163_v48, %v3188_v6  ;;  %v3093_v11 = vadd.f32 -1.0, %v3269_v7  ;;  %v389_v48 = vld [vmem:[%s3605_s19 + $0xa8] sm:$0xff] }
  0xa7   : > { %3272 = vpow2.f32 %v681_v8  ;;  %v1169_v12 = vadd.f32 %v3692_v40, %v1168_v9  ;;  %3220 = vmatmul.msk.f32.vlgmr.msra.gmra.mxu3 %vm403_vm0, %v1418_v10 }
  0xa8   : > { %v526_v13 = vpop.f32.mrf.mxu0  ;;  %v774_v14 = vsel %vm614_vm3, %v521_v53, %v3093_v11 }
  0xa9   : > { %v1292_v17 = vmin.f32 %v1169_v12, 0.0  ;;  %v527_v18 = vadd.f32 %v3692_v40, %v526_v13  ;;  %3125 = vmatmul.msk.f32.gmra.mxu1 %vm403_vm0, %v774_v14  ;;  %vm1260_vm6 = vcmp.gt.f32.partialorder %v1169_v12, 0.0 }
  0xab   : > { %v3271_v19 = vpop.eup %3270  ;;  %v1326_v20 = vmul.f32 1.442695, %v1292_v17  ;;  %v648_v21 = vmin.f32 %v527_v18, 0.0  ;;  %3079 = vmatmul.msk.f32.gmra.mxu0 %vm403_vm0, %v387_v15  ;;  %3175 = vmatmul.msk.f32.gmra.mxu2 %vm403_vm0, %v1036_v16  ;;  %vm616_vm7 = vcmp.gt.f32.partialorder %v527_v18, 0.0  ;;  %v391_v16 = vld [vmem:[%s3605_s19 + $0xb8] sm:$0xff] }
  0xac   : > { %v3189_v22 = vadd.f32 -1.0, %v3271_v19  ;;  %v1040_v17 = vld [vmem:[%s3611_s22 + $0xb8] sm:$0xff] }
  0xad   : > { %v3273_v23 = vpop.eup %3272  ;;  %3274 = vpow2.f32 %v1326_v20  ;;  %v683_v24 = vmul.f32 1.442695, %v648_v21 }
  0xae   : > { %v1171_v25 = vpop.f32.mrf.mxu2  ;;  %v1419_v26 = vsel %vm1259_vm4, %v1166_v60, %v3189_v22  ;;  %v3094_v27 = vadd.f32 -1.0, %v3273_v23 }
  0xaf   : > { %3276 = vpow2.f32 %v683_v24  ;;  %v1172_v28 = vadd.f32 %v3692_v40, %v1171_v25  ;;  %3221 = vmatmul.msk.f32.gmra.mxu3 %vm403_vm0, %v1419_v26 }
  0xb0   : > { %v529_v29 = vpop.f32.mrf.mxu0  ;;  %v775_v30 = vsel %vm615_vm5, %v524_v2, %v3094_v27 }
  0xb1   : > { %v1293_v33 = vmin.f32 %v1172_v28, 0.0  ;;  %v530_v34 = vadd.f32 %v3692_v40, %v529_v29  ;;  %3126 = vmatmul.msk.f32.gmra.mxu1 %vm403_vm0, %v775_v30  ;;  %vm1261_vm8 = vcmp.gt.f32.partialorder %v1172_v28, 0.0 }
  0xb3   : > { %v3275_v35 = vpop.eup %3274  ;;  %v1328_v36 = vmul.f32 1.442695, %v1293_v33  ;;  %v649_v37 = vmin.f32 %v530_v34, 0.0  ;;  %3080 = vmatmul.msk.f32.gmra.mxu0 %vm403_vm0, %v388_v31  ;;  %3176 = vmatmul.msk.f32.gmra.mxu2 %vm403_vm0, %v1037_v32  ;;  %vm617_vm9 = vcmp.gt.f32.partialorder %v530_v34, 0.0  ;;  %v392_v32 = vld [vmem:[%s3605_s19 + $0xc0] sm:$0xff] }
  0xb4   : > { %v3190_v38 = vadd.f32 -1.0, %v3275_v35  ;;  %v1041_v33 = vld [vmem:[%s3611_s22 + $0xc0] sm:$0xff] }
  0xb5   : > { %v3277_v39 = vpop.eup %3276  ;;  %3278 = vpow2.f32 %v1328_v36  ;;  %v685_v41 = vmul.f32 1.442695, %v649_v37 }
  0xb6   : > { %v1174_v42 = vpop.f32.mrf.mxu2  ;;  %v1420_v43 = vsel %vm1260_vm6, %v1169_v12, %v3190_v38  ;;  %v3095_v44 = vadd.f32 -1.0, %v3277_v39 }
  0xb7   : > { %3280 = vpow2.f32 %v685_v41  ;;  %v1175_v45 = vadd.f32 %v3692_v40, %v1174_v42  ;;  %3222 = vmatmul.msk.f32.gmra.mxu3 %vm403_vm0, %v1420_v43 }
  0xb8   : > { %v532_v46 = vpop.f32.mrf.mxu0  ;;  %v776_v47 = vsel %vm616_vm7, %v527_v18, %v3095_v44 }
  0xb9   : > { %v1294_v50 = vmin.f32 %v1175_v45, 0.0  ;;  %v533_v51 = vadd.f32 %v3692_v40, %v532_v46  ;;  %3127 = vmatmul.msk.f32.gmra.mxu1 %vm403_vm0, %v776_v47  ;;  %vm1262_vm10 = vcmp.gt.f32.partialorder %v1175_v45, 0.0 }
  0xbb   : > { %v3279_v52 = vpop.eup %3278  ;;  %v1330_v53 = vmul.f32 1.442695, %v1294_v50  ;;  %v650_v54 = vmin.f32 %v533_v51, 0.0  ;;  %3081 = vmatmul.msk.f32.gmra.mxu0 %vm403_vm0, %v389_v48  ;;  %3177 = vmatmul.msk.f32.gmra.mxu2 %vm403_vm0, %v1038_v49  ;;  %vm618_vm11 = vcmp.gt.f32.partialorder %v533_v51, 0.0  ;;  %v393_v49 = vld [vmem:[%s3605_s19 + $0xc8] sm:$0xff] }
  0xbc   : > { %v3191_v55 = vadd.f32 -1.0, %v3279_v52  ;;  %v1042_v50 = vld [vmem:[%s3611_s22 + $0xc8] sm:$0xff] }
  0xbd   : > { %v3281_v56 = vpop.eup %3280  ;;  %3282 = vpow2.f32 %v1330_v53  ;;  %v687_v57 = vmul.f32 1.442695, %v650_v54 }
  0xbe   : > { %v1177_v58 = vpop.f32.mrf.mxu2  ;;  %v1421_v59 = vsel %vm1261_vm8, %v1172_v28, %v3191_v55  ;;  %v3096_v60 = vadd.f32 -1.0, %v3281_v56 }
  0xbf   : > { %3284 = vpow2.f32 %v687_v57  ;;  %v1178_v61 = vadd.f32 %v3692_v40, %v1177_v58  ;;  %3223 = vmatmul.msk.f32.gmra.mxu3 %vm403_vm0, %v1421_v59 }
  0xc0   : > { %v535_v62 = vpop.f32.mrf.mxu0  ;;  %v777_v63 = vsel %vm617_vm9, %v530_v34, %v3096_v60 }
  0xc1   : > { %v1295_v2 = vmin.f32 %v1178_v61, 0.0  ;;  %v536_v3 = vadd.f32 %v3692_v40, %v535_v62  ;;  %3128 = vmatmul.msk.f32.gmra.mxu1 %vm403_vm0, %v777_v63  ;;  %vm1263_vm12 = vcmp.gt.f32.partialorder %v1178_v61, 0.0 }
  0xc3   : > { %v3283_v4 = vpop.eup %3282  ;;  %v1332_v5 = vmul.f32 1.442695, %v1295_v2  ;;  %v651_v6 = vmin.f32 %v536_v3, 0.0  ;;  %3082 = vmatmul.msk.f32.gmra.mxu0 %vm403_vm0, %v390_v0  ;;  %3178 = vmatmul.msk.f32.gmra.mxu2 %vm403_vm0, %v1039_v1  ;;  %vm619_vm13 = vcmp.gt.f32.partialorder %v536_v3, 0.0  ;;  %v394_v1 = vld [vmem:[%s3605_s19 + $0xd0] sm:$0xff] }
  0xc4   : > { %v3192_v7 = vadd.f32 -1.0, %v3283_v4  ;;  %v1043_v2 = vld [vmem:[%s3611_s22 + $0xd0] sm:$0xff] }
  0xc5   : > { %v3285_v8 = vpop.eup %3284  ;;  %3286 = vpow2.f32 %v1332_v5  ;;  %v689_v9 = vmul.f32 1.442695, %v651_v6 }
  0xc6   : > { %v1180_v10 = vpop.f32.mrf.mxu2  ;;  %v1422_v11 = vsel %vm1262_vm10, %v1175_v45, %v3192_v7  ;;  %v3097_v12 = vadd.f32 -1.0, %v3285_v8 }
  0xc7   : > { %3288 = vpow2.f32 %v689_v9  ;;  %v1181_v13 = vadd.f32 %v3692_v40, %v1180_v10  ;;  %3224 = vmatmul.msk.f32.gmra.mxu3 %vm403_vm0, %v1422_v11 }
  0xc8   : > { %v538_v14 = vpop.f32.mrf.mxu0  ;;  %v778_v15 = vsel %vm618_vm11, %v533_v51, %v3097_v12 }
  0xc9   : > { %v1296_v18 = vmin.f32 %v1181_v13, 0.0  ;;  %v539_v19 = vadd.f32 %v3692_v40, %v538_v14  ;;  %3129 = vmatmul.msk.f32.gmra.mxu1 %vm403_vm0, %v778_v15  ;;  %vm1264_vm14 = vcmp.gt.f32.partialorder %v1181_v13, 0.0 }
  0xcb   : > { %v3287_v20 = vpop.eup %3286  ;;  %v1334_v21 = vmul.f32 1.442695, %v1296_v18  ;;  %v652_v22 = vmin.f32 %v539_v19, 0.0  ;;  %3083 = vmatmul.msk.f32.gmra.mxu0 %vm403_vm0, %v391_v16  ;;  %3179 = vmatmul.msk.f32.gmra.mxu2 %vm403_vm0, %v1040_v17  ;;  %vm620_vm15 = vcmp.gt.f32.partialorder %v539_v19, 0.0  ;;  %v395_v17 = vld [vmem:[%s3605_s19 + $0xd8] sm:$0xff] }
  0xcc   : > { %v3193_v23 = vadd.f32 -1.0, %v3287_v20  ;;  %v1044_v18 = vld [vmem:[%s3611_s22 + $0xd8] sm:$0xff] }
  0xcd   : > { %v3289_v24 = vpop.eup %3288  ;;  %3290 = vpow2.f32 %v1334_v21  ;;  %v691_v25 = vmul.f32 1.442695, %v652_v22 }
  0xce   : > { %v1183_v26 = vpop.f32.mrf.mxu2  ;;  %v1423_v27 = vsel %vm1263_vm12, %v1178_v61, %v3193_v23  ;;  %v3098_v28 = vadd.f32 -1.0, %v3289_v24 }
  0xcf   : > { %3292 = vpow2.f32 %v691_v25  ;;  %v1184_v29 = vadd.f32 %v3692_v40, %v1183_v26  ;;  %3225 = vmatmul.msk.f32.gmra.mxu3 %vm403_vm0, %v1423_v27 }
  0xd0   : > { %v541_v30 = vpop.f32.mrf.mxu0  ;;  %v779_v31 = vsel %vm619_vm13, %v536_v3, %v3098_v28 }
  0xd1   : > { %v1297_v34 = vmin.f32 %v1184_v29, 0.0  ;;  %v542_v35 = vadd.f32 %v3692_v40, %v541_v30  ;;  %3130 = vmatmul.msk.f32.gmra.mxu1 %vm403_vm0, %v779_v31  ;;  %vm1265_vm1 = vcmp.gt.f32.partialorder %v1184_v29, 0.0 }
  0xd3   : > { %v3291_v36 = vpop.eup %3290  ;;  %v1336_v37 = vmul.f32 1.442695, %v1297_v34  ;;  %v653_v38 = vmin.f32 %v542_v35, 0.0  ;;  %3084 = vmatmul.msk.f32.gmra.mxu0 %vm403_vm0, %v392_v32  ;;  %3180 = vmatmul.msk.f32.gmra.mxu2 %vm403_vm0, %v1041_v33  ;;  %vm621_vm2 = vcmp.gt.f32.partialorder %v542_v35, 0.0  ;;  %v396_v33 = vld [vmem:[%s3605_s19 + $0xe0] sm:$0xff] }
  0xd4   : > { %v3194_v39 = vadd.f32 -1.0, %v3291_v36  ;;  %v1045_v34 = vld [vmem:[%s3611_s22 + $0xe0] sm:$0xff] }
  0xd5   : > { %v3293_v41 = vpop.eup %3292  ;;  %3294 = vpow2.f32 %v1336_v37  ;;  %v693_v42 = vmul.f32 1.442695, %v653_v38 }
  0xd6   : > { %v1186_v43 = vpop.f32.mrf.mxu2  ;;  %v1424_v44 = vsel %vm1264_vm14, %v1181_v13, %v3194_v39  ;;  %v3099_v45 = vadd.f32 -1.0, %v3293_v41 }
  0xd7   : > { %3296 = vpow2.f32 %v693_v42  ;;  %v1187_v46 = vadd.f32 %v3692_v40, %v1186_v43  ;;  %3226 = vmatmul.msk.f32.gmra.mxu3 %vm403_vm0, %v1424_v44 }
  0xd8   : > { %v544_v47 = vpop.f32.mrf.mxu0  ;;  %v780_v48 = vsel %vm620_vm15, %v539_v19, %v3099_v45 }
  0xd9   : > { %v1298_v51 = vmin.f32 %v1187_v46, 0.0  ;;  %v545_v52 = vadd.f32 %v3692_v40, %v544_v47  ;;  %3131 = vmatmul.msk.f32.gmra.mxu1 %vm403_vm0, %v780_v48  ;;  %vm1266_vm3 = vcmp.gt.f32.partialorder %v1187_v46, 0.0 }
  0xdb   : > { %v3295_v53 = vpop.eup %3294  ;;  %v1338_v54 = vmul.f32 1.442695, %v1298_v51  ;;  %v654_v55 = vmin.f32 %v545_v52, 0.0  ;;  %3085 = vmatmul.msk.f32.gmra.mxu0 %vm403_vm0, %v393_v49  ;;  %3181 = vmatmul.msk.f32.gmra.mxu2 %vm403_vm0, %v1042_v50  ;;  %vm622_vm4 = vcmp.gt.f32.partialorder %v545_v52, 0.0  ;;  %v397_v50 = vld [vmem:[%s3605_s19 + $0xe8] sm:$0xff] }
  0xdc   : > { %v3195_v56 = vadd.f32 -1.0, %v3295_v53  ;;  %v1046_v51 = vld [vmem:[%s3611_s22 + $0xe8] sm:$0xff] }
  0xdd   : > { %v3297_v57 = vpop.eup %3296  ;;  %3298 = vpow2.f32 %v1338_v54  ;;  %v695_v58 = vmul.f32 1.442695, %v654_v55 }
  0xde   : > { %v1189_v59 = vpop.f32.mrf.mxu2  ;;  %v1425_v60 = vsel %vm1265_vm1, %v1184_v29, %v3195_v56  ;;  %v3100_v61 = vadd.f32 -1.0, %v3297_v57 }
  0xdf   : > { %3300 = vpow2.f32 %v695_v58  ;;  %v1190_v62 = vadd.f32 %v3692_v40, %v1189_v59  ;;  %3227 = vmatmul.msk.f32.gmra.mxu3 %vm403_vm0, %v1425_v60 }
  0xe0   : > { %v547_v63 = vpop.f32.mrf.mxu0  ;;  %v781_v0 = vsel %vm621_vm2, %v542_v35, %v3100_v61 }
  0xe1   : > { %v1299_v3 = vmin.f32 %v1190_v62, 0.0  ;;  %v548_v4 = vadd.f32 %v3692_v40, %v547_v63  ;;  %3132 = vmatmul.msk.f32.gmra.mxu1 %vm403_vm0, %v781_v0  ;;  %vm1267_vm5 = vcmp.gt.f32.partialorder %v1190_v62, 0.0 }
  0xe3   : > { %v3299_v5 = vpop.eup %3298  ;;  %v1340_v6 = vmul.f32 1.442695, %v1299_v3  ;;  %v655_v7 = vmin.f32 %v548_v4, 0.0  ;;  %3086 = vmatmul.msk.f32.gmra.mxu0 %vm403_vm0, %v394_v1  ;;  %3182 = vmatmul.msk.f32.gmra.mxu2 %vm403_vm0, %v1043_v2  ;;  %vm623_vm6 = vcmp.gt.f32.partialorder %v548_v4, 0.0  ;;  %v398_v2 = vld [vmem:[%s3605_s19 + $0xf0] sm:$0xff] }
  0xe4   : > { %v3196_v8 = vadd.f32 -1.0, %v3299_v5  ;;  %v1047_v3 = vld [vmem:[%s3611_s22 + $0xf0] sm:$0xff] }
  0xe5   : > { %v3301_v9 = vpop.eup %3300  ;;  %3302 = vpow2.f32 %v1340_v6  ;;  %v697_v10 = vmul.f32 1.442695, %v655_v7 }
  0xe6   : > { %v1192_v11 = vpop.f32.mrf.mxu2  ;;  %v1426_v12 = vsel %vm1266_vm3, %v1187_v46, %v3196_v8  ;;  %v3101_v13 = vadd.f32 -1.0, %v3301_v9 }
  0xe7   : > { %3304 = vpow2.f32 %v697_v10  ;;  %v1193_v14 = vadd.f32 %v3692_v40, %v1192_v11  ;;  %3228 = vmatmul.msk.f32.gmra.mxu3 %vm403_vm0, %v1426_v12 }
  0xe8   : > { %v550_v15 = vpop.f32.mrf.mxu0  ;;  %v782_v16 = vsel %vm622_vm4, %v545_v52, %v3101_v13  ;;  %vm1723_vm4 = vcmask 130048  }
  0xe9   : > { %v1300_v19 = vmin.f32 %v1193_v14, 0.0  ;;  %v551_v20 = vadd.f32 %v3692_v40, %v550_v15  ;;  %3133 = vmatmul.msk.f32.gmra.mxu1 %vm403_vm0, %v782_v16  ;;  %vm1268_vm7 = vcmp.gt.f32.partialorder %v1193_v14, 0.0 }
  0xeb   : > { %v3303_v21 = vpop.eup %3302  ;;  %v1342_v22 = vmul.f32 1.442695, %v1300_v19  ;;  %v656_v23 = vmin.f32 %v551_v20, 0.0  ;;  %3087 = vmatmul.msk.f32.gmra.mxu0 %vm403_vm0, %v395_v17  ;;  %3183 = vmatmul.msk.f32.gmra.mxu2 %vm403_vm0, %v1044_v18  ;;  %vm624_vm8 = vcmp.gt.f32.partialorder %v551_v20, 0.0  ;;  %v399_v18 = vld [vmem:[%s3605_s19 + $0xf8] sm:$0xff] }
  0xec   : > { %v3197_v24 = vadd.f32 -1.0, %v3303_v21  ;;  %v1048_v19 = vld [vmem:[%s3611_s22 + $0xf8] sm:$0xff]  ;;  %s3055_s22 = sshll.u32 %s5258_s11, 2 }
  0xed   : > { %v3305_v25 = vpop.eup %3304  ;;  %3306 = vpow2.f32 %v1342_v22  ;;  %v699_v26 = vmul.f32 1.442695, %v656_v23  ;;  %s4292_s25 = scalar_lea.vmem %s5254_s6, %s3055_s22  ;;  %s4346_s29 = scalar_lea.vmem %s5255_s7, %s3055_s22 }
  0xee   : > { %v1195_v27 = vpop.f32.mrf.mxu2  ;;  %v1427_v28 = vsel %vm1267_vm5, %v1190_v62, %v3197_v24  ;;  %v3102_v29 = vadd.f32 -1.0, %v3305_v25 }
  0xef   : > { %3308 = vpow2.f32 %v699_v26  ;;  %v1196_v30 = vadd.f32 %v3692_v40, %v1195_v27  ;;  %3229 = vmatmul.msk.f32.gmra.mxu3 %vm403_vm0, %v1427_v28 }
  0xf0   : > { %v553_v31 = vpop.f32.mrf.mxu0  ;;  %v783_v32 = vsel %vm623_vm6, %v548_v4, %v3102_v29 }
  0xf1   : > { %v1301_v35 = vmin.f32 %v1196_v30, 0.0  ;;  %v554_v36 = vadd.f32 %v3692_v40, %v553_v31  ;;  %3134 = vmatmul.msk.f32.gmra.mxu1 %vm403_vm0, %v783_v32  ;;  %vm1269_vm9 = vcmp.gt.f32.partialorder %v1196_v30, 0.0 }
  0xf3   : > { %v3307_v37 = vpop.eup %3306  ;;  %v1344_v38 = vmul.f32 1.442695, %v1301_v35  ;;  %v657_v39 = vmin.f32 %v554_v36, 0.0  ;;  %3088 = vmatmul.msk.f32.gmra.mxu0 %vm403_vm0, %v396_v33  ;;  %3184 = vmatmul.msk.f32.gmra.mxu2 %vm403_vm0, %v1045_v34  ;;  %vm625_vm10 = vcmp.gt.f32.partialorder %v554_v36, 0.0 }
  0xf4   : > { %v3198_v41 = vadd.f32 -1.0, %v3307_v37 }
  0xf5   : > { %v3309_v42 = vpop.eup %3308  ;;  %3310 = vpow2.f32 %v1344_v38  ;;  %v701_v43 = vmul.f32 1.442695, %v657_v39 }
  0xf6   : > { %v1198_v44 = vpop.f32.mrf.mxu2  ;;  %v1428_v45 = vsel %vm1268_vm7, %v1193_v14, %v3198_v41  ;;  %v3103_v46 = vadd.f32 -1.0, %v3309_v42 }
  0xf7   : > { %3312 = vpow2.f32 %v701_v43  ;;  %v1199_v47 = vadd.f32 %v3692_v40, %v1198_v44  ;;  %3230 = vmatmul.msk.f32.gmra.mxu3 %vm403_vm0, %v1428_v45 }
  0xf8   : > { %v556_v48 = vpop.f32.mrf.mxu0  ;;  %v784_v49 = vsel %vm624_vm8, %v551_v20, %v3103_v46 }
  0xf9   : > { %v1302_v52 = vmin.f32 %v1199_v47, 0.0  ;;  %v557_v53 = vadd.f32 %v3692_v40, %v556_v48  ;;  %3135 = vmatmul.msk.f32.gmra.mxu1 %vm403_vm0, %v784_v49  ;;  %vm1270_vm11 = vcmp.gt.f32.partialorder %v1199_v47, 0.0 }
  0xfb   : > { %v3311_v54 = vpop.eup %3310  ;;  %v1346_v55 = vmul.f32 1.442695, %v1302_v52  ;;  %v658_v56 = vmin.f32 %v557_v53, 0.0  ;;  %3089 = vmatmul.msk.f32.gmra.mxu0 %vm403_vm0, %v397_v50  ;;  %3185 = vmatmul.msk.f32.gmra.mxu2 %vm403_vm0, %v1046_v51  ;;  %vm626_vm12 = vcmp.gt.f32.partialorder %v557_v53, 0.0 }
  0xfc   : > { %v3199_v57 = vadd.f32 -1.0, %v3311_v54  ;;  %v3827_v54 = vld [vmem:[%s5253_s5] ss:$0 sm:$0xff] }
  0xfd   : > { %v3313_v58 = vpop.eup %3312  ;;  %3314 = vpow2.f32 %v1346_v55  ;;  %v703_v59 = vmul.f32 1.442695, %v658_v56 }
  0xfe   : > { %v1201_v60 = vpop.f32.mrf.mxu2  ;;  %v1429_v61 = vsel %vm1269_vm9, %v1196_v30, %v3199_v57  ;;  %v3104_v62 = vadd.f32 -1.0, %v3313_v58 }
  0xff   : > { %3316 = vpow2.f32 %v703_v59  ;;  %v1202_v63 = vadd.f32 %v3692_v40, %v1201_v60  ;;  %3231 = vmatmul.msk.f32.gmra.mxu3 %vm403_vm0, %v1429_v61 }
 0x100   : > { %v559_v0 = vpop.f32.mrf.mxu0  ;;  %v785_v1 = vsel %vm625_vm10, %v554_v36, %v3104_v62 }
 0x101   : > { %v1303_v4 = vmin.f32 %v1202_v63, 0.0  ;;  %v560_v5 = vadd.f32 %v3692_v40, %v559_v0  ;;  %3136 = vmatmul.msk.f32.gmra.mxu1 %vm403_vm0, %v785_v1  ;;  %vm1271_vm13 = vcmp.gt.f32.partialorder %v1202_v63, 0.0 }
 0x103   : > { %v3315_v6 = vpop.eup %3314  ;;  %v1348_v7 = vmul.f32 1.442695, %v1303_v4  ;;  %v659_v8 = vmin.f32 %v560_v5, 0.0  ;;  %3090 = vmatmul.msk.f32.gmra.mxu0 %vm403_vm0, %v398_v2  ;;  %3186 = vmatmul.msk.f32.gmra.mxu2 %vm403_vm0, %v1047_v3  ;;  %vm627_vm14 = vcmp.gt.f32.partialorder %v560_v5, 0.0 }
 0x104   : > { %v3200_v9 = vadd.f32 -1.0, %v3315_v6 }
 0x105   : > { %v3317_v10 = vpop.eup %3316  ;;  %3318 = vpow2.f32 %v1348_v7  ;;  %v705_v11 = vmul.f32 1.442695, %v659_v8 }
 0x106   : > { %v1204_v12 = vpop.f32.mrf.mxu2  ;;  %v1430_v13 = vsel %vm1270_vm11, %v1199_v47, %v3200_v9  ;;  %v3105_v14 = vadd.f32 -1.0, %v3317_v10 }
 0x107   : > { %3320 = vpow2.f32 %v705_v11  ;;  %v1205_v15 = vadd.f32 %v3692_v40, %v1204_v12  ;;  %3232 = vmatmul.msk.f32.gmra.mxu3 %vm403_vm0, %v1430_v13 }
 0x108   : > { %v562_v16 = vpop.f32.mrf.mxu0  ;;  %v786_v17 = vsel %vm626_vm12, %v557_v53, %v3105_v14 }
 0x109   : > { %v1304_v20 = vmin.f32 %v1205_v15, 0.0  ;;  %v563_v21 = vadd.f32 %v3692_v40, %v562_v16  ;;  %3137 = vmatmul.msk.f32.gmra.mxu1 %vm403_vm0, %v786_v17  ;;  %vm1272_vm15 = vcmp.gt.f32.partialorder %v1205_v15, 0.0 }
 0x10b   : > { %v3319_v22 = vpop.eup %3318  ;;  %v1350_v23 = vmul.f32 1.442695, %v1304_v20  ;;  %v660_v24 = vmin.f32 %v563_v21, 0.0  ;;  %3091 = vmatmul.msk.f32.gmra.mxu0 %vm403_vm0, %v399_v18  ;;  %3187 = vmatmul.msk.f32.gmra.mxu2 %vm403_vm0, %v1048_v19  ;;  %vm628_vm1 = vcmp.gt.f32.partialorder %v563_v21, 0.0 }
 0x10c   : > { %v3201_v25 = vadd.f32 -1.0, %v3319_v22 }
 0x10d   : > { %v3321_v26 = vpop.eup %3320  ;;  %3322 = vpow2.f32 %v1350_v23  ;;  %v707_v27 = vmul.f32 1.442695, %v660_v24 }
 0x10e   : > { %v1207_v28 = vpop.f32.mrf.mxu2  ;;  %v1431_v29 = vsel %vm1271_vm13, %v1202_v63, %v3201_v25  ;;  %v3106_v30 = vadd.f32 -1.0, %v3321_v26 }
 0x10f   : > { %3324 = vpow2.f32 %v707_v27  ;;  %v1208_v31 = vadd.f32 %v3692_v40, %v1207_v28  ;;  %3233 = vmatmul.msk.f32.gmra.mxu3 %vm403_vm0, %v1431_v29 }
 0x110   : > { %v565_v32 = vpop.f32.mrf.mxu0  ;;  %v787_v33 = vsel %vm627_vm14, %v560_v5, %v3106_v30 }
 0x111   : > { %v1305_v34 = vmin.f32 %v1208_v31, 0.0  ;;  %v566_v35 = vadd.f32 %v3692_v40, %v565_v32  ;;  %3138 = vmatmul.msk.f32.gmra.mxu1 %vm403_vm0, %v787_v33  ;;  %vm1273_vm2 = vcmp.gt.f32.partialorder %v1208_v31, 0.0 }
 0x113   : > { %v3323_v36 = vpop.eup %3322  ;;  %v1352_v37 = vmul.f32 1.442695, %v1305_v34  ;;  %v661_v38 = vmin.f32 %v566_v35, 0.0  ;;  %vm629_vm3 = vcmp.gt.f32.partialorder %v566_v35, 0.0 }
 0x114   : > { %v3202_v39 = vadd.f32 -1.0, %v3323_v36 }
 0x115   : > { %v3325_v41 = vpop.eup %3324  ;;  %3326 = vpow2.f32 %v1352_v37  ;;  %v709_v42 = vmul.f32 1.442695, %v661_v38 }
 0x116   : > { %v1210_v43 = vpop.f32.mrf.mxu2  ;;  %v1432_v44 = vsel %vm1272_vm15, %v1205_v15, %v3202_v39  ;;  %v3107_v45 = vadd.f32 -1.0, %v3325_v41 }
 0x117   : > { %3328 = vpow2.f32 %v709_v42  ;;  %v1211_v46 = vadd.f32 %v3692_v40, %v1210_v43  ;;  %3234 = vmatmul.msk.f32.gmra.mxu3 %vm403_vm0, %v1432_v44 }
 0x118   : > { %v568_v47 = vpop.f32.mrf.mxu0  ;;  %v788_v48 = vsel %vm628_vm1, %v563_v21, %v3107_v45 }
 0x119   : > { %v1306_v49 = vmin.f32 %v1211_v46, 0.0  ;;  %v569_v50 = vadd.f32 %v3692_v40, %v568_v47  ;;  %3139 = vmatmul.msk.f32.gmra.mxu1 %vm403_vm0, %v788_v48  ;;  %vm1274_vm5 = vcmp.gt.f32.partialorder %v1211_v46, 0.0 }
 0x11b   : > { %v3327_v51 = vpop.eup %3326  ;;  %v1354_v52 = vmul.f32 1.442695, %v1306_v49  ;;  %v662_v53 = vmin.f32 %v569_v50, 0.0  ;;  %vm630_vm6 = vcmp.gt.f32.partialorder %v569_v50, 0.0 }
 0x11c   : > { %v3203_v55 = vadd.f32 -1.0, %v3327_v51 }
 0x11d   : > { %v3329_v56 = vpop.eup %3328  ;;  %3330 = vpow2.f32 %v1354_v52  ;;  %v711_v57 = vmul.f32 1.442695, %v662_v53 }
 0x11e   : > { %v921_v58 = vpop.f32.mrf.mxu1  ;;  %v1213_v59 = vpop.f32.mrf.mxu2  ;;  %v1433_v60 = vsel %vm1273_vm2, %v1208_v31, %v3203_v55  ;;  %v3108_v61 = vadd.f32 -1.0, %v3329_v56 }
 0x11f   : > { %3332 = vpow2.f32 %v711_v57  ;;  %v3830_v62 = vadd.f32 %v3827_v54, %v921_v58  ;;  %v1214_v63 = vadd.f32 %v3692_v40, %v1213_v59  ;;  %3235 = vmatmul.msk.f32.gmra.mxu3 %vm403_vm0, %v1433_v60 }
 0x120   : > { %v571_v0 = vpop.f32.mrf.mxu0  ;;  %v789_v1 = vsel %vm629_vm3, %v566_v35, %v3108_v61 }
 0x121   : > { %v1307_v2 = vmin.f32 %v1214_v63, 0.0  ;;  %v572_v3 = vadd.f32 %v3692_v40, %v571_v0  ;;  %3140 = vmatmul.msk.f32.gmra.mxu1 %vm403_vm0, %v789_v1  ;;  %v1756_v4 = vmul.f32 %v3830_v62, %v3830_v62  ;;  %vm1275_vm7 = vcmp.gt.f32.partialorder %v1214_v63, 0.0 }
 0x123   : > { %v3331_v5 = vpop.eup %3330  ;;  %v1356_v6 = vmul.f32 1.442695, %v1307_v2  ;;  %v663_v7 = vmin.f32 %v572_v3, 0.0  ;;  %v1788_v8 = vsel %vm1723_vm4, %v1756_v4, 0.0  ;;  %vm631_vm8 = vcmp.gt.f32.partialorder %v572_v3, 0.0 }
 0x124   : > { %1789 = vadd.xlane.f32.xlu0 %v1788_v8  ;;  %v3204_v9 = vadd.f32 -1.0, %v3331_v5 }
 0x125   : > { %v3333_v10 = vpop.eup %3332  ;;  %3334 = vpow2.f32 %v1356_v6  ;;  %v713_v11 = vmul.f32 1.442695, %v663_v7 }
 0x126   : > { %v924_v12 = vpop.f32.mrf.mxu1  ;;  %v1216_v13 = vpop.f32.mrf.mxu2  ;;  %v1434_v14 = vsel %vm1274_vm5, %v1211_v46, %v3204_v9  ;;  %v3109_v15 = vadd.f32 -1.0, %v3333_v10 }
 0x127   : > { %3336 = vpow2.f32 %v713_v11  ;;  %v3840_v16 = vadd.f32 %v3827_v54, %v924_v12  ;;  %v1217_v17 = vadd.f32 %v3692_v40, %v1216_v13  ;;  %3236 = vmatmul.msk.f32.gmra.mxu3 %vm403_vm0, %v1434_v14 }
 0x128   : > { %v574_v18 = vpop.f32.mrf.mxu0  ;;  %v790_v19 = vsel %vm630_vm6, %v569_v50, %v3109_v15 }
 0x129   : > { %v1308_v20 = vmin.f32 %v1217_v17, 0.0  ;;  %v3845_v21 = vadd.f32 %v3692_v40, %v574_v18  ;;  %3141 = vmatmul.msk.f32.gmra.mxu1 %vm403_vm0, %v790_v19  ;;  %v1757_v22 = vmul.f32 %v3840_v16, %v3840_v16  ;;  %vm1276_vm9 = vcmp.gt.f32.partialorder %v1217_v17, 0.0 }
 0x12a   : > { %v1563_v23 = vpop.f32.mrf.mxu3 }
 0x12b   : > { %v3335_v24 = vpop.eup %3334  ;;  %v1358_v25 = vmul.f32 1.442695, %v1308_v20  ;;  %v664_v26 = vmin.f32 %v3845_v21, 0.0  ;;  %v3852_v27 = vadd.f32 %v3827_v54, %v1563_v23  ;;  %v1791_v28 = vsel %vm1723_vm4, %v1757_v22, 0.0 }
 0x12c   : > { %1792 = vadd.xlane.f32.xlu0 %v1791_v28  ;;  %v3205_v29 = vadd.f32 -1.0, %v3335_v24  ;;  %vm632_vm10 = vcmp.gt.f32.partialorder %v3845_v21, 0.0  ;;  %v3920_v28 = vld [vmem:[%s5251_s3] ss:$0 sm:$0xff] }
 0x12d   : > { %v3337_v30 = vpop.eup %3336  ;;  %3338 = vpow2.f32 %v1358_v25  ;;  %v715_v31 = vmul.f32 1.442695, %v664_v26  ;;  %v1659_v32 = vadd.f32 %v3852_v27, %v3830_v62  ;;  %v2236_v33 = vmul.f32 %v3852_v27, %v3852_v27 }
 0x12e   : > { %v927_v34 = vpop.f32.mrf.mxu1  ;;  %v1219_v35 = vpop.f32.mrf.mxu2  ;;  %v1435_v36 = vsel %vm1275_vm7, %v1214_v63, %v3205_v29  ;;  %v3110_v37 = vadd.f32 -1.0, %v3337_v30 }
 0x12f   : > { %3340 = vpow2.f32 %v715_v31  ;;  %v1691_v38 = vmul.f32 0.5, %v1659_v32  ;;  %v3866_v39 = vadd.f32 %v3827_v54, %v927_v34  ;;  %v1220_v41 = vadd.f32 %v3692_v40, %v1219_v35  ;;  %3237 = vmatmul.msk.f32.gmra.mxu3 %vm403_vm0, %v1435_v36 }
 0x130   : > { %v2268_v42 = vsel %vm1723_vm4, %v2236_v33, 0.0  ;;  %v577_v43 = vpop.f32.mrf.mxu0  ;;  %v791_v44 = vsel %vm631_vm8, %v572_v3, %v3110_v37 }
 0x131   : > { %1724 = vst.msk [vmem:[%s3863_s18] sm:$0xff] %vm1723_vm4, %v1691_v38  ;;  %v1309_v45 = vmin.f32 %v1220_v41, 0.0  ;;  %2269 = vadd.xlane.f32.xlu2 %v2268_v42  ;;  %v3874_v46 = vadd.f32 %v3692_v40, %v577_v43  ;;  %3142 = vmatmul.msk.f32.gmra.mxu1 %vm403_vm0, %v791_v44  ;;  %v1758_v47 = vmul.f32 %v3866_v39, %v3866_v39  ;;  %vm1277_vm11 = vcmp.gt.f32.partialorder %v1220_v41, 0.0 }
 0x132   : > { %v1566_v48 = vpop.f32.mrf.mxu3 }
 0x133   : > { %v3339_v49 = vpop.eup %3338  ;;  %v1360_v50 = vmul.f32 1.442695, %v1309_v45  ;;  %v665_v51 = vmin.f32 %v3874_v46, 0.0  ;;  %v3881_v52 = vadd.f32 %v3827_v54, %v1566_v48  ;;  %v1794_v53 = vsel %vm1723_vm4, %v1758_v47, 0.0 }
 0x134   : > { %1795 = vadd.xlane.f32.xlu1 %v1794_v53  ;;  %v3206_v55 = vadd.f32 -1.0, %v3339_v49  ;;  %vm633_vm12 = vcmp.gt.f32.partialorder %v3874_v46, 0.0 }
 0x135   : > { %v3341_v56 = vpop.eup %3340  ;;  %3342 = vpow2.f32 %v1360_v50  ;;  %v717_v57 = vmul.f32 1.442695, %v665_v51  ;;  %v1660_v58 = vadd.f32 %v3881_v52, %v3840_v16  ;;  %v2237_v59 = vmul.f32 %v3881_v52, %v3881_v52 }
 0x136   : > { %v930_v60 = vpop.f32.mrf.mxu1  ;;  %v1222_v61 = vpop.f32.mrf.mxu2  ;;  %v1436_v63 = vsel %vm1276_vm9, %v1217_v17, %v3206_v55  ;;  %v3111_v0 = vadd.f32 -1.0, %v3341_v56 }
 0x137   : > { %3344 = vpow2.f32 %v717_v57  ;;  %v1692_v1 = vmul.f32 0.5, %v1660_v58  ;;  %v3890_v2 = vadd.f32 %v3827_v54, %v930_v60  ;;  %v1223_v3 = vadd.f32 %v3692_v40, %v1222_v61  ;;  %3238 = vmatmul.msk.f32.gmra.mxu3 %vm403_vm0, %v1436_v63 }
 0x138   : > { %v580_v4 = vpop.f32.mrf.mxu0  ;;  %v2271_v5 = vsel %vm1723_vm4, %v2237_v59, 0.0  ;;  %v792_v6 = vsel %vm632_vm10, %v3845_v21, %v3111_v0 }
 0x139   : > { %1725 = vst.msk [vmem:[%s3863_s18 + $0x8] sm:$0xff] %vm1723_vm4, %v1692_v1  ;;  %v1310_v7 = vmin.f32 %v1223_v3, 0.0  ;;  %v3899_v8 = vadd.f32 %v3692_v40, %v580_v4  ;;  %2272 = vadd.xlane.f32.xlu0 %v2271_v5  ;;  %3143 = vmatmul.msk.f32.gmra.mxu1 %vm403_vm0, %v792_v6  ;;  %v1759_v9 = vmul.f32 %v3890_v2, %v3890_v2  ;;  %vm1278_vm13 = vcmp.gt.f32.partialorder %v1223_v3, 0.0 }
 0x13a   : > { %v1569_v10 = vpop.f32.mrf.mxu3 }
 0x13b   : > { %v3343_v11 = vpop.eup %3342  ;;  %v1362_v12 = vmul.f32 1.442695, %v1310_v7  ;;  %v666_v13 = vmin.f32 %v3899_v8, 0.0  ;;  %v3906_v14 = vadd.f32 %v3827_v54, %v1569_v10  ;;  %v1797_v15 = vsel %vm1723_vm4, %v1759_v9, 0.0 }
 0x13c   : > { %1798 = vadd.xlane.f32.xlu1 %v1797_v15  ;;  %v3207_v17 = vadd.f32 -1.0, %v3343_v11  ;;  %vm634_vm14 = vcmp.gt.f32.partialorder %v3899_v8, 0.0 }
 0x13d   : > { %v3345_v40 = vpop.eup %3344  ;;  %3346 = vpow2.f32 %v1362_v12  ;;  %v719_v18 = vmul.f32 1.442695, %v666_v13  ;;  %v1661_v19 = vadd.f32 %v3906_v14, %v3866_v39  ;;  %v2238_v24 = vmul.f32 %v3906_v14, %v3906_v14 }
 0x13e   : > { %v933_v20 = vpop.f32.mrf.mxu1  ;;  %v1225_v21 = vpop.f32.mrf.mxu2  ;;  %v1437_v22 = vsel %vm1277_vm11, %v1220_v41, %v3207_v17  ;;  %v3112_v23 = vadd.f32 -1.0, %v3345_v40 }
 0x13f   : > { %3348 = vpow2.f32 %v719_v18  ;;  %v1693_v25 = vmul.f32 0.5, %v1661_v19  ;;  %v3915_v26 = vadd.f32 %v3827_v54, %v933_v20  ;;  %v1226_v29 = vadd.f32 %v3920_v28, %v1225_v21  ;;  %3239 = vmatmul.msk.f32.gmra.mxu3 %vm403_vm0, %v1437_v22 }
 0x140   : > { %v583_v30 = vpop.f32.mrf.mxu0  ;;  %v793_v31 = vsel %vm633_vm12, %v3874_v46, %v3112_v23  ;;  %v2274_v36 = vsel %vm1723_vm4, %v2238_v24, 0.0 }
 0x141   : > { %1726 = vst.msk [vmem:[%s3863_s18 + $0x10] sm:$0xff] %vm1723_vm4, %v1693_v25  ;;  %v1311_v32 = vmin.f32 %v1226_v29, 0.0  ;;  %v3928_v33 = vadd.f32 %v3920_v28, %v583_v30  ;;  %3144 = vmatmul.msk.f32.gmra.mxu1 %vm403_vm0, %v793_v31  ;;  %v1760_v34 = vmul.f32 %v3915_v26, %v3915_v26  ;;  %vm1279_vm15 = vcmp.gt.f32.partialorder %v1226_v29, 0.0 }
 0x142   : > { %v1572_v35 = vpop.f32.mrf.mxu3 }
 0x143   : > { %v3347_v37 = vpop.eup %3346  ;;  %v1364_v38 = vmul.f32 1.442695, %v1311_v32  ;;  %v667_v41 = vmin.f32 %v3928_v33, 0.0  ;;  %v3936_v42 = vadd.f32 %v3827_v54, %v1572_v35  ;;  %v1800_v43 = vsel %vm1723_vm4, %v1760_v34, 0.0 }
 0x144   : > { %1801 = vadd.xlane.f32.xlu2 %v1800_v43  ;;  %2275 = vadd.xlane.f32.xlu1 %v2274_v36  ;;  %v3208_v44 = vadd.f32 -1.0, %v3347_v37  ;;  %vm635_vm1 = vcmp.gt.f32.partialorder %v3928_v33, 0.0 }
 0x145   : > { %v3349_v45 = vpop.eup %3348  ;;  %3350 = vpow2.f32 %v1364_v38  ;;  %v721_v46 = vmul.f32 1.442695, %v667_v41  ;;  %v1662_v47 = vadd.f32 %v3936_v42, %v3890_v2  ;;  %v2239_v56 = vmul.f32 %v3936_v42, %v3936_v42 }
 0x146   : > { %v936_v48 = vpop.f32.mrf.mxu1  ;;  %v1228_v49 = vpop.f32.mrf.mxu2  ;;  %v1438_v50 = vsel %vm1278_vm13, %v1223_v3, %v3208_v44  ;;  %v3113_v51 = vadd.f32 -1.0, %v3349_v45 }
 0x147   : > { %3352 = vpow2.f32 %v721_v46  ;;  %v1694_v53 = vmul.f32 0.5, %v1662_v47  ;;  %v1229_v55 = vadd.f32 %v3920_v28, %v1228_v49  ;;  %3240 = vmatmul.msk.f32.gmra.mxu3 %vm403_vm0, %v1438_v50  ;;  %v3954_v61 = vadd.f32 %v3827_v54, %v936_v48 }
 0x148   : > { %v586_v57 = vpop.f32.mrf.mxu0  ;;  %v794_v58 = vsel %vm634_vm14, %v3899_v8, %v3113_v51  ;;  %v2277_v5 = vsel %vm1723_vm4, %v2239_v56, 0.0 }
 0x149   : > { %1727 = vst.msk [vmem:[%s3863_s18 + $0x18] sm:$0xff] %vm1723_vm4, %v1694_v53  ;;  %v1312_v59 = vmin.f32 %v1229_v55, 0.0  ;;  %v3950_v60 = vadd.f32 %v3920_v28, %v586_v57  ;;  %3145 = vmatmul.msk.f32.gmra.mxu1 %vm403_vm0, %v794_v58  ;;  %v1761_v18 = vmul.f32 %v3954_v61, %v3954_v61  ;;  %vm1280_vm2 = vcmp.gt.f32.partialorder %v1229_v55, 0.0 }
 0x14a   : > { %v1575_v63 = vpop.f32.mrf.mxu3 }
 0x14b   : > { %v3351_v0 = vpop.eup %3350  ;;  %v1366_v1 = vmul.f32 1.442695, %v1312_v59  ;;  %v668_v3 = vmin.f32 %v3950_v60, 0.0  ;;  %v3958_v4 = vadd.f32 %v3827_v54, %v1575_v63  ;;  %vm636_vm3 = vcmp.gt.f32.partialorder %v3950_v60, 0.0 }
 0x14c   : > { %2278 = vadd.xlane.f32.xlu2 %v2277_v5  ;;  %v3209_v6 = vadd.f32 -1.0, %v3351_v0 }
 0x14d   : > { %v3353_v7 = vpop.eup %3352  ;;  %3354 = vpow2.f32 %v1366_v1  ;;  %v723_v8 = vmul.f32 1.442695, %v668_v3  ;;  %v1663_v9 = vadd.f32 %v3958_v4, %v3915_v26  ;;  %v2240_v10 = vmul.f32 %v3958_v4, %v3958_v4 }
 0x14e   : > { %v939_v11 = vpop.f32.mrf.mxu1  ;;  %v1231_v12 = vpop.f32.mrf.mxu2  ;;  %v1439_v13 = vsel %vm1279_vm15, %v1226_v29, %v3209_v6  ;;  %v3114_v15 = vadd.f32 -1.0, %v3353_v7 }
 0x14f   : > { %3356 = vpow2.f32 %v723_v8  ;;  %v1695_v17 = vmul.f32 0.5, %v1663_v9  ;;  %v3967_v40 = vadd.f32 %v3920_v28, %v1231_v12  ;;  %3241 = vmatmul.msk.f32.gmra.mxu3 %vm403_vm0, %v1439_v13  ;;  %v3973_v19 = vadd.f32 %v3827_v54, %v939_v11 }
 0x150   : > { %v589_v20 = vpop.f32.mrf.mxu0  ;;  %v2280_v21 = vsel %vm1723_vm4, %v2240_v10, 0.0  ;;  %v795_v22 = vsel %vm635_vm1, %v3928_v33, %v3114_v15  ;;  %v1803_v33 = vsel %vm1723_vm4, %v1761_v18, 0.0 }
 0x151   : > { %1728 = vst.msk [vmem:[%s3863_s18 + $0x20] sm:$0xff] %vm1723_vm4, %v1695_v17  ;;  %v1313_v23 = vmin.f32 %v3967_v40, 0.0  ;;  %v3981_v24 = vadd.f32 %v3920_v28, %v589_v20  ;;  %2281 = vadd.xlane.f32.xlu0 %v2280_v21  ;;  %3146 = vmatmul.msk.f32.gmra.mxu1 %vm403_vm0, %v795_v22  ;;  %v1762_v35 = vmul.f32 %v3973_v19, %v3973_v19  ;;  %vm1281_vm5 = vcmp.gt.f32.partialorder %v3967_v40, 0.0 }
 0x152   : > { %v1578_v25 = vpop.f32.mrf.mxu3 }
 0x153   : > { %v3355_v29 = vpop.eup %3354  ;;  %v1368_v30 = vmul.f32 1.442695, %v1313_v23  ;;  %v669_v31 = vmin.f32 %v3981_v24, 0.0  ;;  %v3986_v32 = vadd.f32 %v3827_v54, %v1578_v25  ;;  %v1806_v53 = vsel %vm1723_vm4, %v1762_v35, 0.0 }
 0x154   : > { %1804 = vadd.xlane.f32.xlu2 %v1803_v33  ;;  %v3210_v34 = vadd.f32 -1.0, %v3355_v29  ;;  %vm637_vm6 = vcmp.gt.f32.partialorder %v3981_v24, 0.0 }
 0x155   : > { %v3357_v36 = vpop.eup %3356  ;;  %3358 = vpow2.f32 %v1368_v30  ;;  %v725_v37 = vmul.f32 1.442695, %v669_v31  ;;  %v1664_v38 = vadd.f32 %v3986_v32, %v3954_v61  ;;  %v2241_v41 = vmul.f32 %v3986_v32, %v3986_v32 }
 0x156   : > { %v942_v43 = vpop.f32.mrf.mxu1  ;;  %v1234_v44 = vpop.f32.mrf.mxu2  ;;  %v1440_v45 = vsel %vm1280_vm2, %v1229_v55, %v3210_v34  ;;  %v3115_v46 = vadd.f32 -1.0, %v3357_v36 }
 0x157   : > { %3360 = vpow2.f32 %v725_v37  ;;  %v1696_v47 = vmul.f32 0.5, %v1664_v38  ;;  %v3996_v48 = vadd.f32 %v3920_v28, %v1234_v44  ;;  %3242 = vmatmul.msk.f32.gmra.mxu3 %vm403_vm0, %v1440_v45  ;;  %v4001_v49 = vadd.f32 %v3827_v54, %v942_v43 }
 0x158   : > { %v592_v50 = vpop.f32.mrf.mxu0  ;;  %v2283_v51 = vsel %vm1723_vm4, %v2241_v41, 0.0  ;;  %v796_v55 = vsel %vm636_vm3, %v3950_v60, %v3115_v46 }
 0x159   : > { %1729 = vst.msk [vmem:[%s3863_s18 + $0x28] sm:$0xff] %vm1723_vm4, %v1696_v47  ;;  %v1314_v56 = vmin.f32 %v3996_v48, 0.0  ;;  %v4010_v57 = vadd.f32 %v3920_v28, %v592_v50  ;;  %2284 = vadd.xlane.f32.xlu1 %v2283_v51  ;;  %1807 = vadd.xlane.f32.xlu0 %v1806_v53  ;;  %v1763_v3 = vmul.f32 %v4001_v49, %v4001_v49  ;;  %vm1282_vm7 = vcmp.gt.f32.partialorder %v3996_v48, 0.0 }
 0x15a   : > { %3147 = vmatmul.msk.f32.gmra.mxu1 %vm403_vm0, %v796_v55  ;;  %v1581_v58 = vpop.f32.mrf.mxu3 }
 0x15b   : > { %v3359_v59 = vpop.eup %3358  ;;  %v1370_v63 = vmul.f32 1.442695, %v1314_v56  ;;  %v670_v0 = vmin.f32 %v4010_v57, 0.0  ;;  %v4015_v1 = vadd.f32 %v3827_v54, %v1581_v58  ;;  %v1809_v21 = vsel %vm1723_vm4, %v1763_v3, 0.0 }
 0x15c   : > { %v3211_v60 = vadd.f32 -1.0, %v3359_v59  ;;  %vm638_vm8 = vcmp.gt.f32.partialorder %v4010_v57, 0.0 }
 0x15d   : > { %v3361_v5 = vpop.eup %3360  ;;  %3362 = vpow2.f32 %v1370_v63  ;;  %v727_v6 = vmul.f32 1.442695, %v670_v0  ;;  %v1665_v7 = vadd.f32 %v4015_v1, %v3973_v19  ;;  %v2242_v8 = vmul.f32 %v4015_v1, %v4015_v1 }
 0x15e   : > { %v3116_v9 = vadd.f32 -1.0, %v3361_v5  ;;  %v945_v10 = vpop.f32.mrf.mxu1  ;;  %v1237_v11 = vpop.f32.mrf.mxu2  ;;  %v1441_v12 = vsel %vm1281_vm5, %v3967_v40, %v3211_v60 }
 0x15f   : > { %3364 = vpow2.f32 %v727_v6  ;;  %v1697_v13 = vmul.f32 0.5, %v1665_v7  ;;  %v4027_v15 = vadd.f32 %v3920_v28, %v1237_v11  ;;  %3243 = vmatmul.msk.f32.gmra.mxu3 %vm403_vm0, %v1441_v12  ;;  %v4031_v17 = vadd.f32 %v3827_v54, %v945_v10 }
 0x160   : > { %v595_v18 = vpop.f32.mrf.mxu0  ;;  %v2286_v20 = vsel %vm1723_vm4, %v2242_v8, 0.0  ;;  %v797_v22 = vsel %vm637_vm6, %v3981_v24, %v3116_v9 }
 0x161   : > { %1730 = vst.msk [vmem:[%s3863_s18 + $0x30] sm:$0xff] %vm1723_vm4, %v1697_v13  ;;  %v1315_v40 = vmin.f32 %v4027_v15, 0.0  ;;  %v4040_v23 = vadd.f32 %v3920_v28, %v595_v18  ;;  %2287 = vadd.xlane.f32.xlu2 %v2286_v20  ;;  %1810 = vadd.xlane.f32.xlu1 %v1809_v21  ;;  %v1764_v34 = vmul.f32 %v4031_v17, %v4031_v17  ;;  %vm1283_vm9 = vcmp.gt.f32.partialorder %v4027_v15, 0.0 }
 0x162   : > { %3148 = vmatmul.msk.f32.gmra.mxu1 %vm403_vm0, %v797_v22  ;;  %v1584_v25 = vpop.f32.mrf.mxu3 }
 0x163   : > { %v3363_v29 = vpop.eup %3362  ;;  %v1372_v30 = vmul.f32 1.442695, %v1315_v40  ;;  %v671_v31 = vmin.f32 %v4040_v23, 0.0  ;;  %v4045_v33 = vadd.f32 %v3827_v54, %v1584_v25  ;;  %v1812_v53 = vsel %vm1723_vm4, %v1764_v34, 0.0 }
 0x164   : > { %v3212_v24 = vadd.f32 -1.0, %v3363_v29  ;;  %vm639_vm10 = vcmp.gt.f32.partialorder %v4040_v23, 0.0 }
 0x165   : > { %v3365_v35 = vpop.eup %3364  ;;  %3366 = vpow2.f32 %v1372_v30  ;;  %v729_v36 = vmul.f32 1.442695, %v671_v31  ;;  %v1666_v37 = vadd.f32 %v4045_v33, %v4001_v49  ;;  %v2243_v38 = vmul.f32 %v4045_v33, %v4045_v33 }
 0x166   : > { %v3117_v41 = vadd.f32 -1.0, %v3365_v35  ;;  %v948_v43 = vpop.f32.mrf.mxu1  ;;  %v1240_v44 = vpop.f32.mrf.mxu2  ;;  %v1442_v45 = vsel %vm1282_vm7, %v3996_v48, %v3212_v24 }
 0x167   : > { %3368 = vpow2.f32 %v729_v36  ;;  %v1698_v46 = vmul.f32 0.5, %v1666_v37  ;;  %v4057_v47 = vadd.f32 %v3920_v28, %v1240_v44  ;;  %3244 = vmatmul.msk.f32.gmra.mxu3 %vm403_vm0, %v1442_v45  ;;  %v4061_v50 = vadd.f32 %v3827_v54, %v948_v43 }
 0x168   : > { %v598_v51 = vpop.f32.mrf.mxu0  ;;  %v2289_v55 = vsel %vm1723_vm4, %v2243_v38, 0.0  ;;  %v798_v56 = vsel %vm638_vm8, %v4010_v57, %v3117_v41 }
 0x169   : > { %1731 = vst.msk [vmem:[%s3863_s18 + $0x38] sm:$0xff] %vm1723_vm4, %v1698_v46  ;;  %v1316_v48 = vmin.f32 %v4057_v47, 0.0  ;;  %v4070_v58 = vadd.f32 %v3920_v28, %v598_v51  ;;  %1813 = vadd.xlane.f32.xlu2 %v1812_v53  ;;  %2290 = vadd.xlane.f32.xlu0 %v2289_v55  ;;  %v1765_v5 = vmul.f32 %v4061_v50, %v4061_v50  ;;  %vm1284_vm11 = vcmp.gt.f32.partialorder %v4057_v47, 0.0 }
 0x16a   : > { %3149 = vmatmul.msk.f32.gmra.mxu1 %vm403_vm0, %v798_v56  ;;  %v1587_v59 = vpop.f32.mrf.mxu3 }
 0x16b   : > { %v3367_v63 = vpop.eup %3366  ;;  %v1374_v0 = vmul.f32 1.442695, %v1316_v48  ;;  %v672_v60 = vmin.f32 %v4070_v58, 0.0  ;;  %v4075_v3 = vadd.f32 %v3827_v54, %v1587_v59  ;;  %v1815_v25 = vsel %vm1723_vm4, %v1765_v5, 0.0 }
 0x16c   : > { %v3213_v57 = vadd.f32 -1.0, %v3367_v63  ;;  %vm640_vm12 = vcmp.gt.f32.partialorder %v4070_v58, 0.0 }
 0x16d   : > { %v3369_v6 = vpop.eup %3368  ;;  %3370 = vpow2.f32 %v1374_v0  ;;  %v731_v7 = vmul.f32 1.442695, %v672_v60  ;;  %v1667_v8 = vadd.f32 %v4075_v3, %v4031_v17  ;;  %v2244_v9 = vmul.f32 %v4075_v3, %v4075_v3 }
 0x16e   : > { %v3118_v10 = vadd.f32 -1.0, %v3369_v6  ;;  %v951_v11 = vpop.f32.mrf.mxu1  ;;  %v1243_v12 = vpop.f32.mrf.mxu2  ;;  %v1443_v13 = vsel %vm1283_vm9, %v4027_v15, %v3213_v57 }
 0x16f   : > { %3372 = vpow2.f32 %v731_v7  ;;  %v1699_v18 = vmul.f32 0.5, %v1667_v8  ;;  %v4087_v20 = vadd.f32 %v3920_v28, %v1243_v12  ;;  %3245 = vmatmul.msk.f32.gmra.mxu3 %vm403_vm0, %v1443_v13  ;;  %v4091_v21 = vadd.f32 %v3827_v54, %v951_v11 }
 0x170   : > { %v601_v22 = vpop.f32.mrf.mxu0  ;;  %v2292_v40 = vsel %vm1723_vm4, %v2244_v9, 0.0  ;;  %v799_v29 = vsel %vm639_vm10, %v4040_v23, %v3118_v10  ;;  %vm2780_vm10 = vcmask 125952  }
 0x171   : > { %1732 = vst.msk [vmem:[%s3863_s18 + $0x40] sm:$0xff] %vm1723_vm4, %v1699_v18  ;;  %v1317_v15 = vmin.f32 %v4087_v20, 0.0  ;;  %v4100_v30 = vadd.f32 %v3920_v28, %v601_v22  ;;  %2293 = vadd.xlane.f32.xlu1 %v2292_v40  ;;  %1816 = vadd.xlane.f32.xlu0 %v1815_v25  ;;  %v1766_v37 = vmul.f32 %v4091_v21, %v4091_v21  ;;  %vm1285_vm13 = vcmp.gt.f32.partialorder %v4087_v20, 0.0 }
 0x172   : > { %3150 = vmatmul.msk.f32.gmra.mxu1 %vm403_vm0, %v799_v29  ;;  %v1590_v31 = vpop.f32.mrf.mxu3 }
 0x173   : > { %v3371_v24 = vpop.eup %3370  ;;  %v1376_v34 = vmul.f32 1.442695, %v1317_v15  ;;  %v673_v35 = vmin.f32 %v4100_v30, 0.0  ;;  %v4105_v36 = vadd.f32 %v3827_v54, %v1590_v31  ;;  %v1818_v0 = vsel %vm1723_vm4, %v1766_v37, 0.0 }
 0x174   : > { %v3214_v23 = vadd.f32 -1.0, %v3371_v24  ;;  %vm641_vm14 = vcmp.gt.f32.partialorder %v4100_v30, 0.0 }
 0x175   : > { %v3373_v38 = vpop.eup %3372  ;;  %3374 = vpow2.f32 %v1376_v34  ;;  %v733_v41 = vmul.f32 1.442695, %v673_v35  ;;  %v1668_v43 = vadd.f32 %v4105_v36, %v4061_v50  ;;  %v2245_v44 = vmul.f32 %v4105_v36, %v4105_v36 }
 0x176   : > { %v3119_v45 = vadd.f32 -1.0, %v3373_v38  ;;  %v954_v46 = vpop.f32.mrf.mxu1  ;;  %v1246_v51 = vpop.f32.mrf.mxu2  ;;  %v1444_v53 = vsel %vm1284_vm11, %v4057_v47, %v3214_v23 }
 0x177   : > { %3376 = vpow2.f32 %v733_v41  ;;  %v1700_v55 = vmul.f32 0.5, %v1668_v43  ;;  %v4117_v56 = vadd.f32 %v3920_v28, %v1246_v51  ;;  %3246 = vmatmul.msk.f32.gmra.mxu3 %vm403_vm0, %v1444_v53  ;;  %v4121_v48 = vadd.f32 %v3827_v54, %v954_v46 }
 0x178   : > { %v604_v59 = vpop.f32.mrf.mxu0  ;;  %v2295_v63 = vsel %vm1723_vm4, %v2245_v44, 0.0  ;;  %v800_v60 = vsel %vm640_vm12, %v4070_v58, %v3119_v45 }
 0x179   : > { %1733 = vst.msk [vmem:[%s3863_s18 + $0x48] sm:$0xff] %vm1723_vm4, %v1700_v55  ;;  %v1318_v47 = vmin.f32 %v4117_v56, 0.0  ;;  %v4130_v57 = vadd.f32 %v3920_v28, %v604_v59  ;;  %2296 = vadd.xlane.f32.xlu2 %v2295_v63  ;;  %1819 = vadd.xlane.f32.xlu1 %v1818_v0  ;;  %v1767_v10 = vmul.f32 %v4121_v48, %v4121_v48  ;;  %vm1286_vm15 = vcmp.gt.f32.partialorder %v4117_v56, 0.0 }
 0x17a   : > { %3151 = vmatmul.msk.f32.gmra.mxu1 %vm403_vm0, %v800_v60  ;;  %v1593_v5 = vpop.f32.mrf.mxu3 }
 0x17b   : > { %v3375_v6 = vpop.eup %3374  ;;  %v1378_v7 = vmul.f32 1.442695, %v1318_v47  ;;  %v674_v8 = vmin.f32 %v4130_v57, 0.0  ;;  %v4135_v9 = vadd.f32 %v3827_v54, %v1593_v5  ;;  %v1821_v35 = vsel %vm1723_vm4, %v1767_v10, 0.0 }
 0x17c   : > { %v3215_v58 = vadd.f32 -1.0, %v3375_v6  ;;  %vm642_vm1 = vcmp.gt.f32.partialorder %v4130_v57, 0.0 }
 0x17d   : > { %v3377_v11 = vpop.eup %3376  ;;  %3378 = vpow2.f32 %v1378_v7  ;;  %v735_v12 = vmul.f32 1.442695, %v674_v8  ;;  %v1669_v13 = vadd.f32 %v4135_v9, %v4091_v21  ;;  %v2246_v18 = vmul.f32 %v4135_v9, %v4135_v9 }
 0x17e   : > { %v3120_v22 = vadd.f32 -1.0, %v3377_v11  ;;  %v957_v40 = vpop.f32.mrf.mxu1  ;;  %v1249_v25 = vpop.f32.mrf.mxu2  ;;  %v1445_v29 = vsel %vm1285_vm13, %v4087_v20, %v3215_v58 }
 0x17f   : > { %3380 = vpow2.f32 %v735_v12  ;;  %v1701_v15 = vmul.f32 0.5, %v1669_v13  ;;  %v4147_v31 = vadd.f32 %v3920_v28, %v1249_v25  ;;  %3247 = vmatmul.msk.f32.gmra.mxu3 %vm403_vm0, %v1445_v29  ;;  %v4151_v24 = vadd.f32 %v3827_v54, %v957_v40 }
 0x180   : > { %v607_v34 = vpop.f32.mrf.mxu0  ;;  %v2298_v23 = vsel %vm1723_vm4, %v2246_v18, 0.0  ;;  %v801_v37 = vsel %vm641_vm14, %v4100_v30, %v3120_v22 }
 0x181   : > { %1734 = vst.msk [vmem:[%s3863_s18 + $0x50] sm:$0xff] %vm1723_vm4, %v1701_v15  ;;  %v1319_v20 = vmin.f32 %v4147_v31, 0.0  ;;  %v4160_v38 = vadd.f32 %v3920_v28, %v607_v34  ;;  %1822 = vadd.xlane.f32.xlu2 %v1821_v35  ;;  %2299 = vadd.xlane.f32.xlu0 %v2298_v23  ;;  %v1768_v51 = vmul.f32 %v4151_v24, %v4151_v24  ;;  %vm1287_vm2 = vcmp.gt.f32.partialorder %v4147_v31, 0.0 }
 0x182   : > { %3152 = vmatmul.msk.f32.gmra.mxu1 %vm403_vm0, %v801_v37  ;;  %v1596_v41 = vpop.f32.mrf.mxu3 }
 0x183   : > { %v3379_v43 = vpop.eup %3378  ;;  %v1380_v44 = vmul.f32 1.442695, %v1319_v20  ;;  %v675_v45 = vmin.f32 %v4160_v38, 0.0  ;;  %v4165_v46 = vadd.f32 %v3827_v54, %v1596_v41  ;;  %v1824_v11 = vsel %vm1723_vm4, %v1768_v51, 0.0 }
 0x184   : > { %v3216_v30 = vadd.f32 -1.0, %v3379_v43  ;;  %vm643_vm3 = vcmp.gt.f32.partialorder %v4160_v38, 0.0 }
 0x185   : > { %v3381_v53 = vpop.eup %3380  ;;  %3382 = vpow2.f32 %v1380_v44  ;;  %v737_v55 = vmul.f32 1.442695, %v675_v45  ;;  %v1670_v59 = vadd.f32 %v4165_v46, %v4121_v48  ;;  %v2247_v63 = vmul.f32 %v4165_v46, %v4165_v46 }
 0x186   : > { %v3121_v0 = vadd.f32 -1.0, %v3381_v53  ;;  %v960_v60 = vpop.f32.mrf.mxu1  ;;  %v1252_v47 = vpop.f32.mrf.mxu2  ;;  %v1446_v5 = vsel %vm1286_vm15, %v4117_v56, %v3216_v30 }
 0x187   : > { %3384 = vpow2.f32 %v737_v55  ;;  %v1702_v6 = vmul.f32 0.5, %v1670_v59  ;;  %v1253_v7 = vadd.f32 %v3920_v28, %v1252_v47  ;;  %3248 = vmatmul.msk.f32.gmra.mxu3 %vm403_vm0, %v1446_v5  ;;  %v4179_v8 = vadd.f32 %v3827_v54, %v960_v60 }
 0x188   : > { %v610_v58 = vpop.f32.mrf.mxu0  ;;  %v2301_v10 = vsel %vm1723_vm4, %v2247_v63, 0.0  ;;  %v802_v12 = vsel %vm642_vm1, %v4130_v57, %v3121_v0 }
 0x189   : > { %1735 = vst.msk [vmem:[%s3863_s18 + $0x58] sm:$0xff] %vm1723_vm4, %v1702_v6  ;;  %v1320_v56 = vmin.f32 %v1253_v7, 0.0  ;;  %v611_v13 = vadd.f32 %v3920_v28, %v610_v58  ;;  %2302 = vadd.xlane.f32.xlu1 %v2301_v10  ;;  %1825 = vadd.xlane.f32.xlu0 %v1824_v11  ;;  %v1769_v57 = vmul.f32 %v4179_v8, %v4179_v8  ;;  %vm1288_vm5 = vcmp.gt.f32.partialorder %v1253_v7, 0.0 }
 0x18a   : > { %3153 = vmatmul.msk.f32.gmra.mxu1 %vm403_vm0, %v802_v12  ;;  %v1599_v18 = vpop.f32.mrf.mxu3 }
 0x18b   : > { %v3383_v22 = vpop.eup %3382  ;;  %v1382_v40 = vmul.f32 1.442695, %v1320_v56  ;;  %v676_v25 = vmin.f32 %v611_v13, 0.0  ;;  %v4189_v29 = vadd.f32 %v3827_v54, %v1599_v18  ;;  %v1827_v55 = vsel %vm1723_vm4, %v1769_v57, 0.0 }
 0x18c   : > { %v3217_v15 = vadd.f32 -1.0, %v3383_v22  ;;  %vm644_vm6 = vcmp.gt.f32.partialorder %v611_v13, 0.0 }
 0x18d   : > { %v3385_v34 = vpop.eup %3384  ;;  %3386 = vpow2.f32 %v1382_v40  ;;  %v739_v35 = vmul.f32 1.442695, %v676_v25  ;;  %v1671_v23 = vadd.f32 %v4189_v29, %v4151_v24  ;;  %v2248_v37 = vmul.f32 %v4189_v29, %v4189_v29 }
 0x18e   : > { %v3122_v20 = vadd.f32 -1.0, %v3385_v34  ;;  %v963_v41 = vpop.f32.mrf.mxu1  ;;  %v1255_v43 = vpop.f32.mrf.mxu2  ;;  %v1447_v44 = vsel %vm1287_vm2, %v4147_v31, %v3217_v15 }
 0x18f   : > { %3388 = vpow2.f32 %v739_v35  ;;  %v1703_v45 = vmul.f32 0.5, %v1671_v23  ;;  %v1256_v30 = vadd.f32 %v3920_v28, %v1255_v43  ;;  %3249 = vmatmul.msk.f32.gmra.mxu3 %vm403_vm0, %v1447_v44  ;;  %v4203_v51 = vadd.f32 %v3827_v54, %v963_v41 }
 0x190   : > { %v2304_v53 = vsel %vm1723_vm4, %v2248_v37, 0.0  ;;  %v803_v59 = vsel %vm643_vm3, %v4160_v38, %v3122_v20 }
 0x191   : > { %1736 = vst.msk [vmem:[%s3863_s18 + $0x60] sm:$0xff] %vm1723_vm4, %v1703_v45  ;;  %v1321_v31 = vmin.f32 %v1256_v30, 0.0  ;;  %2305 = vadd.xlane.f32.xlu2 %v2304_v53  ;;  %1828 = vadd.xlane.f32.xlu1 %v1827_v55  ;;  %v1770_v5 = vmul.f32 %v4203_v51, %v4203_v51  ;;  %vm1289_vm7 = vcmp.gt.f32.partialorder %v1256_v30, 0.0  ;;  %v4245_v55 = vld [vmem:[%s5253_s5] ss:$0 sm:$0xff] }
 0x192   : > { %3154 = vmatmul.msk.f32.gmra.mxu1 %vm403_vm0, %v803_v59  ;;  %v1602_v63 = vpop.f32.mrf.mxu3 }
 0x193   : > { %v3387_v28 = vpop.eup %3386  ;;  %v1384_v0 = vmul.f32 1.442695, %v1321_v31  ;;  %v4212_v60 = vadd.f32 %v3827_v54, %v1602_v63  ;;  %v1830_v25 = vsel %vm1723_vm4, %v1770_v5, 0.0 }
 0x194   : > { %v3218_v47 = vadd.f32 -1.0, %v3387_v28 }
 0x195   : > { %v3389_v6 = vpop.eup %3388  ;;  %3390 = vpow2.f32 %v1384_v0  ;;  %v1672_v38 = vadd.f32 %v4212_v60, %v4179_v8  ;;  %v2249_v58 = vmul.f32 %v4212_v60, %v4212_v60 }
 0x196   : > { %v3123_v10 = vadd.f32 -1.0, %v3389_v6  ;;  %v966_v11 = vpop.f32.mrf.mxu1  ;;  %v1448_v12 = vsel %vm1288_vm5, %v1253_v7, %v3218_v47 }
 0x197   : > { %v1704_v56 = vmul.f32 0.5, %v1672_v38  ;;  %v4221_v18 = vadd.f32 %v3827_v54, %v966_v11  ;;  %3250 = vmatmul.msk.f32.gmra.mxu3 %vm403_vm0, %v1448_v12  ;;  %v1790_v22 = vpop.xlane.xlu0 %1789  ;;  %v2307_v40 = vsel %vm1723_vm4, %v2249_v58, 0.0 }
 0x198   : > { %3392 = vrsqrt.f32 %v1790_v22  ;;  %2308 = vadd.xlane.f32.xlu0 %v2307_v40  ;;  %v804_v15 = vsel %vm644_vm6, %v611_v13, %v3123_v10  ;;  %vm1890_vm8 = vweird.f32 %v1790_v22 }
 0x199   : > { %1737 = vst.msk [vmem:[%s3863_s18 + $0x68] sm:$0xff] %vm1723_vm4, %v1704_v56  ;;  %1831 = vadd.xlane.f32.xlu2 %v1830_v25  ;;  %v1771_v35 = vmul.f32 %v4221_v18, %v4221_v18 }
 0x19a   : > { %3155 = vmatmul.msk.f32.gmra.mxu1 %vm403_vm0, %v804_v15  ;;  %v1605_v7 = vpop.f32.mrf.mxu3 }
 0x19b   : > { %v3391_v57 = vpop.eup %3390  ;;  %v4230_v34 = vadd.f32 %v3827_v54, %v1605_v7  ;;  %v1833_v53 = vsel %vm1723_vm4, %v1771_v35, 0.0 }
 0x19c   : > { %v3219_v23 = vadd.f32 -1.0, %v3391_v57 }
 0x19d   : > { %v1673_v37 = vadd.f32 %v4230_v34, %v4203_v51  ;;  %v2250_v13 = vmul.f32 %v4230_v34, %v4230_v34 }
 0x19e   : > { %v3393_v20 = vpop.eup %3392  ;;  %v969_v41 = vpop.f32.mrf.mxu1  ;;  %v1449_v43 = vsel %vm1289_vm7, %v1256_v30, %v3219_v23 }
 0x19f   : > { %v1885_v44 = vmul.f32 %v3393_v20, %v1790_v22  ;;  %v1705_v45 = vmul.f32 0.5, %v1673_v37  ;;  %3251 = vmatmul.msk.f32.gmra.mxu3 %vm403_vm0, %v1449_v43  ;;  %v4239_v54 = vpop.xlane.xlu0 %1792  ;;  %v4248_v59 = vadd.f32 %v4245_v55, %v969_v41  ;;  %v2310_v30 = vsel %vm1723_vm4, %v2250_v13, 0.0 }
 0x1a0   : > { %3394 = vrsqrt.f32 %v4239_v54  ;;  %1834 = vadd.xlane.f32.xlu0 %v1833_v53  ;;  %2311 = vadd.xlane.f32.xlu1 %v2310_v30  ;;  %vm1891_vm0 = vweird.f32 %v3393_v20  ;;  %vm1900_vm12 = vweird.f32 %v4239_v54 }
 0x1a1   : > { %v1886_v31 = vmul.f32 %v3393_v20, %v1885_v44  ;;  %1738 = vst.msk [vmem:[%s3863_s18 + $0x70] sm:$0xff] %vm1723_vm4, %v1705_v45  ;;  %v1772_v5 = vmul.f32 %v4248_v59, %v4248_v59  ;;  %vm1892_vm9 = vmor %vm1890_vm8, %vm1891_vm0 }
 0x1a2   : > { %v1608_v63 = vpop.f32.mrf.mxu3 }
 0x1a3   : > { %v1887_v28 = vmul.f32 0.5, %v1886_v31  ;;  %v4255_v0 = vadd.f32 %v4245_v55, %v1608_v63  ;;  %v1836_v57 = vsel %vm1723_vm4, %v1772_v5, 0.0 }
 0x1a4   : > { %v4257_v47 = vpop.xlane.xlu2 %2269 }
 0x1a5   : > { %v1888_v6 = vsub.f32 1.5, %v1887_v28  ;;  %v1674_v38 = vadd.f32 %v4255_v0, %v4221_v18  ;;  %3396 = vrsqrt.f32 %v4257_v47  ;;  %v2251_v11 = vmul.f32 %v4255_v0, %v4255_v0 }
 0x1a6   : > { %v3395_v58 = vpop.eup %3394  ;;  %v972_v10 = vpop.f32.mrf.mxu1  ;;  %vm2370_vm15 = vweird.f32 %v4257_v47 }
 0x1a7   : > { %v1889_v12 = vmul.f32 %v3393_v20, %v1888_v6  ;;  %v1895_v56 = vmul.f32 %v3395_v58, %v4239_v54  ;;  %v1706_v40 = vmul.f32 0.5, %v1674_v38  ;;  %v4267_v25 = vpop.xlane.xlu1 %1795  ;;  %v4270_v15 = vadd.f32 %v4245_v55, %v972_v10 }
 0x1a8   : > { %3398 = vrsqrt.f32 %v4267_v25  ;;  %v2313_v7 = vsel %vm1723_vm4, %v2251_v11, 0.0  ;;  %1837 = vadd.xlane.f32.xlu1 %v1836_v57  ;;  %vm1901_vm11 = vweird.f32 %v3395_v58  ;;  %vm1910_vm3 = vweird.f32 %v4267_v25 }
 0x1a9   : > { %v1893_v35 = vsel %vm1892_vm9, %v3393_v20, %v1889_v12  ;;  %v1896_v23 = vmul.f32 %v3395_v58, %v1895_v56  ;;  %1739 = vst.msk [vmem:[%s3863_s18 + $0x78] sm:$0xff] %vm1723_vm4, %v1706_v40  ;;  %2314 = vadd.xlane.f32.xlu2 %v2313_v7  ;;  %v1773_v53 = vmul.f32 %v4270_v15, %v4270_v15  ;;  %vm1902_vm13 = vmor %vm1900_vm12, %vm1901_vm11 }
 0x1aa   : > { %v2204_v22 = vmul.f32 1.118034, %v1893_v35  ;;  %v1611_v37 = vpop.f32.mrf.mxu3 }
 0x1ab   : > { %v3397_v13 = vpop.eup %3396  ;;  %v1897_v41 = vmul.f32 0.5, %v1896_v23  ;;  %v4279_v43 = vadd.f32 %v4245_v55, %v1611_v37  ;;  %v1839_v40 = vsel %vm1723_vm4, %v1773_v53, 0.0 }
 0x1ac   : > { %v2716_v44 = vmul.f32 %v2204_v22, %v3830_v62  ;;  %v2365_v45 = vmul.f32 %v3397_v13, %v4257_v47  ;;  %v4283_v20 = vpop.xlane.xlu0 %2272  ;;  %vm2371_vm14 = vweird.f32 %v3397_v13 }
 0x1ad   : > { %v1898_v30 = vsub.f32 1.5, %v1897_v41  ;;  %v1675_v31 = vadd.f32 %v4279_v43, %v4248_v59  ;;  %3400 = vrsqrt.f32 %v4283_v20  ;;  %v2252_v6 = vmul.f32 %v4279_v43, %v4279_v43  ;;  %vm2372_vm1 = vmor %vm2370_vm15, %vm2371_vm14 }
 0x1ae   : > { %v3399_v62 = vpop.eup %3398  ;;  %v2748_v63 = vpack.c.bf16 %v2716_v44, %v2716_v44  ;;  %v2366_v28 = vmul.f32 %v3397_v13, %v2365_v45  ;;  %v975_v5 = vpop.f32.mrf.mxu1  ;;  %vm2380_vm7 = vweird.f32 %v4283_v20 }
 0x1af   : > { %v1899_v38 = vmul.f32 %v3395_v58, %v1898_v30  ;;  %v1905_v10 = vmul.f32 %v3399_v62, %v4267_v25  ;;  %v1707_v11 = vmul.f32 0.5, %v1675_v31  ;;  %v4301_v12 = vpop.xlane.xlu1 %1798  ;;  %v4310_v35 = vadd.f32 %v4245_v55, %v975_v5 }
 0x1b0   : > { %2781 = vst.msk [vmem:[%s4292_s25] sm:$0xf] %vm2780_vm10, %v2748_v63  ;;  %v2367_v56 = vmul.f32 0.5, %v2366_v28  ;;  %3402 = vrsqrt.f32 %v4301_v12  ;;  %v2316_v54 = vsel %vm1723_vm4, %v2252_v6, 0.0  ;;  %vm1911_vm2 = vweird.f32 %v3399_v62 }
 0x1b1   : > { %v1903_v7 = vsel %vm1902_vm13, %v3395_v58, %v1899_v38  ;;  %v1906_v57 = vmul.f32 %v3399_v62, %v1905_v10  ;;  %1740 = vst.msk [vmem:[%s3863_s18 + $0x80] sm:$0xff] %vm1723_vm4, %v1707_v11  ;;  %1840 = vadd.xlane.f32.xlu2 %v1839_v40  ;;  %2317 = vadd.xlane.f32.xlu0 %v2316_v54  ;;  %vm1912_vm5 = vmor %vm1910_vm3, %vm1911_vm2  ;;  %vm1920_vm9 = vweird.f32 %v4301_v12 }
 0x1b2   : > { %v2205_v23 = vmul.f32 1.118034, %v1903_v7  ;;  %v2368_v22 = vsub.f32 1.5, %v2367_v56  ;;  %v1614_v37 = vpop.f32.mrf.mxu3  ;;  %v1774_v28 = vmul.f32 %v4310_v35, %v4310_v35 }
 0x1b3   : > { %v3401_v41 = vpop.eup %3400  ;;  %v1907_v44 = vmul.f32 0.5, %v1906_v57  ;;  %v4314_v45 = vadd.f32 %v4245_v55, %v1614_v37 }
 0x1b4   : > { %v2717_v58 = vmul.f32 %v2205_v23, %v3840_v16  ;;  %v2369_v53 = vmul.f32 %v3397_v13, %v2368_v22  ;;  %v2375_v30 = vmul.f32 %v3401_v41, %v4283_v20  ;;  %vm2381_vm6 = vweird.f32 %v3401_v41 }
 0x1b5   : > { %v1908_v31 = vsub.f32 1.5, %v1907_v44  ;;  %v1676_v63 = vadd.f32 %v4314_v45, %v4270_v15  ;;  %v2253_v57 = vmul.f32 %v4314_v45, %v4314_v45  ;;  %v1842_v37 = vsel %vm1723_vm4, %v1774_v28, 0.0  ;;  %vm2382_vm0 = vmor %vm2380_vm7, %vm2381_vm6 }
 0x1b6   : > { %v4323_v5 = vpop.eup %3402  ;;  %v2749_v6 = vpack.c.bf16 %v2717_v58, %v2717_v58  ;;  %v2373_v38 = vsel %vm2372_vm1, %v3397_v13, %v2369_v53  ;;  %v2376_v16 = vmul.f32 %v3401_v41, %v2375_v30  ;;  %v978_v47 = vpop.f32.mrf.mxu1 }
 0x1b7   : > { %v2684_v10 = vmul.f32 1.118034, %v2373_v38  ;;  %v1909_v11 = vmul.f32 %v3399_v62, %v1908_v31  ;;  %v1915_v56 = vmul.f32 %v4323_v5, %v4301_v12  ;;  %v4328_v40 = vpop.xlane.xlu2 %1801  ;;  %v4330_v7 = vpop.xlane.xlu1 %2275  ;;  %v1708_v13 = vmul.f32 0.5, %v1676_v63 }
 0x1b8   : > { %2782 = vst.msk [vmem:[%s4292_s25 + $0x4] sm:$0xf] %vm2780_vm10, %v2749_v6  ;;  %v2377_v25 = vmul.f32 0.5, %v2376_v16  ;;  %3404 = vrsqrt.f32 %v4328_v40  ;;  %v4351_v53 = vadd.f32 %v4245_v55, %v978_v47  ;;  %v2319_v31 = vsel %vm1723_vm4, %v2253_v57, 0.0 }
 0x1b9   : > { %v2813_v54 = vmul.f32 %v2684_v10, %v3852_v27  ;;  %v1913_v23 = vsel %vm1912_vm5, %v3399_v62, %v1909_v11  ;;  %v1916_v22 = vmul.f32 %v4323_v5, %v1915_v56  ;;  %1741 = vst.msk [vmem:[%s3863_s18 + $0x88] sm:$0xff] %vm1723_vm4, %v1708_v13  ;;  %3406 = vrsqrt.f32 %v4330_v7  ;;  %1843 = vadd.xlane.f32.xlu0 %v1842_v37 }
 0x1ba   : > { %v2206_v44 = vmul.f32 1.118034, %v1913_v23  ;;  %v2378_v58 = vsub.f32 1.5, %v2377_v25  ;;  %v1617_v27 = vpop.f32.mrf.mxu3  ;;  %2320 = vadd.xlane.f32.xlu1 %v2319_v31  ;;  %vm1921_vm8 = vweird.f32 %v4323_v5  ;;  %v1775_v20 = vmul.f32 %v4351_v53, %v4351_v53 }
 0x1bb   : > { %v2845_v62 = vpack.c.bf16 %v2813_v54, %v2813_v54  ;;  %v1917_v30 = vmul.f32 0.5, %v1916_v22  ;;  %v4356_v63 = vadd.f32 %v4245_v55, %v1617_v27  ;;  %vm1922_vm11 = vmor %vm1920_vm9, %vm1921_vm8  ;;  %vm1930_vm13 = vweird.f32 %v4328_v40 }
 0x1bc   : > { %v2718_v28 = vmul.f32 %v2206_v44, %v3866_v39  ;;  %v2379_v6 = vmul.f32 %v3401_v41, %v2378_v58  ;;  %vm2390_vm1 = vweird.f32 %v4330_v7 }
 0x1bd   : > { %2877 = vst.msk [vmem:[%s4346_s29] sm:$0xf] %vm2780_vm10, %v2845_v62  ;;  %v1918_v38 = vsub.f32 1.5, %v1917_v30  ;;  %v1677_v16 = vadd.f32 %v4356_v63, %v4310_v35  ;;  %v2254_v39 = vmul.f32 %v4356_v63, %v4356_v63  ;;  %v1845_v30 = vsel %vm1723_vm4, %v1775_v20, 0.0 }
 0x1be   : > { %v3405_v47 = vpop.eup %3404  ;;  %v2750_v10 = vpack.c.bf16 %v2718_v28, %v2718_v28  ;;  %v2383_v11 = vsel %vm2382_vm0, %v3401_v41, %v2379_v6  ;;  %v981_v56 = vpop.f32.mrf.mxu1 }
 0x1bf   : > { %v2685_v57 = vmul.f32 1.118034, %v2383_v11  ;;  %v1919_v25 = vmul.f32 %v4323_v5, %v1918_v38  ;;  %v1925_v13 = vmul.f32 %v3405_v47, %v4328_v40  ;;  %v4373_v54 = vpop.xlane.xlu2 %2278  ;;  %v3407_v23 = vpop.eup %3406  ;;  %v1709_v41 = vmul.f32 0.5, %v1677_v16 }
 0x1c0   : > { %2783 = vst.msk [vmem:[%s4292_s25 + $0x8] sm:$0xf] %vm2780_vm10, %v2750_v10  ;;  %3408 = vrsqrt.f32 %v4373_v54  ;;  %v2385_v12 = vmul.f32 %v3407_v23, %v4330_v7  ;;  %v4386_v27 = vadd.f32 %v4245_v55, %v981_v56  ;;  %v2322_v62 = vsel %vm1723_vm4, %v2254_v39, 0.0 }
 0x1c1   : > { %v2814_v22 = vmul.f32 %v2685_v57, %v3881_v52  ;;  %v1923_v37 = vsel %vm1922_vm11, %v4323_v5, %v1919_v25  ;;  %v1926_v44 = vmul.f32 %v3405_v47, %v1925_v13  ;;  %1742 = vst.msk [vmem:[%s3863_s18 + $0x90] sm:$0xff] %vm1723_vm4, %v1709_v41  ;;  %2323 = vadd.xlane.f32.xlu2 %v2322_v62  ;;  %vm1931_vm12 = vweird.f32 %v3405_v47 }
 0x1c2   : > { %v2207_v58 = vmul.f32 1.118034, %v1923_v37  ;;  %v1620_v31 = vpop.f32.mrf.mxu3  ;;  %v2386_v52 = vmul.f32 %v3407_v23, %v2385_v12  ;;  %1846 = vadd.xlane.f32.xlu1 %v1845_v30  ;;  %v1776_v57 = vmul.f32 %v4386_v27, %v4386_v27  ;;  %vm2391_vm14 = vweird.f32 %v3407_v23  ;;  %vm1932_vm15 = vmor %vm1930_vm13, %vm1931_vm12 }
 0x1c3   : > { %v2846_v28 = vpack.c.bf16 %v2814_v22, %v2814_v22  ;;  %v1927_v6 = vmul.f32 0.5, %v1926_v44  ;;  %v4391_v5 = vadd.f32 %v4245_v55, %v1620_v31  ;;  %vm2392_vm2 = vmor %vm2390_vm1, %vm2391_vm14  ;;  %vm2400_vm5 = vweird.f32 %v4373_v54 }
 0x1c4   : > { %v2719_v38 = vmul.f32 %v2207_v58, %v3890_v2  ;;  %v4394_v16 = vpop.xlane.xlu0 %2281  ;;  %v2387_v11 = vmul.f32 0.5, %v2386_v52 }
 0x1c5   : > { %2878 = vst.msk [vmem:[%s4346_s29 + $0x4] sm:$0xf] %vm2780_vm10, %v2846_v28  ;;  %v1928_v10 = vsub.f32 1.5, %v1927_v6  ;;  %v1678_v56 = vadd.f32 %v4391_v5, %v4351_v53  ;;  %3410 = vrsqrt.f32 %v4394_v16  ;;  %v2255_v25 = vmul.f32 %v4391_v5, %v4391_v5 }
 0x1c6   : > { %v4401_v39 = vpop.eup %3408  ;;  %v2751_v20 = vpack.c.bf16 %v2719_v38, %v2719_v38  ;;  %v984_v2 = vpop.f32.mrf.mxu1  ;;  %v2388_v41 = vsub.f32 1.5, %v2387_v11  ;;  %v1848_v28 = vsel %vm1723_vm4, %v1776_v57, 0.0  ;;  %vm2410_vm7 = vweird.f32 %v4394_v16 }
 0x1c7   : > { %v1929_v13 = vmul.f32 %v3405_v47, %v1928_v10  ;;  %v2395_v22 = vmul.f32 %v4401_v39, %v4373_v54  ;;  %v4410_v37 = vpop.xlane.xlu2 %1804  ;;  %v1710_v40 = vmul.f32 0.5, %v1678_v56  ;;  %v4417_v44 = vadd.f32 %v4245_v55, %v984_v2 }
 0x1c8   : > { %2784 = vst.msk [vmem:[%s4292_s25 + $0xc] sm:$0xf] %vm2780_vm10, %v2751_v20  ;;  %3412 = vrsqrt.f32 %v4410_v37  ;;  %v2389_v58 = vmul.f32 %v3407_v23, %v2388_v41  ;;  %v2325_v30 = vsel %vm1723_vm4, %v2255_v25, 0.0  ;;  %vm2401_vm3 = vweird.f32 %v4401_v39 }
 0x1c9   : > { %v1933_v12 = vsel %vm1932_vm15, %v3405_v47, %v1929_v13  ;;  %v2396_v62 = vmul.f32 %v4401_v39, %v2395_v22  ;;  %1743 = vst.msk [vmem:[%s3863_s18 + $0x98] sm:$0xff] %vm1723_vm4, %v1710_v40  ;;  %2326 = vadd.xlane.f32.xlu0 %v2325_v30  ;;  %1849 = vadd.xlane.f32.xlu2 %v1848_v28  ;;  %vm2402_vm6 = vmor %vm2400_vm5, %vm2401_vm3  ;;  %vm1940_vm8 = vweird.f32 %v4410_v37 }
 0x1ca   : > { %v2208_v31 = vmul.f32 1.118034, %v1933_v12  ;;  %v1623_v7 = vpop.f32.mrf.mxu3  ;;  %v2393_v52 = vsel %vm2392_vm2, %v3407_v23, %v2389_v58 }
 0x1cb   : > { %v4425_v6 = vpop.eup %3410  ;;  %v2397_v38 = vmul.f32 0.5, %v2396_v62  ;;  %v4428_v47 = vadd.f32 %v4245_v55, %v1623_v7  ;;  %v2686_v11 = vmul.f32 1.118034, %v2393_v52 }
 0x1cc   : > { %v2720_v10 = vmul.f32 %v2208_v31, %v3915_v26  ;;  %v2405_v56 = vmul.f32 %v4425_v6, %v4394_v16  ;;  %v4434_v20 = vpop.xlane.xlu1 %2284  ;;  %v4436_v2 = vpop.xlane.xlu0 %1807  ;;  %v1777_v26 = vmul.f32 %v4417_v44, %v4417_v44  ;;  %vm2411_vm0 = vweird.f32 %v4425_v6 }
 0x1cd   : > { %v2398_v57 = vsub.f32 1.5, %v2397_v38  ;;  %v1679_v23 = vadd.f32 %v4428_v47, %v4386_v27  ;;  %3414 = vrsqrt.f32 %v4434_v20  ;;  %v2815_v41 = vmul.f32 %v2686_v11, %v3906_v14  ;;  %vm2412_vm11 = vmor %vm2410_vm7, %vm2411_vm0 }
 0x1ce   : > { %v4443_v25 = vpop.eup %3412  ;;  %v2752_v13 = vpack.c.bf16 %v2720_v10, %v2720_v10  ;;  %v2406_v22 = vmul.f32 %v4425_v6, %v2405_v56  ;;  %3416 = vrsqrt.f32 %v4436_v2  ;;  %v987_v40 = vpop.f32.mrf.mxu1  ;;  %v2256_v54 = vmul.f32 %v4428_v47, %v4428_v47 }
 0x1cf   : > { %v2399_v12 = vmul.f32 %v4401_v39, %v2398_v57  ;;  %v1935_v58 = vmul.f32 %v4443_v25, %v4410_v37  ;;  %v1711_v62 = vmul.f32 0.5, %v1679_v23  ;;  %v2847_v30 = vpack.c.bf16 %v2815_v41, %v2815_v41 }
 0x1d0   : > { %2785 = vst.msk [vmem:[%s4292_s25 + $0x10] sm:$0xf] %vm2780_vm10, %v2752_v13  ;;  %v2407_v14 = vmul.f32 0.5, %v2406_v22  ;;  %v4457_v31 = vadd.f32 %v4245_v55, %v987_v40  ;;  %v1851_v52 = vsel %vm1723_vm4, %v1777_v26, 0.0  ;;  %v2328_v57 = vsel %vm1723_vm4, %v2256_v54, 0.0 }
 0x1d1   : > { %v2403_v28 = vsel %vm2402_vm6, %v4401_v39, %v2399_v12  ;;  %v1936_v7 = vmul.f32 %v4443_v25, %v1935_v58  ;;  %1744 = vst.msk [vmem:[%s3863_s18 + $0xa0] sm:$0xff] %vm1723_vm4, %v1711_v62  ;;  %1852 = vadd.xlane.f32.xlu0 %v1851_v52  ;;  %vm1941_vm9 = vweird.f32 %v4443_v25  ;;  %2329 = vadd.xlane.f32.xlu1 %v2328_v57  ;;  %vm2420_vm13 = vweird.f32 %v4434_v20 }
 0x1d2   : > { %2879 = vst.msk [vmem:[%s4346_s29 + $0x8] sm:$0xf] %vm2780_vm10, %v2847_v30  ;;  %v2687_v38 = vmul.f32 1.118034, %v2403_v28  ;;  %v2408_v10 = vsub.f32 1.5, %v2407_v14  ;;  %v1626_v11 = vpop.f32.mrf.mxu3  ;;  %v1778_v30 = vmul.f32 %v4457_v31, %v4457_v31  ;;  %vm1942_vm12 = vmor %vm1940_vm8, %vm1941_vm9  ;;  %vm1950_vm2 = vweird.f32 %v4436_v2 }
 0x1d3   : > { %v4470_v39 = vpop.eup %3414  ;;  %v1937_v56 = vmul.f32 0.5, %v1936_v7  ;;  %v4475_v23 = vadd.f32 %v4245_v55, %v1626_v11 }
 0x1d4   : > { %v4477_v26 = vpop.eup %3416  ;;  %v2816_v13 = vmul.f32 %v2687_v38, %v3936_v42  ;;  %v2409_v41 = vmul.f32 %v4425_v6, %v2408_v10  ;;  %v2415_v22 = vmul.f32 %v4470_v39, %v4434_v20  ;;  %v4484_v40 = vpop.xlane.xlu2 %2287  ;;  %vm2421_vm14 = vweird.f32 %v4470_v39 }
 0x1d5   : > { %v1938_v12 = vsub.f32 1.5, %v1937_v56  ;;  %v1945_v42 = vmul.f32 %v4477_v26, %v4436_v2  ;;  %v1680_v58 = vadd.f32 %v4475_v23, %v4417_v44  ;;  %v4494_v62 = vpop.xlane.xlu1 %1810  ;;  %3418 = vrsqrt.f32 %v4484_v40  ;;  %vm2422_vm1 = vmor %vm2420_vm13, %vm2421_vm14 }
 0x1d6   : > { %v2848_v14 = vpack.c.bf16 %v2816_v13, %v2816_v13  ;;  %v2413_v28 = vsel %vm2412_vm11, %v4425_v6, %v2409_v41  ;;  %v2416_v7 = vmul.f32 %v4470_v39, %v2415_v22  ;;  %3420 = vrsqrt.f32 %v4494_v62 }
 0x1d7   : > { %v2688_v16 = vmul.f32 1.118034, %v2413_v28  ;;  %v1939_v54 = vmul.f32 %v4443_v25, %v1938_v12  ;;  %v1946_v52 = vmul.f32 %v4477_v26, %v1945_v42  ;;  %v1712_v38 = vmul.f32 0.5, %v1680_v58  ;;  %v990_v10 = vpop.f32.mrf.mxu1 }
 0x1d8   : > { %2880 = vst.msk [vmem:[%s4346_s29 + $0xc] sm:$0xf] %vm2780_vm10, %v2848_v14  ;;  %v2417_v6 = vmul.f32 0.5, %v2416_v7  ;;  %vm1951_vm15 = vweird.f32 %v4477_v26  ;;  %v2257_v37 = vmul.f32 %v4475_v23, %v4475_v23  ;;  %v4528_v7 = vadd.f32 %v4245_v55, %v990_v10 }
 0x1d9   : > { %v2817_v11 = vmul.f32 %v2688_v16, %v3958_v4  ;;  %v1943_v56 = vsel %vm1942_vm12, %v4443_v25, %v1939_v54  ;;  %v1947_v57 = vmul.f32 0.5, %v1946_v52  ;;  %1745 = vst.msk [vmem:[%s3863_s18 + $0xa8] sm:$0xff] %vm1723_vm4, %v1712_v38  ;;  %v1854_v4 = vsel %vm1723_vm4, %v1778_v30, 0.0  ;;  %vm1952_vm3 = vmor %vm1950_vm2, %vm1951_vm15 }
 0x1da   : > { %v2209_v13 = vmul.f32 1.118034, %v1943_v56  ;;  %v2418_v41 = vsub.f32 1.5, %v2417_v6  ;;  %v1629_v22 = vpop.f32.mrf.mxu3  ;;  %v2331_v16 = vsel %vm1723_vm4, %v2257_v37, 0.0  ;;  %1855 = vadd.xlane.f32.xlu1 %v1854_v4  ;;  %vm2430_vm5 = vweird.f32 %v4484_v40 }
 0x1db   : > { %v2849_v12 = vpack.c.bf16 %v2817_v11, %v2817_v11  ;;  %v1948_v42 = vsub.f32 1.5, %v1947_v57  ;;  %v4521_v25 = vadd.f32 %v4245_v55, %v1629_v22  ;;  %v4523_v58 = vpop.eup %3418  ;;  %2332 = vadd.xlane.f32.xlu2 %v2331_v16  ;;  %vm1960_vm8 = vweird.f32 %v4494_v62 }
 0x1dc   : > { %v2721_v14 = vmul.f32 %v2209_v13, %v3954_v61  ;;  %v2419_v28 = vmul.f32 %v4470_v39, %v2418_v41  ;;  %v4531_v54 = vpop.xlane.xlu2 %1813  ;;  %v4533_v52 = vpop.xlane.xlu0 %2290  ;;  %v2425_v30 = vmul.f32 %v4523_v58, %v4484_v40  ;;  %vm2431_vm6 = vweird.f32 %v4523_v58 }
 0x1dd   : > { %2881 = vst.msk [vmem:[%s4346_s29 + $0x10] sm:$0xf] %vm2780_vm10, %v2849_v12  ;;  %v1949_v61 = vmul.f32 %v4477_v26, %v1948_v42  ;;  %v1681_v38 = vadd.f32 %v4521_v25, %v4457_v31  ;;  %v4547_v10 = vpop.eup %3420  ;;  %3422 = vrsqrt.f32 %v4531_v54  ;;  %v2258_v4 = vmul.f32 %v4521_v25, %v4521_v25  ;;  %vm2432_vm0 = vmor %vm2430_vm5, %vm2431_vm6 }
 0x1de   : > { %v2753_v6 = vpack.c.bf16 %v2721_v14, %v2721_v14  ;;  %v2423_v11 = vsel %vm2422_vm1, %v4470_v39, %v2419_v28  ;;  %v2426_v56 = vmul.f32 %v4523_v58, %v2425_v30  ;;  %v1955_v57 = vmul.f32 %v4547_v10, %v4494_v62 }
 0x1df   : > { %v2689_v20 = vmul.f32 1.118034, %v2423_v11  ;;  %v1953_v2 = vsel %vm1952_vm3, %v4477_v26, %v1949_v61  ;;  %v993_v13 = vpop.f32.mrf.mxu1  ;;  %v1713_v37 = vmul.f32 0.5, %v1681_v38  ;;  %3424 = vrsqrt.f32 %v4533_v52 }
 0x1e0   : > { %2786 = vst.msk [vmem:[%s4292_s25 + $0x14] sm:$0xf] %vm2780_vm10, %v2753_v6  ;;  %v2210_v41 = vmul.f32 1.118034, %v1953_v2  ;;  %v1779_v39 = vmul.f32 %v4528_v7, %v4528_v7  ;;  %v2427_v12 = vmul.f32 0.5, %v2426_v56  ;;  %v1956_v26 = vmul.f32 %v4547_v10, %v1955_v57 }
 0x1e1   : > { %v2818_v22 = vmul.f32 %v2689_v20, %v3986_v32  ;;  %1746 = vst.msk [vmem:[%s3863_s18 + $0xb0] sm:$0xff] %vm1723_vm4, %v1713_v37  ;;  %v4577_v38 = vadd.f32 %v4245_v55, %v993_v13  ;;  %v2334_v11 = vsel %vm1723_vm4, %v2258_v4, 0.0  ;;  %vm1961_vm7 = vweird.f32 %v4547_v10 }
 0x1e2   : > { %v2722_v42 = vmul.f32 %v2210_v41, %v3973_v19  ;;  %v1632_v14 = vpop.f32.mrf.mxu3  ;;  %v2428_v16 = vsub.f32 1.5, %v2427_v12  ;;  %v1957_v61 = vmul.f32 0.5, %v1956_v26  ;;  %v1857_v6 = vsel %vm1723_vm4, %v1779_v39, 0.0  ;;  %2335 = vadd.xlane.f32.xlu0 %v2334_v11  ;;  %vm1962_vm9 = vmor %vm1960_vm8, %vm1961_vm7 }
 0x1e3   : > { %v2850_v28 = vpack.c.bf16 %v2818_v22, %v2818_v22  ;;  %v4572_v32 = vadd.f32 %v4245_v55, %v1632_v14  ;;  %v4574_v30 = vpop.eup %3422  ;;  %1858 = vadd.xlane.f32.xlu2 %v1857_v6  ;;  %v1780_v4 = vmul.f32 %v4577_v38, %v4577_v38  ;;  %vm1970_vm11 = vweird.f32 %v4531_v54 }
 0x1e4   : > { %v2754_v19 = vpack.c.bf16 %v2722_v42, %v2722_v42  ;;  %v4581_v20 = vpop.xlane.xlu1 %2293  ;;  %v2429_v2 = vmul.f32 %v4523_v58, %v2428_v16  ;;  %v1958_v56 = vsub.f32 1.5, %v1957_v61  ;;  %v1965_v57 = vmul.f32 %v4574_v30, %v4531_v54  ;;  %v4589_v13 = vpop.xlane.xlu0 %1816 }
 0x1e5   : > { %2882 = vst.msk [vmem:[%s4346_s29 + $0x14] sm:$0xf] %vm2780_vm10, %v2850_v28  ;;  %v4591_v41 = vpop.eup %3424  ;;  %v1682_v37 = vadd.f32 %v4572_v32, %v4528_v7  ;;  %3426 = vrsqrt.f32 %v4581_v20  ;;  %vm1971_vm12 = vweird.f32 %v4574_v30  ;;  %vm2440_vm15 = vweird.f32 %v4533_v52 }
 0x1e6   : > { %2787 = vst.msk [vmem:[%s4292_s25 + $0x18] sm:$0xf] %vm2780_vm10, %v2754_v19  ;;  %v2433_v39 = vsel %vm2432_vm0, %v4523_v58, %v2429_v2  ;;  %v1959_v22 = vmul.f32 %v4547_v10, %v1958_v56  ;;  %v1966_v12 = vmul.f32 %v4574_v30, %v1965_v57  ;;  %v2435_v26 = vmul.f32 %v4591_v41, %v4533_v52  ;;  %vm1972_vm14 = vmor %vm1970_vm11, %vm1971_vm12 }
 0x1e7   : > { %v996_v42 = vpop.f32.mrf.mxu1  ;;  %v2690_v40 = vmul.f32 1.118034, %v2433_v39  ;;  %v1714_v62 = vmul.f32 0.5, %v1682_v37  ;;  %3428 = vrsqrt.f32 %v4589_v13  ;;  %v2259_v19 = vmul.f32 %v4572_v32, %v4572_v32 }
 0x1e8   : > { %v1963_v58 = vsel %vm1962_vm9, %v4547_v10, %v1959_v22  ;;  %v1967_v14 = vmul.f32 0.5, %v1966_v12  ;;  %v2436_v28 = vmul.f32 %v4591_v41, %v2435_v26  ;;  %v4623_v10 = vadd.f32 %v4245_v55, %v996_v42 }
 0x1e9   : > { %v2819_v16 = vmul.f32 %v2690_v40, %v4015_v1  ;;  %v2211_v61 = vmul.f32 1.118034, %v1963_v58  ;;  %1747 = vst.msk [vmem:[%s3863_s18 + $0xb8] sm:$0xff] %vm1723_vm4, %v1714_v62  ;;  %v2337_v39 = vsel %vm1723_vm4, %v2259_v19, 0.0  ;;  %v1860_v22 = vsel %vm1723_vm4, %v1780_v4, 0.0 }
 0x1ea   : > { %v1635_v6 = vpop.f32.mrf.mxu3  ;;  %v1968_v11 = vsub.f32 1.5, %v1967_v14  ;;  %v2437_v2 = vmul.f32 0.5, %v2436_v28  ;;  %vm2441_vm13 = vweird.f32 %v4591_v41  ;;  %2338 = vadd.xlane.f32.xlu1 %v2337_v39  ;;  %1861 = vadd.xlane.f32.xlu0 %v1860_v22  ;;  %vm2450_vm2 = vweird.f32 %v4581_v20 }
 0x1eb   : > { %v4626_v56 = vadd.f32 %v4245_v55, %v1635_v6  ;;  %v4628_v57 = vpop.eup %3426  ;;  %v2851_v1 = vpack.c.bf16 %v2819_v16, %v2819_v16  ;;  %v2723_v37 = vmul.f32 %v2211_v61, %v4001_v49  ;;  %vm2442_vm1 = vmor %vm2440_vm15, %vm2441_vm13  ;;  %vm1980_vm7 = vweird.f32 %v4589_v13 }
 0x1ec   : > { %v4633_v12 = vpop.xlane.xlu2 %2296  ;;  %v1969_v26 = vmul.f32 %v4574_v30, %v1968_v11  ;;  %v2438_v40 = vsub.f32 1.5, %v2437_v2  ;;  %v2445_v42 = vmul.f32 %v4628_v57, %v4581_v20  ;;  %v4639_v62 = vpop.xlane.xlu1 %1819  ;;  %vm2451_vm3 = vweird.f32 %v4628_v57 }
 0x1ed   : > { %v4641_v49 = vpop.eup %3428  ;;  %2883 = vst.msk [vmem:[%s4346_s29 + $0x18] sm:$0xf] %vm2780_vm10, %v2851_v1  ;;  %v2755_v4 = vpack.c.bf16 %v2723_v37, %v2723_v37  ;;  %v1683_v58 = vadd.f32 %v4626_v56, %v4577_v38  ;;  %3430 = vrsqrt.f32 %v4633_v12  ;;  %v2260_v39 = vmul.f32 %v4626_v56, %v4626_v56  ;;  %vm2452_vm6 = vmor %vm2450_vm2, %vm2451_vm3 }
 0x1ee   : > { %v1973_v14 = vsel %vm1972_vm14, %v4574_v30, %v1969_v26  ;;  %v2439_v28 = vmul.f32 %v4591_v41, %v2438_v40  ;;  %v2446_v16 = vmul.f32 %v4628_v57, %v2445_v42  ;;  %v1975_v61 = vmul.f32 %v4641_v49, %v4589_v13 }
 0x1ef   : > { %v999_v19 = vpop.f32.mrf.mxu1  ;;  %2788 = vst.msk [vmem:[%s4292_s25 + $0x1c] sm:$0xf] %vm2780_vm10, %v2755_v4  ;;  %v2212_v54 = vmul.f32 1.118034, %v1973_v14  ;;  %v1715_v52 = vmul.f32 0.5, %v1683_v58  ;;  %3432 = vrsqrt.f32 %v4639_v62  ;;  %v1781_v30 = vmul.f32 %v4623_v10, %v4623_v10 }
 0x1f0   : > { %v2443_v6 = vsel %vm2442_vm1, %v4591_v41, %v2439_v28  ;;  %v2447_v11 = vmul.f32 0.5, %v2446_v16  ;;  %v1976_v2 = vmul.f32 %v4641_v49, %v1975_v61  ;;  %v4675_v41 = vadd.f32 %v4245_v55, %v999_v19 }
 0x1f1   : > { %v2724_v1 = vmul.f32 %v2212_v54, %v4031_v17  ;;  %v2691_v37 = vmul.f32 1.118034, %v2443_v6  ;;  %1748 = vst.msk [vmem:[%s3863_s18 + $0xc0] sm:$0xff] %vm1723_vm4, %v1715_v52  ;;  %v2340_v14 = vsel %vm1723_vm4, %v2260_v39, 0.0  ;;  %v1863_v28 = vsel %vm1723_vm4, %v1781_v30, 0.0 }
 0x1f2   : > { %v1638_v22 = vpop.f32.mrf.mxu3  ;;  %v2448_v26 = vsub.f32 1.5, %v2447_v11  ;;  %v1977_v40 = vmul.f32 0.5, %v1976_v2  ;;  %vm1981_vm5 = vweird.f32 %v4641_v49  ;;  %2341 = vadd.xlane.f32.xlu2 %v2340_v14  ;;  %1864 = vadd.xlane.f32.xlu1 %v1863_v28  ;;  %vm2460_vm8 = vweird.f32 %v4633_v12 }
 0x1f3   : > { %v4678_v42 = vadd.f32 %v4245_v55, %v1638_v22  ;;  %v4680_v4 = vpop.eup %3430  ;;  %v2756_v17 = vpack.c.bf16 %v2724_v1, %v2724_v1  ;;  %v2820_v58 = vmul.f32 %v2691_v37, %v4045_v33  ;;  %vm1982_vm0 = vmor %vm1980_vm7, %vm1981_vm5  ;;  %vm1990_vm11 = vweird.f32 %v4639_v62 }
 0x1f4   : > { %v4685_v16 = vpop.xlane.xlu2 %1822  ;;  %v4687_v61 = vpop.xlane.xlu0 %2299  ;;  %v2449_v19 = vmul.f32 %v4628_v57, %v2448_v26  ;;  %v1978_v54 = vsub.f32 1.5, %v1977_v40  ;;  %v2455_v52 = vmul.f32 %v4680_v4, %v4633_v12  ;;  %vm2461_vm9 = vweird.f32 %v4680_v4 }
 0x1f5   : > { %v4693_v33 = vpop.eup %3432  ;;  %2789 = vst.msk [vmem:[%s4292_s25 + $0x20] sm:$0xf] %vm2780_vm10, %v2756_v17  ;;  %v2852_v30 = vpack.c.bf16 %v2820_v58, %v2820_v58  ;;  %v1684_v6 = vadd.f32 %v4678_v42, %v4623_v10  ;;  %3434 = vrsqrt.f32 %v4685_v16  ;;  %vm2462_vm13 = vmor %vm2460_vm8, %vm2461_vm9  ;;  %vm2000_vm15 = vweird.f32 %v4685_v16 }
 0x1f6   : > { %v2453_v11 = vsel %vm2452_vm6, %v4628_v57, %v2449_v19  ;;  %v1979_v2 = vmul.f32 %v4641_v49, %v1978_v54  ;;  %v2456_v1 = vmul.f32 %v4680_v4, %v2455_v52  ;;  %v1985_v37 = vmul.f32 %v4693_v33, %v4639_v62 }
 0x1f7   : > { %v1002_v39 = vpop.f32.mrf.mxu1  ;;  %2884 = vst.msk [vmem:[%s4346_s29 + $0x1c] sm:$0xf] %vm2780_vm10, %v2852_v30  ;;  %v2692_v20 = vmul.f32 1.118034, %v2453_v11  ;;  %v1716_v13 = vmul.f32 0.5, %v1684_v6  ;;  %3436 = vrsqrt.f32 %v4687_v61  ;;  %v1782_v57 = vmul.f32 %v4675_v41, %v4675_v41 }
 0x1f8   : > { %v1983_v22 = vsel %vm1982_vm0, %v4641_v49, %v1979_v2  ;;  %v2457_v26 = vmul.f32 0.5, %v2456_v1  ;;  %v1986_v40 = vmul.f32 %v4693_v33, %v1985_v37  ;;  %v2261_v49 = vmul.f32 %v4678_v42, %v4678_v42 }
 0x1f9   : > { %v2821_v17 = vmul.f32 %v2692_v20, %v4075_v3  ;;  %v2213_v58 = vmul.f32 1.118034, %v1983_v22  ;;  %1749 = vst.msk [vmem:[%s3863_s18 + $0xc8] sm:$0xff] %vm1723_vm4, %v1716_v13  ;;  %v4734_v6 = vadd.f32 %v4245_v55, %v1002_v39  ;;  %v1866_v11 = vsel %vm1723_vm4, %v1782_v57, 0.0 }
 0x1fa   : > { %v1641_v14 = vpop.f32.mrf.mxu3  ;;  %v2458_v28 = vsub.f32 1.5, %v2457_v26  ;;  %v1987_v19 = vmul.f32 0.5, %v1986_v40  ;;  %vm1991_vm12 = vweird.f32 %v4693_v33  ;;  %1867 = vadd.xlane.f32.xlu2 %v1866_v11  ;;  %v2343_v39 = vsel %vm1723_vm4, %v2261_v49, 0.0 }
 0x1fb   : > { %v4728_v54 = vadd.f32 %v4245_v55, %v1641_v14  ;;  %v4730_v52 = vpop.eup %3434  ;;  %v2853_v3 = vpack.c.bf16 %v2821_v17, %v2821_v17  ;;  %v2725_v30 = vmul.f32 %v2213_v58, %v4061_v50  ;;  %2344 = vadd.xlane.f32.xlu0 %v2343_v39  ;;  %vm1992_vm14 = vmor %vm1990_vm11, %vm1991_vm12  ;;  %vm2470_vm2 = vweird.f32 %v4687_v61 }
 0x1fc   : > { %v4737_v2 = vpop.xlane.xlu1 %2302  ;;  %v2459_v1 = vmul.f32 %v4680_v4, %v2458_v28  ;;  %v1988_v37 = vsub.f32 1.5, %v1987_v19  ;;  %v1995_v20 = vmul.f32 %v4730_v52, %v4685_v16  ;;  %v4755_v22 = vpop.xlane.xlu0 %1825  ;;  %v1783_v28 = vmul.f32 %v4734_v6, %v4734_v6 }
 0x1fd   : > { %v4743_v13 = vpop.eup %3436  ;;  %2885 = vst.msk [vmem:[%s4346_s29 + $0x20] sm:$0xf] %vm2780_vm10, %v2853_v3  ;;  %v2757_v50 = vpack.c.bf16 %v2725_v30, %v2725_v30  ;;  %v1685_v57 = vadd.f32 %v4728_v54, %v4675_v41  ;;  %3438 = vrsqrt.f32 %v4737_v2  ;;  %vm2001_vm1 = vweird.f32 %v4730_v52 }
 0x1fe   : > { %v2463_v26 = vsel %vm2462_vm13, %v4680_v4, %v2459_v1  ;;  %v1989_v40 = vmul.f32 %v4693_v33, %v1988_v37  ;;  %v1996_v17 = vmul.f32 %v4730_v52, %v1995_v20  ;;  %v2465_v58 = vmul.f32 %v4743_v13, %v4687_v61  ;;  %vm2002_vm5 = vmor %vm2000_vm15, %vm2001_vm1 }
 0x1ff   : > { %v1005_v12 = vpop.f32.mrf.mxu1  ;;  %2790 = vst.msk [vmem:[%s4292_s25 + $0x24] sm:$0xf] %vm2780_vm10, %v2757_v50  ;;  %v2693_v14 = vmul.f32 1.118034, %v2463_v26  ;;  %v1717_v4 = vmul.f32 0.5, %v1685_v57  ;;  %3440 = vrsqrt.f32 %v4755_v22  ;;  %vm2471_vm3 = vweird.f32 %v4743_v13 }
 0x200   : > { %v1993_v19 = vsel %vm1992_vm14, %v4693_v33, %v1989_v40  ;;  %v1997_v49 = vmul.f32 0.5, %v1996_v17  ;;  %v2466_v3 = vmul.f32 %v4743_v13, %v2465_v58  ;;  %v2262_v33 = vmul.f32 %v4728_v54, %v4728_v54  ;;  %v4791_v57 = vld [vmem:[%s5253_s5] ss:$0 sm:$0xff]  ;;  %vm2472_vm7 = vmor %vm2470_vm2, %vm2471_vm3 }
 0x201   : > { %v2822_v30 = vmul.f32 %v2693_v14, %v4105_v36  ;;  %v2214_v11 = vmul.f32 1.118034, %v1993_v19  ;;  %1750 = vst.msk [vmem:[%s3863_s18 + $0xd0] sm:$0xff] %vm1723_vm4, %v1717_v4  ;;  %v4786_v39 = vadd.f32 %v4245_v55, %v1005_v12  ;;  %vm2480_vm6 = vweird.f32 %v4737_v2 }
 0x202   : > { %v1644_v62 = vpop.f32.mrf.mxu3  ;;  %v1998_v1 = vsub.f32 1.5, %v1997_v49  ;;  %v2467_v37 = vmul.f32 0.5, %v2466_v3  ;;  %v2346_v12 = vsel %vm1723_vm4, %v2262_v33, 0.0  ;;  %vm2010_vm11 = vweird.f32 %v4755_v22 }
 0x203   : > { %v4782_v20 = vpop.eup %3438  ;;  %v2854_v50 = vpack.c.bf16 %v2822_v30, %v2822_v30  ;;  %v2726_v36 = vmul.f32 %v2214_v11, %v4091_v21  ;;  %v4794_v26 = vadd.f32 %v4791_v57, %v1644_v62  ;;  %v1869_v21 = vsel %vm1723_vm4, %v1783_v28, 0.0  ;;  %2347 = vadd.xlane.f32.xlu1 %v2346_v12 }
 0x204   : > { %v4796_v40 = vpop.xlane.xlu2 %2305  ;;  %v1999_v17 = vmul.f32 %v4730_v52, %v1998_v1  ;;  %v2468_v58 = vsub.f32 1.5, %v2467_v37  ;;  %v2475_v14 = vmul.f32 %v4782_v20, %v4737_v2  ;;  %v4812_v19 = vpop.xlane.xlu1 %1828  ;;  %1870 = vadd.xlane.f32.xlu0 %v1869_v21  ;;  %v1784_v1 = vmul.f32 %v4786_v39, %v4786_v39 }
 0x205   : > { %2886 = vst.msk [vmem:[%s4346_s29 + $0x24] sm:$0xf] %vm2780_vm10, %v2854_v50  ;;  %v2758_v55 = vpack.c.bf16 %v2726_v36, %v2726_v36  ;;  %v1686_v4 = vadd.f32 %v4794_v26, %v4734_v6  ;;  %3442 = vrsqrt.f32 %v4796_v40  ;;  %v4814_v49 = vpop.eup %3440  ;;  %vm2481_vm0 = vweird.f32 %v4782_v20 }
 0x206   : > { %v2003_v28 = vsel %vm2002_vm5, %v4730_v52, %v1999_v17  ;;  %v2469_v3 = vmul.f32 %v4743_v13, %v2468_v58  ;;  %v2476_v30 = vmul.f32 %v4782_v20, %v2475_v14  ;;  %v2005_v52 = vmul.f32 %v4814_v49, %v4755_v22  ;;  %vm2482_vm9 = vmor %vm2480_vm6, %vm2481_vm0 }
 0x207   : > { %v1008_v16 = vpop.f32.mrf.mxu1  ;;  %2791 = vst.msk [vmem:[%s4292_s25 + $0x28] sm:$0xf] %vm2780_vm10, %v2758_v55  ;;  %v2215_v11 = vmul.f32 1.118034, %v2003_v28  ;;  %v1718_v62 = vmul.f32 0.5, %v1686_v4  ;;  %3444 = vrsqrt.f32 %v4812_v19  ;;  %vm2011_vm8 = vweird.f32 %v4814_v49 }
 0x208   : > { %v2473_v37 = vsel %vm2472_vm7, %v4743_v13, %v2469_v3  ;;  %v2477_v33 = vmul.f32 0.5, %v2476_v30  ;;  %v2006_v61 = vmul.f32 %v4814_v49, %v2005_v52  ;;  %v4839_v14 = vadd.f32 %v4791_v57, %v1008_v16  ;;  %vm2012_vm14 = vmor %vm2010_vm11, %vm2011_vm8 }
 0x209   : > { %v2727_v50 = vmul.f32 %v2215_v11, %v4121_v48  ;;  %v2694_v36 = vmul.f32 1.118034, %v2473_v37  ;;  %1751 = vst.msk [vmem:[%s3863_s18 + $0xd8] sm:$0xff] %vm1723_vm4, %v1718_v62  ;;  %v2263_v13 = vmul.f32 %v4794_v26, %v4794_v26  ;;  %v1872_v52 = vsel %vm1723_vm4, %v1784_v1, 0.0 }
 0x20a   : > { %v1647_v17 = vpop.f32.mrf.mxu3  ;;  %v2478_v58 = vsub.f32 1.5, %v2477_v33  ;;  %v2007_v28 = vmul.f32 0.5, %v2006_v61  ;;  %vm2490_vm12 = vweird.f32 %v4796_v40  ;;  %vm2020_vm13 = vweird.f32 %v4812_v19 }
 0x20b   : > { %v4844_v21 = vadd.f32 %v4791_v57, %v1647_v17  ;;  %v4846_v48 = vpop.xlane.xlu0 %2308  ;;  %v4848_v55 = vpop.eup %3442  ;;  %v2759_v12 = vpack.c.bf16 %v2727_v50, %v2727_v50  ;;  %v2823_v4 = vmul.f32 %v2694_v36, %v4135_v9  ;;  %v2349_v11 = vsel %vm1723_vm4, %v2263_v13, 0.0  ;;  %1873 = vadd.xlane.f32.xlu1 %v1872_v52 }
 0x20c   : > { %v4851_v3 = vpop.xlane.xlu2 %1831  ;;  %3446 = vrsqrt.f32 %v4846_v48  ;;  %v2479_v30 = vmul.f32 %v4782_v20, %v2478_v58  ;;  %v2485_v16 = vmul.f32 %v4848_v55, %v4796_v40  ;;  %v2008_v9 = vsub.f32 1.5, %v2007_v28  ;;  %2350 = vadd.xlane.f32.xlu2 %v2349_v11 }
 0x20d   : > { %2792 = vst.msk [vmem:[%s4292_s25 + $0x2c] sm:$0xf] %vm2780_vm10, %v2759_v12  ;;  %v2855_v62 = vpack.c.bf16 %v2823_v4, %v2823_v4  ;;  %v1687_v37 = vadd.f32 %v4844_v21, %v4786_v39  ;;  %3448 = vrsqrt.f32 %v4851_v3  ;;  %v4868_v33 = vpop.eup %3444  ;;  %vm2491_vm15 = vweird.f32 %v4848_v55 }
 0x20e   : > { %v2483_v50 = vsel %vm2482_vm9, %v4782_v20, %v2479_v30  ;;  %v2486_v1 = vmul.f32 %v4848_v55, %v2485_v16  ;;  %v2009_v61 = vmul.f32 %v4814_v49, %v2008_v9  ;;  %v2015_v17 = vmul.f32 %v4868_v33, %v4812_v19  ;;  %vm2492_vm2 = vmor %vm2490_vm12, %vm2491_vm15 }
 0x20f   : > { %v1011_v2 = vpop.f32.mrf.mxu1  ;;  %2887 = vst.msk [vmem:[%s4346_s29 + $0x28] sm:$0xf] %vm2780_vm10, %v2855_v62  ;;  %v2695_v36 = vmul.f32 1.118034, %v2483_v50  ;;  %v1719_v20 = vmul.f32 0.5, %v1687_v37  ;;  %v1785_v58 = vmul.f32 %v4839_v14, %v4839_v14  ;;  %v2264_v30 = vmul.f32 %v4844_v21, %v4844_v21 }
 0x210   : > { %v2487_v22 = vmul.f32 0.5, %v2486_v1  ;;  %v2013_v4 = vsel %vm2012_vm14, %v4814_v49, %v2009_v61  ;;  %v2016_v28 = vmul.f32 %v4868_v33, %v2015_v17  ;;  %vm2021_vm1 = vweird.f32 %v4868_v33 }
 0x211   : > { %v2824_v12 = vmul.f32 %v2695_v36, %v4165_v46  ;;  %v2216_v11 = vmul.f32 1.118034, %v2013_v4  ;;  %1752 = vst.msk [vmem:[%s3863_s18 + $0xe0] sm:$0xff] %vm1723_vm4, %v1719_v20  ;;  %v4900_v37 = vadd.f32 %v4791_v57, %v1011_v2  ;;  %v2352_v50 = vsel %vm1723_vm4, %v2264_v30, 0.0  ;;  %vm2022_vm5 = vmor %vm2020_vm13, %vm2021_vm1 }
 0x212   : > { %v4885_v13 = vpop.eup %3446  ;;  %v1650_v16 = vpop.f32.mrf.mxu3  ;;  %v2488_v52 = vsub.f32 1.5, %v2487_v22  ;;  %v2017_v49 = vmul.f32 0.5, %v2016_v28  ;;  %v1875_v22 = vsel %vm1723_vm4, %v1785_v58, 0.0  ;;  %2353 = vadd.xlane.f32.xlu0 %v2352_v50  ;;  %vm2030_vm7 = vweird.f32 %v4851_v3 }
 0x213   : > { %v2495_v62 = vmul.f32 %v4885_v13, %v4846_v48  ;;  %v4897_v9 = vpop.eup %3448  ;;  %v2856_v46 = vpack.c.bf16 %v2824_v12, %v2824_v12  ;;  %v4903_v1 = vpop.xlane.xlu1 %2311  ;;  %v2728_v36 = vmul.f32 %v2216_v11, %v4151_v24  ;;  %v4918_v24 = vadd.f32 %v4791_v57, %v1650_v16 }
 0x214   : > { %v2489_v61 = vmul.f32 %v4848_v55, %v2488_v52  ;;  %v2025_v17 = vmul.f32 %v4897_v9, %v4851_v3  ;;  %v2018_v2 = vsub.f32 1.5, %v2017_v49  ;;  %1876 = vadd.xlane.f32.xlu2 %v1875_v22  ;;  %3450 = vrsqrt.f32 %v4903_v1  ;;  %v4921_v12 = vpop.xlane.xlu0 %1834 }
 0x215   : > { %2888 = vst.msk [vmem:[%s4346_s29 + $0x2c] sm:$0xf] %vm2780_vm10, %v2856_v46  ;;  %v2496_v20 = vmul.f32 %v4885_v13, %v2495_v62  ;;  %v2760_v58 = vpack.c.bf16 %v2728_v36, %v2728_v36  ;;  %vm2501_vm3 = vweird.f32 %v4885_v13  ;;  %v1688_v16 = vadd.f32 %v4918_v24, %v4839_v14 }
 0x216   : > { %v2493_v4 = vsel %vm2492_vm2, %v4848_v55, %v2489_v61  ;;  %v2026_v28 = vmul.f32 %v4897_v9, %v2025_v17  ;;  %v2019_v11 = vmul.f32 %v4868_v33, %v2018_v2  ;;  %vm2031_vm6 = vweird.f32 %v4897_v9 }
 0x217   : > { %v1014_v40 = vpop.f32.mrf.mxu1  ;;  %v2696_v30 = vmul.f32 1.118034, %v2493_v4  ;;  %v2497_v52 = vmul.f32 0.5, %v2496_v20  ;;  %2793 = vst.msk [vmem:[%s4292_s25 + $0x30] sm:$0xf] %vm2780_vm10, %v2760_v58  ;;  %3452 = vrsqrt.f32 %v4921_v12  ;;  %v1720_v36 = vmul.f32 0.5, %v1688_v16  ;;  %vm2032_vm9 = vmor %vm2030_vm7, %vm2031_vm6 }
 0x218   : > { %v2027_v55 = vmul.f32 0.5, %v2026_v28  ;;  %v4938_v62 = vadd.f32 %v4791_v57, %v1014_v40  ;;  %v2023_v49 = vsel %vm2022_vm5, %v4868_v33, %v2019_v11  ;;  %v1786_v22 = vmul.f32 %v4900_v37, %v4900_v37 }
 0x219   : > { %v2825_v46 = vmul.f32 %v2696_v30, %v4189_v29  ;;  %v2498_v50 = vsub.f32 1.5, %v2497_v52  ;;  %v2217_v17 = vmul.f32 1.118034, %v2023_v49  ;;  %vm2500_vm0 = vweird.f32 %v4846_v48  ;;  %1753 = vst.msk [vmem:[%s3863_s18 + $0xe8] sm:$0xff] %vm1723_vm4, %v1720_v36 }
 0x21a   : > { %v1653_v61 = vpop.f32.mrf.mxu3  ;;  %v2028_v19 = vsub.f32 1.5, %v2027_v55  ;;  %v4947_v20 = vpop.eup %3450  ;;  %vm2502_vm8 = vmor %vm2500_vm0, %vm2501_vm3  ;;  %v1787_v3 = vmul.f32 %v4938_v62, %v4938_v62  ;;  %vm2510_vm12 = vweird.f32 %v4903_v1  ;;  %vm2040_vm15 = vweird.f32 %v4921_v12 }
 0x21b   : > { %v4945_v2 = vadd.f32 %v4791_v57, %v1653_v61  ;;  %v2857_v58 = vpack.c.bf16 %v2825_v46, %v2825_v46  ;;  %v2499_v29 = vmul.f32 %v4885_v13, %v2498_v50  ;;  %v2729_v4 = vmul.f32 %v2217_v17, %v4179_v8  ;;  %v4973_v11 = vpop.xlane.xlu1 %1837 }
 0x21c   : > { %v4954_v33 = vpop.xlane.xlu2 %2314  ;;  %v2029_v28 = vmul.f32 %v4897_v9, %v2028_v19  ;;  %v2505_v40 = vmul.f32 %v4947_v20, %v4903_v1  ;;  %v1878_v8 = vsel %vm1723_vm4, %v1786_v22, 0.0  ;;  %vm2511_vm11 = vweird.f32 %v4947_v20 }
 0x21d   : > { %2889 = vst.msk [vmem:[%s4346_s29 + $0x30] sm:$0xf] %vm2780_vm10, %v2857_v58  ;;  %v2503_v48 = vsel %vm2502_vm8, %v4885_v13, %v2499_v29  ;;  %v1689_v30 = vadd.f32 %v4945_v2, %v4900_v37  ;;  %3454 = vrsqrt.f32 %v4954_v33  ;;  %v3453_v52 = vpop.eup %3452  ;;  %v2761_v16 = vpack.c.bf16 %v2729_v4, %v2729_v4  ;;  %1879 = vadd.xlane.f32.xlu0 %v1878_v8  ;;  %vm2512_vm13 = vmor %vm2510_vm12, %vm2511_vm11 }
 0x21e   : > { %v2033_v55 = vsel %vm2032_vm9, %v4897_v9, %v2029_v28  ;;  %v2697_v46 = vmul.f32 1.118034, %v2503_v48  ;;  %v2506_v49 = vmul.f32 %v4947_v20, %v2505_v40  ;;  %v2035_v13 = vmul.f32 %v3453_v52, %v4921_v12 }
 0x21f   : > { %v2218_v50 = vmul.f32 1.118034, %v2033_v55  ;;  %v1721_v36 = vmul.f32 0.5, %v1689_v30  ;;  %2794 = vst.msk [vmem:[%s4292_s25 + $0x34] sm:$0xf] %vm2780_vm10, %v2761_v16  ;;  %3456 = vrsqrt.f32 %v4973_v11  ;;  %v1881_v22 = vsel %vm1723_vm4, %v1787_v3, 0.0 }
 0x220   : > { %v2826_v61 = vmul.f32 %v2697_v46, %v4212_v60  ;;  %v2507_v17 = vmul.f32 0.5, %v2506_v49  ;;  %v2036_v9 = vmul.f32 %v3453_v52, %v2035_v13  ;;  %1882 = vadd.xlane.f32.xlu1 %v1881_v22  ;;  %v2266_v60 = vmul.f32 %v4945_v2, %v4945_v2 }
 0x221   : > { %v2730_v19 = vmul.f32 %v2218_v50, %v4203_v51  ;;  %1754 = vst.msk [vmem:[%s3863_s18 + $0xf0] sm:$0xff] %vm1723_vm4, %v1721_v36  ;;  %vm2041_vm14 = vweird.f32 %v3453_v52  ;;  %vm2520_vm3 = vweird.f32 %v4954_v33  ;;  %vm2050_vm6 = vweird.f32 %v4973_v11 }
 0x222   : > { %v1656_v58 = vpop.f32.mrf.mxu3  ;;  %v2858_v29 = vpack.c.bf16 %v2826_v61, %v2826_v61  ;;  %v2508_v4 = vsub.f32 1.5, %v2507_v17  ;;  %v2037_v48 = vmul.f32 0.5, %v2036_v9  ;;  %v2358_v16 = vsel %vm1723_vm4, %v2266_v60, 0.0  ;;  %vm2042_vm1 = vmor %vm2040_vm15, %vm2041_vm14 }
 0x223   : > { %v4990_v28 = vadd.f32 %v4791_v57, %v1656_v58  ;;  %v3455_v51 = vpop.eup %3454  ;;  %v2762_v40 = vpack.c.bf16 %v2730_v19, %v2730_v19  ;;  %v2265_v57 = vmul.f32 %v4918_v24, %v4918_v24  ;;  %2359 = vadd.xlane.f32.xlu2 %v2358_v16 }
 0x224   : > { %v4993_v8 = vpop.xlane.xlu2 %1840  ;;  %2890 = vst.msk [vmem:[%s4346_s29 + $0x34] sm:$0xf] %vm2780_vm10, %v2858_v29  ;;  %v2509_v3 = vmul.f32 %v4947_v20, %v2508_v4  ;;  %v2515_v30 = vmul.f32 %v3455_v51, %v4954_v33  ;;  %v5000_v55 = vpop.xlane.xlu0 %2317  ;;  %v2038_v1 = vsub.f32 1.5, %v2037_v48  ;;  %vm2521_vm2 = vweird.f32 %v3455_v51 }
 0x225   : > { %2795 = vst.msk [vmem:[%s4292_s25 + $0x38] sm:$0xf] %vm2780_vm10, %v2762_v40  ;;  %v1690_v46 = vadd.f32 %v4990_v28, %v4938_v62  ;;  %3458 = vrsqrt.f32 %v4993_v8  ;;  %v3457_v49 = vpop.eup %3456  ;;  %v2267_v22 = vmul.f32 %v4990_v28, %v4990_v28  ;;  %v2355_v4 = vsel %vm1723_vm4, %v2265_v57, 0.0  ;;  %vm2522_vm5 = vmor %vm2520_vm3, %vm2521_vm2 }
 0x226   : > { %v2513_v50 = vsel %vm2512_vm13, %v4947_v20, %v2509_v3  ;;  %v2516_v13 = vmul.f32 %v3455_v51, %v2515_v30  ;;  %3460 = vrsqrt.f32 %v5000_v55  ;;  %v2039_v61 = vmul.f32 %v3453_v52, %v2038_v1 }
 0x227   : > { %v2698_v36 = vmul.f32 1.118034, %v2513_v50  ;;  %v2045_v17 = vmul.f32 %v3457_v49, %v4973_v11  ;;  %v1722_v9 = vmul.f32 0.5, %v1690_v46  ;;  %v2361_v12 = vsel %vm1723_vm4, %v2267_v22, 0.0 }
 0x228   : > { %v2517_v19 = vmul.f32 0.5, %v2516_v13  ;;  %v2043_v29 = vsel %vm2042_vm1, %v3453_v52, %v2039_v61  ;;  %2356 = vadd.xlane.f32.xlu1 %v2355_v4  ;;  %2362 = vadd.xlane.f32.xlu0 %v2361_v12  ;;  %vm2060_vm9 = vweird.f32 %v4993_v8  ;;  %vm2530_vm12 = vweird.f32 %v5000_v55 }
 0x229   : > { %v2827_v58 = vmul.f32 %v2698_v36, %v4230_v34  ;;  %v2046_v20 = vmul.f32 %v3457_v49, %v2045_v17  ;;  %v2219_v60 = vmul.f32 1.118034, %v2043_v29  ;;  %1755 = vst.msk [vmem:[%s3863_s18 + $0xf8] sm:$0xff] %vm1723_vm4, %v1722_v9  ;;  %vm2051_vm4 = vweird.f32 %v3457_v49 }
 0x22a   : > { %v2518_v40 = vsub.f32 1.5, %v2517_v19  ;;  %vm2052_vm7 = vmor %vm2050_vm6, %vm2051_vm4 }
 0x22b   : > { %v3459_v48 = vpop.eup %3458  ;;  %v2859_v3 = vpack.c.bf16 %v2827_v58, %v2827_v58  ;;  %v2047_v30 = vmul.f32 0.5, %v2046_v20  ;;  %v2731_v34 = vmul.f32 %v2219_v60, %v4221_v18 }
 0x22c   : > { %v3461_v16 = vpop.eup %3460  ;;  %v2519_v52 = vmul.f32 %v3455_v51, %v2518_v40  ;;  %v2055_v57 = vmul.f32 %v3459_v48, %v4993_v8  ;;  %v5025_v1 = vpop.xlane.xlu0 %1843  ;;  %vm2061_vm0 = vweird.f32 %v3459_v48 }
 0x22d   : > { %2891 = vst.msk [vmem:[%s4346_s29 + $0x38] sm:$0xf] %vm2780_vm10, %v2859_v3  ;;  %v2048_v46 = vsub.f32 1.5, %v2047_v30  ;;  %v2525_v50 = vmul.f32 %v3461_v16, %v5000_v55  ;;  %3462 = vrsqrt.f32 %v5025_v1  ;;  %v2763_v13 = vpack.c.bf16 %v2731_v34, %v2731_v34  ;;  %v5033_v36 = vpop.xlane.xlu1 %2320  ;;  %vm2062_vm11 = vmor %vm2060_vm9, %vm2061_vm0 }
 0x22e   : > { %v2523_v18 = vsel %vm2522_vm5, %v3455_v51, %v2519_v52  ;;  %v2056_v33 = vmul.f32 %v3459_v48, %v2055_v57  ;;  %3464 = vrsqrt.f32 %v5033_v36  ;;  %vm2531_vm8 = vweird.f32 %v3461_v16 }
 0x22f   : > { %v2699_v61 = vmul.f32 1.118034, %v2523_v18  ;;  %v2049_v17 = vmul.f32 %v3457_v49, %v2048_v46  ;;  %v2526_v19 = vmul.f32 %v3461_v16, %v2525_v50  ;;  %2796 = vst.msk [vmem:[%s4292_s25 + $0x3c] sm:$0xf] %vm2780_vm10, %v2763_v13  ;;  %vm2532_vm13 = vmor %vm2530_vm12, %vm2531_vm8  ;;  %vm2070_vm1 = vweird.f32 %v5025_v1 }
 0x230   : > { %v2057_v9 = vmul.f32 0.5, %v2056_v33  ;;  %vm2540_vm2 = vweird.f32 %v5033_v36 }
 0x231   : > { %v2828_v22 = vmul.f32 %v2699_v61, %v4255_v0  ;;  %v2053_v58 = vsel %vm2052_vm7, %v3457_v49, %v2049_v17  ;;  %v2527_v29 = vmul.f32 0.5, %v2526_v19 }
 0x232   : > { %v2220_v51 = vmul.f32 1.118034, %v2053_v58  ;;  %v2058_v20 = vsub.f32 1.5, %v2057_v9 }
 0x233   : > { %v3463_v11 = vpop.eup %3462  ;;  %v2860_v4 = vpack.c.bf16 %v2828_v22, %v2828_v22  ;;  %v2528_v60 = vsub.f32 1.5, %v2527_v29 }
 0x234   : > { %v2732_v40 = vmul.f32 %v2220_v51, %v4248_v59  ;;  %v2059_v12 = vmul.f32 %v3459_v48, %v2058_v20  ;;  %v2065_v3 = vmul.f32 %v3463_v11, %v5025_v1  ;;  %v3465_v30 = vpop.eup %3464  ;;  %v5045_v49 = vpop.xlane.xlu2 %2323  ;;  %vm2071_vm14 = vweird.f32 %v3463_v11 }
 0x235   : > { %2892 = vst.msk [vmem:[%s4346_s29 + $0x3c] sm:$0xf] %vm2780_vm10, %v2860_v4  ;;  %v2529_v0 = vmul.f32 %v3461_v16, %v2528_v60  ;;  %v2535_v59 = vmul.f32 %v3465_v30, %v5033_v36  ;;  %v5048_v57 = vpop.xlane.xlu1 %1846  ;;  %3466 = vrsqrt.f32 %v5045_v49  ;;  %vm2541_vm15 = vweird.f32 %v3465_v30  ;;  %vm2072_vm3 = vmor %vm2070_vm1, %vm2071_vm14 }
 0x236   : > { %v2764_v34 = vpack.c.bf16 %v2732_v40, %v2732_v40  ;;  %v2063_v52 = vsel %vm2062_vm11, %v3459_v48, %v2059_v12  ;;  %v2066_v50 = vmul.f32 %v3463_v11, %v2065_v3  ;;  %3468 = vrsqrt.f32 %v5048_v57  ;;  %vm2542_vm5 = vmor %vm2540_vm2, %vm2541_vm15 }
 0x237   : > { %v2221_v8 = vmul.f32 1.118034, %v2063_v52  ;;  %v2533_v46 = vsel %vm2532_vm13, %v3461_v16, %v2529_v0  ;;  %v2536_v18 = vmul.f32 %v3465_v30, %v2535_v59  ;;  %vm2550_vm7 = vweird.f32 %v5045_v49 }
 0x238   : > { %2797 = vst.msk [vmem:[%s4292_s25 + $0x40] sm:$0xf] %vm2780_vm10, %v2764_v34  ;;  %v2700_v13 = vmul.f32 1.118034, %v2533_v46  ;;  %v2067_v48 = vmul.f32 0.5, %v2066_v50  ;;  %vm2080_vm8 = vweird.f32 %v5048_v57 }
 0x239   : > { %v2733_v55 = vmul.f32 %v2221_v8, %v4270_v15  ;;  %v2537_v61 = vmul.f32 0.5, %v2536_v18 }
 0x23a   : > { %v2829_v33 = vmul.f32 %v2700_v13, %v4279_v43  ;;  %v2068_v19 = vsub.f32 1.5, %v2067_v48 }
 0x23b   : > { %v2765_v17 = vpack.c.bf16 %v2733_v55, %v2733_v55  ;;  %v2538_v9 = vsub.f32 1.5, %v2537_v61  ;;  %v3467_v58 = vpop.eup %3466 }
 0x23c   : > { %v2861_v16 = vpack.c.bf16 %v2829_v33, %v2829_v33  ;;  %v5056_v22 = vpop.xlane.xlu0 %2326  ;;  %v2069_v29 = vmul.f32 %v3463_v11, %v2068_v19  ;;  %v5061_v15 = vpop.xlane.xlu2 %1849  ;;  %v2545_v20 = vmul.f32 %v3467_v58, %v5045_v49  ;;  %vm2551_vm4 = vweird.f32 %v3467_v58 }
 0x23d   : > { %2798 = vst.msk [vmem:[%s4292_s25 + $0x44] sm:$0xf] %vm2780_vm10, %v2765_v17  ;;  %3470 = vrsqrt.f32 %v5056_v22  ;;  %v3469_v43 = vpop.eup %3468  ;;  %v2539_v51 = vmul.f32 %v3465_v30, %v2538_v9  ;;  %vm2552_vm0 = vmor %vm2550_vm7, %vm2551_vm4  ;;  %vm2560_vm13 = vweird.f32 %v5056_v22  ;;  %vm2090_vm14 = vweird.f32 %v5061_v15 }
 0x23e   : > { %2893 = vst.msk [vmem:[%s4346_s29 + $0x40] sm:$0xf] %vm2780_vm10, %v2861_v16  ;;  %3472 = vrsqrt.f32 %v5061_v15  ;;  %v2073_v4 = vsel %vm2072_vm3, %v3463_v11, %v2069_v29  ;;  %v2075_v1 = vmul.f32 %v3469_v43, %v5048_v57  ;;  %v2546_v12 = vmul.f32 %v3467_v58, %v2545_v20 }
 0x23f   : > { %v2543_v60 = vsel %vm2542_vm5, %v3465_v30, %v2539_v51  ;;  %v2222_v40 = vmul.f32 1.118034, %v2073_v4  ;;  %vm2081_vm6 = vweird.f32 %v3469_v43 }
 0x240   : > { %v2701_v3 = vmul.f32 1.118034, %v2543_v60  ;;  %v2076_v0 = vmul.f32 %v3469_v43, %v2075_v1  ;;  %v2547_v36 = vmul.f32 0.5, %v2546_v12  ;;  %vm2082_vm9 = vmor %vm2080_vm8, %vm2081_vm6 }
 0x241   : > { %v2734_v34 = vmul.f32 %v2222_v40, %v4310_v35 }
 0x242   : > { %v2830_v59 = vmul.f32 %v2701_v3, %v4314_v45  ;;  %v2077_v8 = vmul.f32 0.5, %v2076_v0  ;;  %v2548_v13 = vsub.f32 1.5, %v2547_v36 }
 0x243   : > { %v3471_v52 = vpop.eup %3470  ;;  %v2766_v50 = vpack.c.bf16 %v2734_v34, %v2734_v34 }
 0x244   : > { %v3473_v46 = vpop.eup %3472  ;;  %v2555_v11 = vmul.f32 %v3471_v52, %v5056_v22  ;;  %v5075_v30 = vpop.xlane.xlu0 %1852  ;;  %v2862_v18 = vpack.c.bf16 %v2830_v59, %v2830_v59  ;;  %v2078_v55 = vsub.f32 1.5, %v2077_v8  ;;  %v2549_v35 = vmul.f32 %v3467_v58, %v2548_v13 }
 0x245   : > { %v2085_v48 = vmul.f32 %v3473_v46, %v5061_v15  ;;  %2799 = vst.msk [vmem:[%s4292_s25 + $0x48] sm:$0xf] %vm2780_vm10, %v2766_v50  ;;  %v5081_v33 = vpop.xlane.xlu1 %2329  ;;  %3474 = vrsqrt.f32 %v5075_v30  ;;  %vm2561_vm11 = vweird.f32 %v3471_v52  ;;  %vm2091_vm12 = vweird.f32 %v3473_v46 }
 0x246   : > { %v2556_v45 = vmul.f32 %v3471_v52, %v2555_v11  ;;  %2894 = vst.msk [vmem:[%s4346_s29 + $0x44] sm:$0xf] %vm2780_vm10, %v2862_v18  ;;  %v2079_v61 = vmul.f32 %v3469_v43, %v2078_v55  ;;  %3476 = vrsqrt.f32 %v5081_v33  ;;  %v2553_v19 = vsel %vm2552_vm0, %v3467_v58, %v2549_v35  ;;  %vm2562_vm15 = vmor %vm2560_vm13, %vm2561_vm11 }
 0x247   : > { %v2086_v17 = vmul.f32 %v3473_v46, %v2085_v48  ;;  %v2702_v9 = vmul.f32 1.118034, %v2553_v19  ;;  %vm2092_vm1 = vmor %vm2090_vm14, %vm2091_vm12  ;;  %vm2100_vm5 = vweird.f32 %v5075_v30  ;;  %vm2570_vm4 = vweird.f32 %v5081_v33 }
 0x248   : > { %v2557_v16 = vmul.f32 0.5, %v2556_v45  ;;  %v2083_v49 = vsel %vm2082_vm9, %v3469_v43, %v2079_v61 }
 0x249   : > { %v2087_v29 = vmul.f32 0.5, %v2086_v17  ;;  %v2223_v51 = vmul.f32 1.118034, %v2083_v49  ;;  %v2831_v4 = vmul.f32 %v2702_v9, %v4356_v63 }
 0x24a   : > { %v2558_v20 = vsub.f32 1.5, %v2557_v16 }
 0x24b   : > { %v2088_v1 = vsub.f32 1.5, %v2087_v29  ;;  %v3475_v60 = vpop.eup %3474  ;;  %v2735_v57 = vmul.f32 %v2223_v51, %v4351_v53  ;;  %v2863_v12 = vpack.c.bf16 %v2831_v4, %v2831_v4 }
 0x24c   : > { %v2559_v40 = vmul.f32 %v3471_v52, %v2558_v20  ;;  %v3477_v58 = vpop.eup %3476  ;;  %v2095_v43 = vmul.f32 %v3475_v60, %v5075_v30  ;;  %vm2101_vm2 = vweird.f32 %v3475_v60 }
 0x24d   : > { %v2089_v3 = vmul.f32 %v3473_v46, %v2088_v1  ;;  %v2767_v0 = vpack.c.bf16 %v2735_v57, %v2735_v57  ;;  %v2565_v34 = vmul.f32 %v3477_v58, %v5081_v33  ;;  %v1856_v36 = vpop.xlane.xlu1 %1855  ;;  %2895 = vst.msk [vmem:[%s4346_s29 + $0x48] sm:$0xf] %vm2780_vm10, %v2863_v12  ;;  %vm2571_vm3 = vweird.f32 %v3477_v58  ;;  %vm2102_vm6 = vmor %vm2100_vm5, %vm2101_vm2 }
 0x24e   : > { %v2563_v63 = vsel %vm2562_vm15, %v3471_v52, %v2559_v40  ;;  %v2096_v22 = vmul.f32 %v3475_v60, %v2095_v43  ;;  %v2333_v8 = vpop.xlane.xlu2 %2332  ;;  %3478 = vrsqrt.f32 %v1856_v36  ;;  %vm2572_vm7 = vmor %vm2570_vm4, %vm2571_vm3  ;;  %vm2110_vm9 = vweird.f32 %v1856_v36 }
 0x24f   : > { %v2093_v53 = vsel %vm2092_vm1, %v3473_v46, %v2089_v3  ;;  %v2703_v59 = vmul.f32 1.118034, %v2563_v63  ;;  %2800 = vst.msk [vmem:[%s4292_s25 + $0x4c] sm:$0xf] %vm2780_vm10, %v2767_v0  ;;  %v2566_v50 = vmul.f32 %v3477_v58, %v2565_v34  ;;  %3480 = vrsqrt.f32 %v2333_v8 }
 0x250   : > { %v2224_v15 = vmul.f32 1.118034, %v2093_v53  ;;  %v2097_v52 = vmul.f32 0.5, %v2096_v22  ;;  %vm2580_vm11 = vweird.f32 %v2333_v8 }
 0x251   : > { %v2832_v13 = vmul.f32 %v2703_v59, %v4391_v5  ;;  %v2567_v18 = vmul.f32 0.5, %v2566_v50 }
 0x252   : > { %v2736_v11 = vmul.f32 %v2224_v15, %v4386_v27  ;;  %v2098_v48 = vsub.f32 1.5, %v2097_v52 }
 0x253   : > { %v2864_v55 = vpack.c.bf16 %v2832_v13, %v2832_v13  ;;  %v2568_v35 = vsub.f32 1.5, %v2567_v18 }
 0x254   : > { %v2768_v46 = vpack.c.bf16 %v2736_v11, %v2736_v11  ;;  %v3479_v45 = vpop.eup %3478  ;;  %v2099_v61 = vmul.f32 %v3475_v60, %v2098_v48 }
 0x255   : > { %2896 = vst.msk [vmem:[%s4346_s29 + $0x4c] sm:$0xf] %vm2780_vm10, %v2864_v55  ;;  %v3481_v17 = vpop.eup %3480  ;;  %v2569_v5 = vmul.f32 %v3477_v58, %v2568_v35  ;;  %v2105_v27 = vmul.f32 %v3479_v45, %v1856_v36  ;;  %v5107_v49 = vpop.xlane.xlu0 %2335  ;;  %vm2111_vm0 = vweird.f32 %v3479_v45 }
 0x256   : > { %2801 = vst.msk [vmem:[%s4292_s25 + $0x50] sm:$0xf] %vm2780_vm10, %v2768_v46  ;;  %v2103_v19 = vsel %vm2102_vm6, %v3475_v60, %v2099_v61  ;;  %v2575_v16 = vmul.f32 %v3481_v17, %v2333_v8  ;;  %v1859_v9 = vpop.xlane.xlu2 %1858  ;;  %vm2581_vm8 = vweird.f32 %v3481_v17  ;;  %vm2112_vm12 = vmor %vm2110_vm9, %vm2111_vm0  ;;  %vm2590_vm3 = vweird.f32 %v5107_v49 }
 0x257   : > { %v2573_v29 = vsel %vm2572_vm7, %v3477_v58, %v2569_v5  ;;  %v2225_v51 = vmul.f32 1.118034, %v2103_v19  ;;  %v2106_v20 = vmul.f32 %v3479_v45, %v2105_v27  ;;  %3482 = vrsqrt.f32 %v1859_v9  ;;  %vm2582_vm13 = vmor %vm2580_vm11, %vm2581_vm8 }
 0x258   : > { %v2704_v30 = vmul.f32 1.118034, %v2573_v29  ;;  %v2576_v4 = vmul.f32 %v3481_v17, %v2575_v16  ;;  %3484 = vrsqrt.f32 %v5107_v49  ;;  %vm2120_vm1 = vweird.f32 %v1859_v9 }
 0x259   : > { %v2737_v33 = vmul.f32 %v2225_v51, %v4417_v44  ;;  %v2107_v1 = vmul.f32 0.5, %v2106_v20 }
 0x25a   : > { %v2833_v57 = vmul.f32 %v2704_v30, %v4428_v47  ;;  %v2577_v60 = vmul.f32 0.5, %v2576_v4 }
 0x25b   : > { %v2769_v40 = vpack.c.bf16 %v2737_v33, %v2737_v33  ;;  %v2108_v12 = vsub.f32 1.5, %v2107_v1 }
 0x25c   : > { %v2865_v3 = vpack.c.bf16 %v2833_v57, %v2833_v57  ;;  %v2578_v58 = vsub.f32 1.5, %v2577_v60 }
 0x25d   : > { %v3483_v43 = vpop.eup %3482  ;;  %2802 = vst.msk [vmem:[%s4292_s25 + $0x54] sm:$0xf] %vm2780_vm10, %v2769_v40  ;;  %v2109_v0 = vmul.f32 %v3479_v45, %v2108_v12  ;;  %v2339_v47 = vpop.xlane.xlu1 %2338 }
 0x25e   : > { %v3485_v63 = vpop.eup %3484  ;;  %2897 = vst.msk [vmem:[%s4346_s29 + $0x50] sm:$0xf] %vm2780_vm10, %v2865_v3  ;;  %v2579_v34 = vmul.f32 %v3481_v17, %v2578_v58  ;;  %v2115_v44 = vmul.f32 %v3483_v43, %v1859_v9  ;;  %v5116_v53 = vpop.xlane.xlu0 %1861  ;;  %3486 = vrsqrt.f32 %v2339_v47  ;;  %vm2121_vm14 = vweird.f32 %v3483_v43 }
 0x25f   : > { %v2113_v59 = vsel %vm2112_vm12, %v3479_v45, %v2109_v0  ;;  %v2585_v22 = vmul.f32 %v3485_v63, %v5107_v49  ;;  %3488 = vrsqrt.f32 %v5116_v53  ;;  %vm2591_vm15 = vweird.f32 %v3485_v63  ;;  %vm2122_vm2 = vmor %vm2120_vm1, %vm2121_vm14 }
 0x260   : > { %v2583_v15 = vsel %vm2582_vm13, %v3481_v17, %v2579_v34  ;;  %v2226_v50 = vmul.f32 1.118034, %v2113_v59  ;;  %v2116_v13 = vmul.f32 %v3483_v43, %v2115_v44  ;;  %vm2592_vm5 = vmor %vm2590_vm3, %vm2591_vm15  ;;  %vm2600_vm6 = vweird.f32 %v2339_v47 }
 0x261   : > { %v2705_v36 = vmul.f32 1.118034, %v2583_v15  ;;  %v2586_v52 = vmul.f32 %v3485_v63, %v2585_v22  ;;  %vm2130_vm8 = vweird.f32 %v5116_v53 }
 0x262   : > { %v2738_v8 = vmul.f32 %v2226_v50, %v4457_v31  ;;  %v2117_v11 = vmul.f32 0.5, %v2116_v13 }
 0x263   : > { %v2834_v18 = vmul.f32 %v2705_v36, %v4475_v23  ;;  %v2587_v55 = vmul.f32 0.5, %v2586_v52 }
 0x264   : > { %v2770_v48 = vpack.c.bf16 %v2738_v8, %v2738_v8  ;;  %v2118_v46 = vsub.f32 1.5, %v2117_v11  ;;  %v3487_v35 = vpop.eup %3486 }
 0x265   : > { %v2866_v45 = vpack.c.bf16 %v2834_v18, %v2834_v18  ;;  %v2588_v61 = vsub.f32 1.5, %v2587_v55  ;;  %v2595_v5 = vmul.f32 %v3487_v35, %v2339_v47  ;;  %v5124_v27 = vpop.xlane.xlu2 %2341  ;;  %v5126_v31 = vpop.xlane.xlu1 %1864  ;;  %vm2601_vm4 = vweird.f32 %v3487_v35 }
 0x266   : > { %2803 = vst.msk [vmem:[%s4292_s25 + $0x58] sm:$0xf] %vm2780_vm10, %v2770_v48  ;;  %v2119_v17 = vmul.f32 %v3483_v43, %v2118_v46  ;;  %v3489_v19 = vpop.eup %3488  ;;  %3490 = vrsqrt.f32 %v5124_v27  ;;  %vm2602_vm0 = vmor %vm2600_vm6, %vm2601_vm4  ;;  %vm2610_vm12 = vweird.f32 %v5124_v27  ;;  %vm2140_vm15 = vweird.f32 %v5126_v31 }
 0x267   : > { %2898 = vst.msk [vmem:[%s4346_s29 + $0x54] sm:$0xf] %vm2780_vm10, %v2866_v45  ;;  %v2589_v23 = vmul.f32 %v3485_v63, %v2588_v61  ;;  %v2596_v29 = vmul.f32 %v3487_v35, %v2595_v5  ;;  %v2125_v51 = vmul.f32 %v3489_v19, %v5116_v53  ;;  %3492 = vrsqrt.f32 %v5126_v31 }
 0x268   : > { %v2123_v16 = vsel %vm2122_vm2, %v3483_v43, %v2119_v17  ;;  %vm2131_vm7 = vweird.f32 %v3489_v19 }
 0x269   : > { %v2227_v9 = vmul.f32 1.118034, %v2123_v16  ;;  %v2593_v20 = vsel %vm2592_vm5, %v3485_v63, %v2589_v23  ;;  %v2597_v4 = vmul.f32 0.5, %v2596_v29  ;;  %v2126_v33 = vmul.f32 %v3489_v19, %v2125_v51  ;;  %vm2132_vm9 = vmor %vm2130_vm8, %vm2131_vm7 }
 0x26a   : > { %v2706_v30 = vmul.f32 1.118034, %v2593_v20 }
 0x26b   : > { %v2739_v1 = vmul.f32 %v2227_v9, %v4528_v7  ;;  %v2598_v49 = vsub.f32 1.5, %v2597_v4  ;;  %v2127_v60 = vmul.f32 0.5, %v2126_v33 }
 0x26c   : > { %v2835_v57 = vmul.f32 %v2706_v30, %v4521_v25  ;;  %v3491_v40 = vpop.eup %3490 }
 0x26d   : > { %v2771_v12 = vpack.c.bf16 %v2739_v1, %v2739_v1  ;;  %v2599_v58 = vmul.f32 %v3487_v35, %v2598_v49  ;;  %v2128_v43 = vsub.f32 1.5, %v2127_v60  ;;  %v2605_v0 = vmul.f32 %v3491_v40, %v5124_v27  ;;  %v5137_v63 = vpop.xlane.xlu2 %1867  ;;  %v3493_v34 = vpop.eup %3492 }
 0x26e   : > { %v2867_v3 = vpack.c.bf16 %v2835_v57, %v2835_v57  ;;  %3494 = vrsqrt.f32 %v5137_v63  ;;  %v2135_v47 = vmul.f32 %v3493_v34, %v5126_v31  ;;  %v5146_v59 = vpop.xlane.xlu0 %2344  ;;  %vm2611_vm11 = vweird.f32 %v3491_v40 }
 0x26f   : > { %2804 = vst.msk [vmem:[%s4292_s25 + $0x5c] sm:$0xf] %vm2780_vm10, %v2771_v12  ;;  %v2603_v25 = vsel %vm2602_vm0, %v3487_v35, %v2599_v58  ;;  %v2129_v7 = vmul.f32 %v3489_v19, %v2128_v43  ;;  %v2606_v44 = vmul.f32 %v3491_v40, %v2605_v0  ;;  %3496 = vrsqrt.f32 %v5146_v59  ;;  %vm2612_vm14 = vmor %vm2610_vm12, %vm2611_vm11 }
 0x270   : > { %2899 = vst.msk [vmem:[%s4346_s29 + $0x58] sm:$0xf] %vm2780_vm10, %v2867_v3  ;;  %v2707_v22 = vmul.f32 1.118034, %v2603_v25  ;;  %v2136_v53 = vmul.f32 %v3493_v34, %v2135_v47  ;;  %vm2141_vm13 = vweird.f32 %v3493_v34  ;;  %vm2150_vm3 = vweird.f32 %v5137_v63 }
 0x271   : > { %v2133_v15 = vsel %vm2132_vm9, %v3489_v19, %v2129_v7  ;;  %v2607_v50 = vmul.f32 0.5, %v2606_v44  ;;  %vm2142_vm1 = vmor %vm2140_vm15, %vm2141_vm13  ;;  %vm2620_vm6 = vweird.f32 %v5146_v59 }
 0x272   : > { %v2836_v13 = vmul.f32 %v2707_v22, %v4572_v32  ;;  %v2228_v36 = vmul.f32 1.118034, %v2133_v15  ;;  %v2137_v8 = vmul.f32 0.5, %v2136_v53 }
 0x273   : > { %v2608_v52 = vsub.f32 1.5, %v2607_v50 }
 0x274   : > { %v3495_v11 = vpop.eup %3494  ;;  %v2868_v18 = vpack.c.bf16 %v2836_v13, %v2836_v13  ;;  %v2740_v55 = vmul.f32 %v2228_v36, %v4577_v38  ;;  %v2138_v46 = vsub.f32 1.5, %v2137_v8 }
 0x275   : > { %v2609_v48 = vmul.f32 %v3491_v40, %v2608_v52  ;;  %v2145_v35 = vmul.f32 %v3495_v11, %v5137_v63  ;;  %v3497_v45 = vpop.eup %3496  ;;  %vm2151_vm2 = vweird.f32 %v3495_v11 }
 0x276   : > { %2900 = vst.msk [vmem:[%s4346_s29 + $0x5c] sm:$0xf] %vm2780_vm10, %v2868_v18  ;;  %v2772_v32 = vpack.c.bf16 %v2740_v55, %v2740_v55  ;;  %v2139_v17 = vmul.f32 %v3493_v34, %v2138_v46  ;;  %v2615_v38 = vmul.f32 %v3497_v45, %v5146_v59  ;;  %v5158_v19 = vpop.xlane.xlu1 %2347  ;;  %vm2621_vm5 = vweird.f32 %v3497_v45  ;;  %vm2152_vm4 = vmor %vm2150_vm3, %vm2151_vm2 }
 0x277   : > { %v2613_v61 = vsel %vm2612_vm14, %v3491_v40, %v2609_v48  ;;  %v2146_v5 = vmul.f32 %v3495_v11, %v2145_v35  ;;  %v5160_v27 = vpop.xlane.xlu0 %1870  ;;  %3498 = vrsqrt.f32 %v5158_v19  ;;  %vm2622_vm7 = vmor %vm2620_vm6, %vm2621_vm5  ;;  %vm2630_vm9 = vweird.f32 %v5158_v19 }
 0x278   : > { %2805 = vst.msk [vmem:[%s4292_s25 + $0x60] sm:$0xf] %vm2780_vm10, %v2772_v32  ;;  %v2708_v23 = vmul.f32 1.118034, %v2613_v61  ;;  %v2143_v16 = vsel %vm2142_vm1, %v3493_v34, %v2139_v17  ;;  %v2616_v31 = vmul.f32 %v3497_v45, %v2615_v38  ;;  %3500 = vrsqrt.f32 %v5160_v27 }
 0x279   : > { %v2147_v29 = vmul.f32 0.5, %v2146_v5  ;;  %v2229_v9 = vmul.f32 1.118034, %v2143_v16  ;;  %vm2160_vm12 = vweird.f32 %v5160_v27 }
 0x27a   : > { %v2837_v51 = vmul.f32 %v2708_v23, %v4626_v56  ;;  %v2617_v30 = vmul.f32 0.5, %v2616_v31 }
 0x27b   : > { %v2148_v20 = vsub.f32 1.5, %v2147_v29  ;;  %v2741_v33 = vmul.f32 %v2229_v9, %v4623_v10 }
 0x27c   : > { %v2869_v4 = vpack.c.bf16 %v2837_v51, %v2837_v51  ;;  %v2618_v57 = vsub.f32 1.5, %v2617_v30 }
 0x27d   : > { %v2149_v1 = vmul.f32 %v3495_v11, %v2148_v20  ;;  %v3499_v49 = vpop.eup %3498  ;;  %v2773_v60 = vpack.c.bf16 %v2741_v33, %v2741_v33 }
 0x27e   : > { %2901 = vst.msk [vmem:[%s4346_s29 + $0x60] sm:$0xf] %vm2780_vm10, %v2869_v4  ;;  %v3501_v56 = vpop.eup %3500  ;;  %v2619_v3 = vmul.f32 %v3497_v45, %v2618_v57  ;;  %v2625_v10 = vmul.f32 %v3499_v49, %v5158_v19  ;;  %v5176_v58 = vpop.xlane.xlu1 %1873  ;;  %vm2631_vm0 = vweird.f32 %v3499_v49 }
 0x27f   : > { %v5172_v40 = vpop.xlane.xlu2 %2350  ;;  %v2153_v12 = vsel %vm2152_vm4, %v3495_v11, %v2149_v1  ;;  %2806 = vst.msk [vmem:[%s4292_s25 + $0x64] sm:$0xf] %vm2780_vm10, %v2773_v60  ;;  %v2155_v0 = vmul.f32 %v3501_v56, %v5160_v27  ;;  %vm2161_vm8 = vweird.f32 %v3501_v56  ;;  %vm2632_vm11 = vmor %vm2630_vm9, %vm2631_vm0  ;;  %vm2170_vm3 = vweird.f32 %v5176_v58 }
 0x280   : > { %v2230_v43 = vmul.f32 1.118034, %v2153_v12  ;;  %3502 = vrsqrt.f32 %v5172_v40  ;;  %v2623_v63 = vsel %vm2622_vm7, %v3497_v45, %v2619_v3  ;;  %v2626_v34 = vmul.f32 %v3499_v49, %v2625_v10  ;;  %vm2162_vm13 = vmor %vm2160_vm12, %vm2161_vm8 }
 0x281   : > { %3504 = vrsqrt.f32 %v5176_v58  ;;  %v2709_v7 = vmul.f32 1.118034, %v2623_v63  ;;  %v2156_v44 = vmul.f32 %v3501_v56, %v2155_v0  ;;  %vm2640_vm1 = vweird.f32 %v5172_v40 }
 0x282   : > { %v2742_v25 = vmul.f32 %v2230_v43, %v4675_v41  ;;  %v2627_v47 = vmul.f32 0.5, %v2626_v34 }
 0x283   : > { %v2838_v22 = vmul.f32 %v2709_v7, %v4678_v42  ;;  %v2157_v15 = vmul.f32 0.5, %v2156_v44 }
 0x284   : > { %v2774_v59 = vpack.c.bf16 %v2742_v25, %v2742_v25  ;;  %v2628_v50 = vsub.f32 1.5, %v2627_v47 }
 0x285   : > { %v5185_v53 = vpop.xlane.xlu0 %2353  ;;  %v2870_v36 = vpack.c.bf16 %v2838_v22, %v2838_v22  ;;  %v2158_v52 = vsub.f32 1.5, %v2157_v15 }
 0x286   : > { %v3503_v13 = vpop.eup %3502  ;;  %2807 = vst.msk [vmem:[%s4292_s25 + $0x68] sm:$0xf] %vm2780_vm10, %v2774_v59  ;;  %3506 = vrsqrt.f32 %v5185_v53  ;;  %v2629_v11 = vmul.f32 %v3499_v49, %v2628_v50  ;;  %vm2650_vm7 = vweird.f32 %v5185_v53 }
 0x287   : > { %v5189_v8 = vpop.xlane.xlu2 %1876  ;;  %v3505_v41 = vpop.eup %3504  ;;  %v2635_v42 = vmul.f32 %v3503_v13, %v5172_v40  ;;  %2902 = vst.msk [vmem:[%s4346_s29 + $0x64] sm:$0xf] %vm2780_vm10, %v2870_v36  ;;  %v2159_v18 = vmul.f32 %v3501_v56, %v2158_v52  ;;  %vm2641_vm14 = vweird.f32 %v3503_v13 }
 0x288   : > { %3508 = vrsqrt.f32 %v5189_v8  ;;  %v2165_v55 = vmul.f32 %v3505_v41, %v5176_v58  ;;  %v2633_v48 = vsel %vm2632_vm11, %v3499_v49, %v2629_v11  ;;  %vm2171_vm15 = vweird.f32 %v3505_v41  ;;  %vm2642_vm2 = vmor %vm2640_vm1, %vm2641_vm14 }
 0x289   : > { %v2636_v46 = vmul.f32 %v3503_v13, %v2635_v42  ;;  %v2710_v35 = vmul.f32 1.118034, %v2633_v48  ;;  %v2163_v45 = vsel %vm2162_vm13, %v3501_v56, %v2159_v18  ;;  %vm2172_vm5 = vmor %vm2170_vm3, %vm2171_vm15  ;;  %vm2180_vm0 = vweird.f32 %v5189_v8 }
 0x28a   : > { %v2166_v32 = vmul.f32 %v3505_v41, %v2165_v55  ;;  %v2231_v61 = vmul.f32 1.118034, %v2163_v45 }
 0x28b   : > { %v2637_v17 = vmul.f32 0.5, %v2636_v46  ;;  %v2839_v38 = vmul.f32 %v2710_v35, %v4728_v54 }
 0x28c   : > { %v3507_v5 = vpop.eup %3506  ;;  %v2167_v19 = vmul.f32 0.5, %v2166_v32  ;;  %v2743_v16 = vmul.f32 %v2231_v61, %v4734_v6 }
 0x28d   : > { %v2638_v29 = vsub.f32 1.5, %v2637_v17  ;;  %v2645_v27 = vmul.f32 %v3507_v5, %v5185_v53  ;;  %v2871_v31 = vpack.c.bf16 %v2839_v38, %v2839_v38  ;;  %vm2651_vm4 = vweird.f32 %v3507_v5 }
 0x28e   : > { %v3509_v23 = vpop.eup %3508  ;;  %v2168_v51 = vsub.f32 1.5, %v2167_v19  ;;  %v2775_v20 = vpack.c.bf16 %v2743_v16, %v2743_v16  ;;  %vm2652_vm8 = vmor %vm2650_vm7, %vm2651_vm4 }
 0x28f   : > { %v2175_v9 = vmul.f32 %v3509_v23, %v5189_v8  ;;  %v2639_v30 = vmul.f32 %v3503_v13, %v2638_v29  ;;  %v2646_v54 = vmul.f32 %v3507_v5, %v2645_v27  ;;  %2903 = vst.msk [vmem:[%s4346_s29 + $0x68] sm:$0xf] %vm2780_vm10, %v2871_v31  ;;  %vm2181_vm6 = vweird.f32 %v3509_v23 }
 0x290   : > { %v5205_v4 = vpop.xlane.xlu0 %1879  ;;  %v2169_v6 = vmul.f32 %v3505_v41, %v2168_v51  ;;  %2808 = vst.msk [vmem:[%s4292_s25 + $0x6c] sm:$0xf] %vm2780_vm10, %v2775_v20  ;;  %vm2182_vm9 = vmor %vm2180_vm0, %vm2181_vm6 }
 0x291   : > { %v2176_v33 = vmul.f32 %v3509_v23, %v2175_v9  ;;  %3510 = vrsqrt.f32 %v5205_v4  ;;  %v2643_v1 = vsel %vm2642_vm2, %v3503_v13, %v2639_v30  ;;  %v2647_v57 = vmul.f32 0.5, %v2646_v54 }
 0x292   : > { %v2711_v49 = vmul.f32 1.118034, %v2643_v1  ;;  %v2173_v60 = vsel %vm2172_vm5, %v3505_v41, %v2169_v6  ;;  %vm2190_vm12 = vweird.f32 %v5205_v4 }
 0x293   : > { %v2177_v40 = vmul.f32 0.5, %v2176_v33  ;;  %v2232_v56 = vmul.f32 1.118034, %v2173_v60  ;;  %v2648_v12 = vsub.f32 1.5, %v2647_v57  ;;  %v1883_v3 = vpop.xlane.xlu1 %1882 }
 0x294   : > { %v2840_v10 = vmul.f32 %v2711_v49, %v4794_v26  ;;  %3512 = vrsqrt.f32 %v1883_v3  ;;  %vm2200_vm15 = vweird.f32 %v1883_v3 }
 0x295   : > { %v2178_v43 = vsub.f32 1.5, %v2177_v40  ;;  %v2744_v58 = vmul.f32 %v2232_v56, %v4786_v39  ;;  %v2649_v0 = vmul.f32 %v3507_v5, %v2648_v12 }
 0x296   : > { %v2872_v34 = vpack.c.bf16 %v2840_v10, %v2840_v10  ;;  %v2360_v7 = vpop.xlane.xlu2 %2359 }
 0x297   : > { %v3511_v63 = vpop.eup %3510  ;;  %v2179_v25 = vmul.f32 %v3509_v23, %v2178_v43  ;;  %v2776_v44 = vpack.c.bf16 %v2744_v58, %v2744_v58  ;;  %v2653_v26 = vsel %vm2652_vm8, %v3507_v5, %v2649_v0  ;;  %3514 = vrsqrt.f32 %v2360_v7 }
 0x298   : > { %v2185_v47 = vmul.f32 %v3511_v63, %v5205_v4  ;;  %2904 = vst.msk [vmem:[%s4346_s29 + $0x6c] sm:$0xf] %vm2780_vm10, %v2872_v34  ;;  %v2712_v39 = vmul.f32 1.118034, %v2653_v26  ;;  %vm2191_vm11 = vweird.f32 %v3511_v63  ;;  %vm2670_vm3 = vweird.f32 %v2360_v7 }
 0x299   : > { %v2183_v59 = vsel %vm2182_vm9, %v3509_v23, %v2179_v25  ;;  %2809 = vst.msk [vmem:[%s4292_s25 + $0x70] sm:$0xf] %vm2780_vm10, %v2776_v44  ;;  %vm2192_vm13 = vmor %vm2190_vm12, %vm2191_vm11 }
 0x29a   : > { %v2233_v22 = vmul.f32 1.118034, %v2183_v59  ;;  %v2186_v15 = vmul.f32 %v3511_v63, %v2185_v47  ;;  %v3513_v50 = vpop.eup %3512  ;;  %v2841_v53 = vmul.f32 %v2712_v39, %v4844_v21 }
 0x29b   : > { %v2195_v52 = vmul.f32 %v3513_v50, %v1883_v3  ;;  %v2357_v8 = vpop.xlane.xlu1 %2356  ;;  %v2363_v11 = vpop.xlane.xlu0 %2362  ;;  %vm2201_vm14 = vweird.f32 %v3513_v50 }
 0x29c   : > { %v2745_v13 = vmul.f32 %v2233_v22, %v4839_v14  ;;  %v2187_v36 = vmul.f32 0.5, %v2186_v15  ;;  %v2873_v41 = vpack.c.bf16 %v2841_v53, %v2841_v53  ;;  %3516 = vrsqrt.f32 %v2357_v8  ;;  %vm2202_vm1 = vmor %vm2200_vm15, %vm2201_vm14 }
 0x29d   : > { %v2196_v55 = vmul.f32 %v3513_v50, %v2195_v52  ;;  %3518 = vrsqrt.f32 %v2363_v11  ;;  %v3515_v48 = vpop.eup %3514  ;;  %vm2660_vm7 = vweird.f32 %v2357_v8  ;;  %vm2680_vm8 = vweird.f32 %v2363_v11 }
 0x29e   : > { %v2777_v42 = vpack.c.bf16 %v2745_v13, %v2745_v13  ;;  %v2188_v18 = vsub.f32 1.5, %v2187_v36  ;;  %2905 = vst.msk [vmem:[%s4346_s29 + $0x70] sm:$0xf] %vm2780_vm10, %v2873_v41  ;;  %v2665_v21 = vmul.f32 %v3515_v48, %v2360_v7  ;;  %vm2671_vm2 = vweird.f32 %v3515_v48 }
 0x29f   : > { %v2197_v14 = vmul.f32 0.5, %v2196_v55  ;;  %vm2672_vm5 = vmor %vm2670_vm3, %vm2671_vm2 }
 0x2a0   : > { %2810 = vst.msk [vmem:[%s4292_s25 + $0x74] sm:$0xf] %vm2780_vm10, %v2777_v42  ;;  %v2189_v46 = vmul.f32 %v3511_v63, %v2188_v18  ;;  %v2666_v32 = vmul.f32 %v3515_v48, %v2665_v21 }
 0x2a1   : > { %v2198_v45 = vsub.f32 1.5, %v2197_v14 }
 0x2a2   : > { %v2193_v35 = vsel %vm2192_vm13, %v3511_v63, %v2189_v46  ;;  %v3517_v61 = vpop.eup %3516  ;;  %v2667_v19 = vmul.f32 0.5, %v2666_v32 }
 0x2a3   : > { %v2234_v17 = vmul.f32 1.118034, %v2193_v35  ;;  %v3519_v5 = vpop.eup %3518  ;;  %v2199_v38 = vmul.f32 %v3513_v50, %v2198_v45  ;;  %v2655_v23 = vmul.f32 %v3517_v61, %v2357_v8  ;;  %vm2661_vm4 = vweird.f32 %v3517_v61 }
 0x2a4   : > { %v2675_v29 = vmul.f32 %v3519_v5, %v2363_v11  ;;  %v2668_v31 = vsub.f32 1.5, %v2667_v19  ;;  %vm2681_vm6 = vweird.f32 %v3519_v5  ;;  %vm2662_vm0 = vmor %vm2660_vm7, %vm2661_vm4 }
 0x2a5   : > { %v2746_v16 = vmul.f32 %v2234_v17, %v4900_v37  ;;  %v2203_v27 = vsel %vm2202_vm1, %v3513_v50, %v2199_v38  ;;  %v2656_v51 = vmul.f32 %v3517_v61, %v2655_v23  ;;  %vm2682_vm9 = vmor %vm2680_vm8, %vm2681_vm6 }
 0x2a6   : > { %v2235_v20 = vmul.f32 1.118034, %v2203_v27  ;;  %v2676_v30 = vmul.f32 %v3519_v5, %v2675_v29  ;;  %v2669_v54 = vmul.f32 %v3515_v48, %v2668_v31 }
 0x2a7   : > { %v2778_v9 = vpack.c.bf16 %v2746_v16, %v2746_v16  ;;  %v2657_v4 = vmul.f32 0.5, %v2656_v51 }
 0x2a8   : > { %v2747_v6 = vmul.f32 %v2235_v20, %v4938_v62  ;;  %v2677_v33 = vmul.f32 0.5, %v2676_v30  ;;  %v2673_v37 = vsel %vm2672_vm5, %v3515_v48, %v2669_v54 }
 0x2a9   : > { %2811 = vst.msk [vmem:[%s4292_s25 + $0x78] sm:$0xf] %vm2780_vm10, %v2778_v9  ;;  %v2658_v1 = vsub.f32 1.5, %v2657_v4  ;;  %v2714_v49 = vmul.f32 1.118034, %v2673_v37 }
 0x2aa   : > { %v2779_v57 = vpack.c.bf16 %v2747_v6, %v2747_v6  ;;  %v2678_v60 = vsub.f32 1.5, %v2677_v33 }
 0x2ab   : > { %v2659_v40 = vmul.f32 %v3517_v61, %v2658_v1  ;;  %v2843_v56 = vmul.f32 %v2714_v49, %v4945_v2 }
 0x2ac   : > { %2812 = vst.msk [vmem:[%s4292_s25 + $0x7c] sm:$0xf] %vm2780_vm10, %v2779_v57  ;;  %v2679_v62 = vmul.f32 %v3519_v5, %v2678_v60 }
 0x2ad   : > { %v2663_v12 = vsel %vm2662_vm0, %v3517_v61, %v2659_v40  ;;  %v2875_v3 = vpack.c.bf16 %v2843_v56, %v2843_v56 }
 0x2ae   : > { %v2713_v10 = vmul.f32 1.118034, %v2663_v12  ;;  %v2683_v43 = vsel %vm2682_vm9, %v3519_v5, %v2679_v62 }
 0x2af   : > { %v2715_v58 = vmul.f32 1.118034, %v2683_v43  ;;  %2907 = vst.msk [vmem:[%s4346_s29 + $0x78] sm:$0xf] %vm2780_vm10, %v2875_v3 }
 0x2b0   : > { %v2842_v0 = vmul.f32 %v2713_v10, %v4918_v24 }
 0x2b1   : > { %v2844_v63 = vmul.f32 %v2715_v58, %v4990_v28 }
 0x2b2   : > { %v2874_v34 = vpack.c.bf16 %v2842_v0, %v2842_v0 }
 0x2b3   : > { %v2876_v25 = vpack.c.bf16 %v2844_v63, %v2844_v63 }
 0x2b4   : > { %2906 = vst.msk [vmem:[%s4346_s29 + $0x74] sm:$0xf] %vm2780_vm10, %v2874_v34 }
 0x2b5   : > { %2908 = vst.msk [vmem:[%s4346_s29 + $0x7c] sm:$0xf] %vm2780_vm10, %v2876_v25 }
 0x2b6 PF: > { %s19_s27 = sadd.s32 1, %s3529_s27  }
 0x2b7   : > { %p16_p4 = scmp.ge.s32.totalorder %s19_s27, 4  }
 0x2b9   :  { %18 = sbr.rel (!%p16_p4) target bundleno = 1 (0x1), region = 101 }

</bundles_post_ra>
